<compile_context>
chip_gen: v7x
topology: tpu7x:2x2x1
jax: 0.10.0
libtpu: 0.0.40
codegen_flags: <defaults>
</compile_context>

<pallas_src>
import functools
import math

import jax
import jax.numpy as jnp
from jax import lax
from jax.experimental import pallas as pl
from jax.experimental.pallas import tpu as pltpu

DILATION_RATES = (3, 6, 9)
GEM_P = 3.0          # GeM p is a frozen Parameter (requires_grad=False) == 3
GEM_EPS = 1e-6
BN_EPS = 1e-5


def _softplus(x):
    # Matches torch.nn.Softplus (beta=1, threshold=20).
    return jnp.where(x > 20.0, x, jnp.log(1.0 + jnp.exp(jnp.minimum(x, 20.0))))


# ---------------------------------------------------------------------------
# Generic fused matmul + bias (+ optional ReLU).  Every 1x1 conv over NHWC is
# a matmul over the channel axis, so this one kernel serves conv1x1_1/2, the
# GAP-branch 1x1 conv, fc_1 and fc_2.  Shapes are small => single whole-array
# block (full K and lane-dense N resident in VMEM).
# ---------------------------------------------------------------------------
def _linear_kernel(x_ref, w_ref, b_ref, o_ref, *, activation):
    y = jnp.dot(x_ref[...], w_ref[...], preferred_element_type=jnp.float32)
    y = y + b_ref[...]
    if activation == "relu":
        y = jnp.maximum(y, 0.0)
    o_ref[...] = y.astype(o_ref.dtype)


def linear(x, w, b, activation="none"):
    m, _ = x.shape
    n = w.shape[1]
    m_pad = (-m) % 8                     # keep the sublane dim a multiple of 8
    if m_pad:
        x = jnp.pad(x, ((0, m_pad), (0, 0)))
    out = pl.pallas_call(
        functools.partial(_linear_kernel, activation=activation),
        out_shape=jax.ShapeDtypeStruct((m + m_pad, n), x.dtype),
    )(x, w, b.reshape(1, n))
    return out[:m] if m_pad else out


# ---------------------------------------------------------------------------
# Dilated 3x3 conv (padding == dilation), channels-last.  The wrapper zero-pads
# spatially and extracts the nine shifted taps as flat (HW, Cin) slabs (pure
# layout plumbing); the kernel does nine (HW, Cin) @ (Cin, Cout) MXU matmuls
# and one lane-dense (HW, Cout) store per image.
# ---------------------------------------------------------------------------
def _dilated_conv3x3_kernel(x_ref, w_ref, b_ref, o_ref):
    # x_ref: (9, 1, HW, Cin)   nine shifted taps
    # w_ref: (9, Cin, Cout)    flattened HWIO weights
    # b_ref: (1, Cout)
    # o_ref: (1, HW, Cout)
    hw, c_out = o_ref.shape[1], o_ref.shape[2]
    acc = jnp.zeros((hw, c_out), jnp.float32)
    for k in range(9):
        acc = acc + jnp.dot(x_ref[k, 0], w_ref[k],
                            preferred_element_type=jnp.float32)
    o_ref[0] = (acc + b_ref[...]).astype(o_ref.dtype)


def dilated_conv3x3(x_nhwc, w, b, rate):
    B, H, W, Cin = x_nhwc.shape
    Cout = w.shape[-1]
    xp = jnp.pad(x_nhwc, ((0, 0), (rate, rate), (rate, rate), (0, 0)))
    taps = jnp.stack(
        [xp[:, di * rate:di * rate + H, dj * rate:dj * rate + W, :]
           .reshape(B, H * W, Cin)
         for di in range(3) for dj in range(3)], axis=0)      # (9, B, HW, Cin)
    w9 = w.reshape(9, Cin, Cout)
    return pl.pallas_call(
        _dilated_conv3x3_kernel,
        out_shape=jax.ShapeDtypeStruct((B, H * W, Cout), x_nhwc.dtype),
        grid_spec=pltpu.PrefetchScalarGridSpec(
            num_scalar_prefetch=0,
            grid=(B,),
            in_specs=[
                pl.BlockSpec((9, 1, H * W, Cin), lambda i: (0, i, 0, 0)),
                pl.BlockSpec((9, Cin, Cout), lambda i: (0, 0, 0)),
                pl.BlockSpec((1, Cout), lambda i: (0, 0)),
            ],
            out_specs=pl.BlockSpec((1, H * W, Cout), lambda i: (i, 0, 0)),
        ),
        compiler_params=pltpu.CompilerParams(dimension_semantics=("parallel",)),
    )(taps, w9, b.reshape(1, Cout))


# ---------------------------------------------------------------------------
# GeM pooling: avg_pool(clamp(x, eps)^p)^(1/p) over the full spatial extent.
# p = 3 is baked (frozen parameter).
# ---------------------------------------------------------------------------
def _gem_kernel(x_ref, o_ref, *, eps):
    x = jnp.maximum(x_ref[0], eps)               # (HW, C) clamp(min=eps)
    x = x * x * x                                # pow(p), p == 3
    m = jnp.mean(x, axis=0, keepdims=True)       # (1, C)
    o_ref[0] = jnp.exp(jnp.log(m) / GEM_P).astype(o_ref.dtype)   # pow(1/p)


def gem_pool(x_nchw, eps=GEM_EPS):
    B, C, H, W = x_nchw.shape
    x = jnp.transpose(x_nchw, (0, 2, 3, 1)).reshape(B, H * W, C)
    out = pl.pallas_call(
        functools.partial(_gem_kernel, eps=eps),
        out_shape=jax.ShapeDtypeStruct((B, 1, C), x.dtype),
        grid_spec=pltpu.PrefetchScalarGridSpec(
            num_scalar_prefetch=0,
            grid=(B,),
            in_specs=[pl.BlockSpec((1, H * W, C), lambda i: (i, 0, 0))],
            out_specs=pl.BlockSpec((1, 1, C), lambda i: (i, 0, 0)),
        ),
        compiler_params=pltpu.CompilerParams(dimension_semantics=("parallel",)),
    )(x)
    return out.reshape(B, C)


# ---------------------------------------------------------------------------
# Local-branch head: attention = softplus(conv1x1_3(relu(x)));
#                    out = l2_normalize(x, channel) * attention
# ---------------------------------------------------------------------------
def _local_head_kernel(x_ref, w_ref, b_ref, o_ref):
    x = x_ref[0]                                             # (HW, C)
    att = jnp.dot(jnp.maximum(x, 0.0), w_ref[...],
                  preferred_element_type=jnp.float32) + b_ref[...]
    att = _softplus(att)
    norm = jnp.sqrt(jnp.sum(x * x, axis=-1, keepdims=True))
    xn = x / jnp.maximum(norm, 1e-12)                        # F.normalize(p=2)
    o_ref[0] = (xn * att).astype(o_ref.dtype)


def local_head(x, w3, b3):
    B, HW, C = x.shape
    return pl.pallas_call(
        _local_head_kernel,
        out_shape=jax.ShapeDtypeStruct((B, HW, C), x.dtype),
        grid_spec=pltpu.PrefetchScalarGridSpec(
            num_scalar_prefetch=0,
            grid=(B,),
            in_specs=[
                pl.BlockSpec((1, HW, C), lambda i: (i, 0, 0)),
                pl.BlockSpec((C, C), lambda i: (0, 0)),
                pl.BlockSpec((1, C), lambda i: (0, 0)),
            ],
            out_specs=pl.BlockSpec((1, HW, C), lambda i: (i, 0, 0)),
        ),
        compiler_params=pltpu.CompilerParams(dimension_semantics=("parallel",)),
    )(x, w3, b3.reshape(1, C))


# ---------------------------------------------------------------------------
# OrthogonalFusion fused with the following GAP.  Because the spatial mean is
# linear, mean(local - proj) = mean(local) - (mean(local).g_unit) g_unit, so
# the kernel emits the pooled (1, 2C) vector directly and the (HW, 2C) fused
# map never leaves VMEM.
# ---------------------------------------------------------------------------
def _fusion_gap_kernel(l_ref, g_ref, o_ref):
    l = l_ref[0]                                             # (HW, C)
    g = g_ref[0]                                             # (1, C)
    c = l.shape[-1]
    g_norm = jnp.sqrt(jnp.sum(g * g, axis=-1, keepdims=True)) + 1e-6
    g_unit = g / g_norm                                      # (1, C)
    mean_l = jnp.mean(l, axis=0, keepdims=True)              # (1, C)
    s = jnp.sum(mean_l * g_unit, axis=-1, keepdims=True)     # (1, 1)
    orth_mean = mean_l - s * g_unit                          # (1, C)
    o_ref[0, :, :c] = g.astype(o_ref.dtype)
    o_ref[0, :, c:] = orth_mean.astype(o_ref.dtype)


def orthogonal_fusion_gap(local_flat, global_feat):
    B, HW, C = local_flat.shape
    out = pl.pallas_call(
        _fusion_gap_kernel,
        out_shape=jax.ShapeDtypeStruct((B, 1, 2 * C), local_flat.dtype),
        grid_spec=pltpu.PrefetchScalarGridSpec(
            num_scalar_prefetch=0,
            grid=(B,),
            in_specs=[
                pl.BlockSpec((1, HW, C), lambda i: (i, 0, 0)),
                pl.BlockSpec((1, 1, C), lambda i: (i, 0, 0)),
            ],
            out_specs=pl.BlockSpec((1, 1, 2 * C), lambda i: (i, 0, 0)),
        ),
        compiler_params=pltpu.CompilerParams(dimension_semantics=("parallel",)),
    )(local_flat, global_feat.reshape(B, 1, C))
    return out.reshape(B, 2 * C)


# ---------------------------------------------------------------------------
# Module wrappers
# ---------------------------------------------------------------------------
def local_branch(f3_nchw, params):
    B, _, H, W = f3_nchw.shape
    x = jnp.transpose(f3_nchw, (0, 2, 3, 1))                 # NHWC, lane = C
    # MultiAtrous: three dilated 3x3 convs + a global-average branch.
    branches = [dilated_conv3x3(x, w, b, r)                  # each (B, HW, C/4)
                for r, w, b in zip(DILATION_RATES, params["dil_w"], params["dil_b"])]
    gap = jnp.mean(x, axis=(1, 2))                           # AdaptiveAvgPool2d(1)
    gap = linear(gap, params["gap_w"], params["gap_b"], activation="relu")
    # bilinear upsample of a 1x1 map == constant broadcast
    branches.append(jnp.broadcast_to(gap[:, None, :], branches[0].shape))
    feat = jnp.concatenate(branches, axis=-1)                # (B, HW, hidden_ch)

    hidden_ch = feat.shape[-1]
    y = linear(feat.reshape(B * H * W, hidden_ch),
               params["w1"], params["b1"], activation="relu")   # conv1x1_1 + ReLU
    # conv1x1_2 (bias-free) with inference-mode BatchNorm folded in.
    # TODO(synk): training-mode BatchNorm (batch statistics) is not implemented.
    y = linear(y, params["w2f"], params["b2f"])
    y = y.reshape(B, H * W, y.shape[-1])
    return local_head(y, params["w3"], params["b3"])            # (B, HW, C)


def dolg_forward(f3, f2, params):
    # TODO(synk): timm tf_efficientnetv2_s backbone has no Pallas equivalent;
    # its two feature maps (out_indices 2 and 3) are taken as inputs here.
    local = local_branch(f3, params)                         # (B, HW, C)
    g = gem_pool(f2)                                         # GeM        (B, 64)
    g = linear(g, params["fc1_w"], params["fc1_b"])          # fc_1       (B, C)
    pooled = orthogonal_fusion_gap(local, g)                 # fusion+GAP (B, 2C)
    return linear(pooled, params["fc2_w"], params["fc2_b"])  # fc_2       (B, E)


# ---------------------------------------------------------------------------
# Pure-JAX reference (same parameters, HIGHEST-precision matmuls/convs).
# ---------------------------------------------------------------------------
def reference_forward(f3, f2, params):
    hi = lax.Precision.HIGHEST
    B = f3.shape[0]
    x = jnp.transpose(f3, (0, 2, 3, 1))
    branches = []
    for r, w, b in zip(DILATION_RATES, params["dil_w"], params["dil_b"]):
        y = lax.conv_general_dilated(
            x, w, window_strides=(1, 1), padding=((r, r), (r, r)),
            rhs_dilation=(r, r), dimension_numbers=("NHWC", "HWIO", "NHWC"),
            precision=hi) + b
        branches.append(y)
    gap = jnp.mean(x, axis=(1, 2))
    gap = jnp.maximum(jnp.dot(gap, params["gap_w"], precision=hi) + params["gap_b"], 0.0)
    branches.append(jnp.broadcast_to(gap[:, None, None, :], branches[0].shape))
    feat = jnp.concatenate(branches, axis=-1)
    y = jnp.maximum(
        jnp.einsum("bhwc,co->bhwo", feat, params["w1"], precision=hi) + params["b1"], 0.0)
    y = jnp.einsum("bhwc,co->bhwo", y, params["w2f"], precision=hi) + params["b2f"]
    att = _softplus(
        jnp.einsum("bhwc,co->bhwo", jnp.maximum(y, 0.0), params["w3"], precision=hi)
        + params["b3"])
    nrm = jnp.sqrt(jnp.sum(y * y, axis=-1, keepdims=True))
    local = (y / jnp.maximum(nrm, 1e-12)) * att
    H, W = local.shape[1:3]
    local = local.reshape(B, H * W, -1)

    g = jnp.maximum(f2, GEM_EPS) ** GEM_P
    g = jnp.mean(g, axis=(2, 3)) ** (1.0 / GEM_P)
    g = jnp.dot(g, params["fc1_w"], precision=hi) + params["fc1_b"]

    gn = jnp.sqrt(jnp.sum(g * g, axis=-1, keepdims=True)) + 1e-6
    gu = g / gn
    s = jnp.einsum("bnc,bc->bn", local, gu, precision=hi)
    orth = local - s[:, :, None] * gu[:, None, :]
    pooled = jnp.concatenate([g, jnp.mean(orth, axis=1)], axis=-1)
    return jnp.dot(pooled, params["fc2_w"], precision=hi) + params["fc2_b"]


if __name__ == "__main__":
    # Small shapes consistent with DOLGModel(image_size=128, hidden_dim=128,
    # embedding_size=64) on a tf_efficientnetv2_s-style backbone:
    #   out_index 2 feature: (B,  64, 16, 16) -> GeM -> fc_1
    #   out_index 3 feature: (B, 160,  8,  8) -> LocalBranch
    B = 2
    C_G, H2, W2 = 64, 16, 16
    C_L, H3, W3 = 160, 8, 8
    HIDDEN_CH = 512        # MultiAtrous hidden_channel (scaled from 2048)
    HIDDEN_DIM = 128       # DOLG hidden_dim            (scaled from 1024)
    EMBED = 64             # embedding_size             (scaled from 128)
    C_BR = HIDDEN_CH // 4

    key = jax.random.PRNGKey(0)
    _keys = iter(jax.random.split(key, 24))

    def w_init(shape, fan_in):
        return jax.random.normal(next(_keys), shape, jnp.float32) / math.sqrt(fan_in)

    def b_init(n):
        return 0.1 * jax.random.normal(next(_keys), (n,), jnp.float32)

    # conv1x1_2 is bias-free; fold inference-mode BatchNorm (fresh running
    # stats) into it: y = (x@W2) * scale + shift.
    w2 = w_init((HIDDEN_DIM, HIDDEN_DIM), HIDDEN_DIM)
    bn_gamma = jnp.ones((HIDDEN_DIM,), jnp.float32)
    bn_beta = jnp.zeros((HIDDEN_DIM,), jnp.float32)
    bn_mean = jnp.zeros((HIDDEN_DIM,), jnp.float32)
    bn_var = jnp.ones((HIDDEN_DIM,), jnp.float32)
    bn_scale = bn_gamma / jnp.sqrt(bn_var + BN_EPS)

    params = {
        "dil_w": [w_init((3, 3, C_L, C_BR), 9 * C_L) for _ in DILATION_RATES],
        "dil_b": [b_init(C_BR) for _ in DILATION_RATES],
        "gap_w": w_init((C_L, C_BR), C_L),
        "gap_b": b_init(C_BR),
        "w1": w_init((HIDDEN_CH, HIDDEN_DIM), HIDDEN_CH),
        "b1": b_init(HIDDEN_DIM),
        "w2f": w2 * bn_scale[None, :],
        "b2f": bn_beta - bn_mean * bn_scale,
        "w3": w_init((HIDDEN_DIM, HIDDEN_DIM), HIDDEN_DIM),
        "b3": b_init(HIDDEN_DIM),
        "fc1_w": w_init((C_G, HIDDEN_DIM), C_G),
        "fc1_b": b_init(HIDDEN_DIM),
        "fc2_w": w_init((2 * HIDDEN_DIM, EMBED), 2 * HIDDEN_DIM),
        "fc2_b": b_init(EMBED),
    }

    f3 = jax.random.normal(next(_keys), (B, C_L, H3, W3), jnp.float32)
    f2 = jax.random.normal(next(_keys), (B, C_G, H2, W2), jnp.float32)

    out = jax.jit(dolg_forward)(f3, f2, params)
    out = jax.block_until_ready(out)

    ref = reference_forward(f3, f2, params)
    assert out.shape == (B, EMBED), out.shape
    assert bool(jnp.all(jnp.isfinite(out)))
    max_err = float(jnp.max(jnp.abs(out - ref)))
    assert jnp.allclose(out, ref, rtol=2e-2, atol=2e-2), f"max abs err {max_err}"

    print("KERNEL_OK")
</pallas_src>

<mosaic_0001>
module attributes {stable_mosaic.version = 11 : i64} {
  func.func @_linear_kernel(%arg0: memref<8x160xf32, #tpu.memory_space<vmem>>, %arg1: memref<160x128xf32, #tpu.memory_space<vmem>>, %arg2: memref<1x128xf32, #tpu.memory_space<vmem>>, %arg3: memref<8x128xf32, #tpu.memory_space<vmem>>) attributes {dimension_semantics = [], scalar_prefetch = 0 : i64, scratch_operands = 0 : i64, tpu.core_type = #tpu.core_type<tc>} {
    %c0 = arith.constant 0 : index
    %c0_0 = arith.constant 0 : index
    %0 = vector.load %arg0[%c0, %c0_0] : memref<8x160xf32, #tpu.memory_space<vmem>>, vector<8x160xf32>
    %c0_1 = arith.constant 0 : index
    %c0_2 = arith.constant 0 : index
    %1 = vector.load %arg1[%c0_1, %c0_2] : memref<160x128xf32, #tpu.memory_space<vmem>>, vector<160x128xf32>
    %cst = arith.constant dense<0.000000e+00> : vector<8x128xf32>
    %2 = tpu.matmul %0, %1, %cst {dimension_numbers = #tpu.dot_dimension_numbers<[1], [0], [0], [1], [0, 0, 1, 1], [], []>} : vector<8x160xf32>, vector<160x128xf32>, vector<8x128xf32> -> vector<8x128xf32>
    %c0_3 = arith.constant 0 : index
    %c0_4 = arith.constant 0 : index
    %3 = vector.load %arg2[%c0_3, %c0_4] : memref<1x128xf32, #tpu.memory_space<vmem>>, vector<1x128xf32>
    %4 = vector.broadcast %3 : vector<1x128xf32> to vector<8x128xf32>
    %5 = arith.addf %2, %4 : vector<8x128xf32>
    %cst_5 = arith.constant 0.000000e+00 : f32
    %6 = vector.broadcast %cst_5 : f32 to vector<8x128xf32>
    %7 = arith.maximumf %5, %6 : vector<8x128xf32>
    %c0_6 = arith.constant 0 : index
    %c0_7 = arith.constant 0 : index
    %8 = vector.load %arg3[%c0_6, %c0_7] : memref<8x128xf32, #tpu.memory_space<vmem>>, vector<8x128xf32>
    tpu.vector_store %arg3[%c0_6, %c0_7], %7 {strides = array<i32>} : memref<8x128xf32, #tpu.memory_space<vmem>>, vector<8x128xf32>,
    return
  }
}

module attributes {stable_mosaic.version = 11 : i64} {
  func.func @_dilated_conv3x3_kernel(%arg0: i32, %arg1: memref<9x1x64x160xf32, #tpu.memory_space<vmem>>, %arg2: memref<9x160x128xf32, #tpu.memory_space<vmem>>, %arg3: memref<1x128xf32, #tpu.memory_space<vmem>>, %arg4: memref<1x64x128xf32, #tpu.memory_space<vmem>>) attributes {dimension_semantics = [#tpu.dimension_semantics<parallel>], iteration_bounds = array<i64: 2>, scalar_prefetch = 0 : i64, scratch_operands = 0 : i64, tpu.core_type = #tpu.core_type<tc>, window_params = [{transform_indices = @transform_0, window_bounds = array<i64: 9, 1, 64, 160>}, {pipeline_mode = #tpu.pipeline_mode<synchronous>, transform_indices = @transform_1, window_bounds = array<i64: 9, 160, 128>}, {pipeline_mode = #tpu.pipeline_mode<synchronous>, transform_indices = @transform_2, window_bounds = array<i64: 1, 128>}, {transform_indices = @transform_3, window_bounds = array<i64: 1, 64, 128>}]} {
    %cst = arith.constant 0.000000e+00 : f32
    %0 = vector.broadcast %cst : f32 to vector<64x128xf32>
    %c0 = arith.constant 0 : index
    %c0_0 = arith.constant 0 : index
    %c0_1 = arith.constant 0 : index
    %c0_2 = arith.constant 0 : index
    %1 = vector.load %arg1[%c0, %c0_0, %c0_1, %c0_2] : memref<9x1x64x160xf32, #tpu.memory_space<vmem>>, vector<1x1x64x160xf32>
    %2 = vector.shape_cast %1 : vector<1x1x64x160xf32> to vector<64x160xf32>
    %c0_3 = arith.constant 0 : index
    %c0_4 = arith.constant 0 : index
    %c0_5 = arith.constant 0 : index
    %3 = vector.load %arg2[%c0_3, %c0_4, %c0_5] : memref<9x160x128xf32, #tpu.memory_space<vmem>>, vector<1x160x128xf32>
    %4 = vector.shape_cast %3 : vector<1x160x128xf32> to vector<160x128xf32>
    %cst_6 = arith.constant dense<0.000000e+00> : vector<64x128xf32>
    %5 = tpu.matmul %2, %4, %cst_6 {dimension_numbers = #tpu.dot_dimension_numbers<[1], [0], [0], [1], [0, 0, 1, 1], [], []>} : vector<64x160xf32>, vector<160x128xf32>, vector<64x128xf32> -> vector<64x128xf32>
    %6 = arith.addf %0, %5 : vector<64x128xf32>
    %c1 = arith.constant 1 : index
    %c0_7 = arith.constant 0 : index
    %c0_8 = arith.constant 0 : index
    %c0_9 = arith.constant 0 : index
    %7 = vector.load %arg1[%c1, %c0_7, %c0_8, %c0_9] : memref<9x1x64x160xf32, #tpu.memory_space<vmem>>, vector<1x1x64x160xf32>
    %8 = vector.shape_cast %7 : vector<1x1x64x160xf32> to vector<64x160xf32>
    %c1_10 = arith.constant 1 : index
    %c0_11 = arith.constant 0 : index
    %c0_12 = arith.constant 0 : index
    %9 = vector.load %arg2[%c1_10, %c0_11, %c0_12] : memref<9x160x128xf32, #tpu.memory_space<vmem>>, vector<1x160x128xf32>
    %10 = vector.shape_cast %9 : vector<1x160x128xf32> to vector<160x128xf32>
    %cst_13 = arith.constant dense<0.000000e+00> : vector<64x128xf32>
    %11 = tpu.matmul %8, %10, %cst_13 {dimension_numbers = #tpu.dot_dimension_numbers<[1], [0], [0], [1], [0, 0, 1, 1], [], []>} : vector<64x160xf32>, vector<160x128xf32>, vector<64x128xf32> -> vector<64x128xf32>
    %12 = arith.addf %6, %11 : vector<64x128xf32>
    %c2 = arith.constant 2 : index
    %c0_14 = arith.constant 0 : index
    %c0_15 = arith.constant 0 : index
    %c0_16 = arith.constant 0 : index
    %13 = vector.load %arg1[%c2, %c0_14, %c0_15, %c0_16] : memref<9x1x64x160xf32, #tpu.memory_space<vmem>>, vector<1x1x64x160xf32>
    %14 = vector.shape_cast %13 : vector<1x1x64x160xf32> to vector<64x160xf32>
    %c2_17 = arith.constant 2 : index
    %c0_18 = arith.constant 0 : index
    %c0_19 = arith.constant 0 : index
    %15 = vector.load %arg2[%c2_17, %c0_18, %c0_19] : memref<9x160x128xf32, #tpu.memory_space<vmem>>, vector<1x160x128xf32>
    %16 = vector.shape_cast %15 : vector<1x160x128xf32> to vector<160x128xf32>
    %cst_20 = arith.constant dense<0.000000e+00> : vector<64x128xf32>
    %17 = tpu.matmul %14, %16, %cst_20 {dimension_numbers = #tpu.dot_dimension_numbers<[1], [0], [0], [1], [0, 0, 1, 1], [], []>} : vector<64x160xf32>, vector<160x128xf32>, vector<64x128xf32> -> vector<64x128xf32>
    %18 = arith.addf %12, %17 : vector<64x128xf32>
    %c3 = arith.constant 3 : index
    %c0_21 = arith.constant 0 : index
    %c0_22 = arith.constant 0 : index
    %c0_23 = arith.constant 0 : index
    %19 = vector.load %arg1[%c3, %c0_21, %c0_22, %c0_23] : memref<9x1x64x160xf32, #tpu.memory_space<vmem>>, vector<1x1x64x160xf32>
    %20 = vector.shape_cast %19 : vector<1x1x64x160xf32> to vector<64x160xf32>
    %c3_24 = arith.constant 3 : index
    %c0_25 = arith.constant 0 : index
    %c0_26 = arith.constant 0 : index
    %21 = vector.load %arg2[%c3_24, %c0_25, %c0_26] : memref<9x160x128xf32, #tpu.memory_space<vmem>>, vector<1x160x128xf32>
    %22 = vector.shape_cast %21 : vector<1x160x128xf32> to vector<160x128xf32>
    %cst_27 = arith.constant dense<0.000000e+00> : vector<64x128xf32>
    %23 = tpu.matmul %20, %22, %cst_27 {dimension_numbers = #tpu.dot_dimension_numbers<[1], [0], [0], [1], [0, 0, 1, 1], [], []>} : vector<64x160xf32>, vector<160x128xf32>, vector<64x128xf32> -> vector<64x128xf32>
    %24 = arith.addf %18, %23 : vector<64x128xf32>
    %c4 = arith.constant 4 : index
    %c0_28 = arith.constant 0 : index
    %c0_29 = arith.constant 0 : index
    %c0_30 = arith.constant 0 : index
    %25 = vector.load %arg1[%c4, %c0_28, %c0_29, %c0_30] : memref<9x1x64x160xf32, #tpu.memory_space<vmem>>, vector<1x1x64x160xf32>
    %26 = vector.shape_cast %25 : vector<1x1x64x160xf32> to vector<64x160xf32>
    %c4_31 = arith.constant 4 : index
    %c0_32 = arith.constant 0 : index
    %c0_33 = arith.constant 0 : index
    %27 = vector.load %arg2[%c4_31, %c0_32, %c0_33] : memref<9x160x128xf32, #tpu.memory_space<vmem>>, vector<1x160x128xf32>
    %28 = vector.shape_cast %27 : vector<1x160x128xf32> to vector<160x128xf32>
    %cst_34 = arith.constant dense<0.000000e+00> : vector<64x128xf32>
    %29 = tpu.matmul %26, %28, %cst_34 {dimension_numbers = #tpu.dot_dimension_numbers<[1], [0], [0], [1], [0, 0, 1, 1], [], []>} : vector<64x160xf32>, vector<160x128xf32>, vector<64x128xf32> -> vector<64x128xf32>
    %30 = arith.addf %24, %29 : vector<64x128xf32>
    %c5 = arith.constant 5 : index
    %c0_35 = arith.constant 0 : index
    %c0_36 = arith.constant 0 : index
    %c0_37 = arith.constant 0 : index
    %31 = vector.load %arg1[%c5, %c0_35, %c0_36, %c0_37] : memref<9x1x64x160xf32, #tpu.memory_space<vmem>>, vector<1x1x64x160xf32>
    %32 = vector.shape_cast %31 : vector<1x1x64x160xf32> to vector<64x160xf32>
    %c5_38 = arith.constant 5 : index
    %c0_39 = arith.constant 0 : index
    %c0_40 = arith.constant 0 : index
    %33 = vector.load %arg2[%c5_38, %c0_39, %c0_40] : memref<9x160x128xf32, #tpu.memory_space<vmem>>, vector<1x160x128xf32>
    %34 = vector.shape_cast %33 : vector<1x160x128xf32> to vector<160x128xf32>
    %cst_41 = arith.constant dense<0.000000e+00> : vector<64x128xf32>
    %35 = tpu.matmul %32, %34, %cst_41 {dimension_numbers = #tpu.dot_dimension_numbers<[1], [0], [0], [1], [0, 0, 1, 1], [], []>} : vector<64x160xf32>, vector<160x128xf32>, vector<64x128xf32> -> vector<64x128xf32>
    %36 = arith.addf %30, %35 : vector<64x128xf32>
    %c6 = arith.constant 6 : index
    %c0_42 = arith.constant 0 : index
    %c0_43 = arith.constant 0 : index
    %c0_44 = arith.constant 0 : index
    %37 = vector.load %arg1[%c6, %c0_42, %c0_43, %c0_44] : memref<9x1x64x160xf32, #tpu.memory_space<vmem>>, vector<1x1x64x160xf32>
    %38 = vector.shape_cast %37 : vector<1x1x64x160xf32> to vector<64x160xf32>
    %c6_45 = arith.constant 6 : index
    %c0_46 = arith.constant 0 : index
    %c0_47 = arith.constant 0 : index
    %39 = vector.load %arg2[%c6_45, %c0_46, %c0_47] : memref<9x160x128xf32, #tpu.memory_space<vmem>>, vector<1x160x128xf32>
    %40 = vector.shape_cast %39 : vector<1x160x128xf32> to vector<160x128xf32>
    %cst_48 = arith.constant dense<0.000000e+00> : vector<64x128xf32>
    %41 = tpu.matmul %38, %40, %cst_48 {dimension_numbers = #tpu.dot_dimension_numbers<[1], [0], [0], [1], [0, 0, 1, 1], [], []>} : vector<64x160xf32>, vector<160x128xf32>, vector<64x128xf32> -> vector<64x128xf32>
    %42 = arith.addf %36, %41 : vector<64x128xf32>
    %c7 = arith.constant 7 : index
    %c0_49 = arith.constant 0 : index
    %c0_50 = arith.constant 0 : index
    %c0_51 = arith.constant 0 : index
    %43 = vector.load %arg1[%c7, %c0_49, %c0_50, %c0_51] : memref<9x1x64x160xf32, #tpu.memory_space<vmem>>, vector<1x1x64x160xf32>
    %44 = vector.shape_cast %43 : vector<1x1x64x160xf32> to vector<64x160xf32>
    %c7_52 = arith.constant 7 : index
    %c0_53 = arith.constant 0 : index
    %c0_54 = arith.constant 0 : index
    %45 = vector.load %arg2[%c7_52, %c0_53, %c0_54] : memref<9x160x128xf32, #tpu.memory_space<vmem>>, vector<1x160x128xf32>
    %46 = vector.shape_cast %45 : vector<1x160x128xf32> to vector<160x128xf32>
    %cst_55 = arith.constant dense<0.000000e+00> : vector<64x128xf32>
    %47 = tpu.matmul %44, %46, %cst_55 {dimension_numbers = #tpu.dot_dimension_numbers<[1], [0], [0], [1], [0, 0, 1, 1], [], []>} : vector<64x160xf32>, vector<160x128xf32>, vector<64x128xf32> -> vector<64x128xf32>
    %48 = arith.addf %42, %47 : vector<64x128xf32>
    %c8 = arith.constant 8 : index
    %c0_56 = arith.constant 0 : index
    %c0_57 = arith.constant 0 : index
    %c0_58 = arith.constant 0 : index
    %49 = vector.load %arg1[%c8, %c0_56, %c0_57, %c0_58] : memref<9x1x64x160xf32, #tpu.memory_space<vmem>>, vector<1x1x64x160xf32>
    %50 = vector.shape_cast %49 : vector<1x1x64x160xf32> to vector<64x160xf32>
    %c8_59 = arith.constant 8 : index
    %c0_60 = arith.constant 0 : index
    %c0_61 = arith.constant 0 : index
    %51 = vector.load %arg2[%c8_59, %c0_60, %c0_61] : memref<9x160x128xf32, #tpu.memory_space<vmem>>, vector<1x160x128xf32>
    %52 = vector.shape_cast %51 : vector<1x160x128xf32> to vector<160x128xf32>
    %cst_62 = arith.constant dense<0.000000e+00> : vector<64x128xf32>
    %53 = tpu.matmul %50, %52, %cst_62 {dimension_numbers = #tpu.dot_dimension_numbers<[1], [0], [0], [1], [0, 0, 1, 1], [], []>} : vector<64x160xf32>, vector<160x128xf32>, vector<64x128xf32> -> vector<64x128xf32>
    %54 = arith.addf %48, %53 : vector<64x128xf32>
    %c0_63 = arith.constant 0 : index
    %c0_64 = arith.constant 0 : index
    %55 = vector.load %arg3[%c0_63, %c0_64] : memref<1x128xf32, #tpu.memory_space<vmem>>, vector<1x128xf32>
    %56 = vector.broadcast %55 : vector<1x128xf32> to vector<64x128xf32>
    %57 = arith.addf %54, %56 : vector<64x128xf32>
    %c0_65 = arith.constant 0 : index
    %c0_66 = arith.constant 0 : index
    %c0_67 = arith.constant 0 : index
    %58 = vector.load %arg4[%c0_65, %c0_66, %c0_67] : memref<1x64x128xf32, #tpu.memory_space<vmem>>, vector<1x64x128xf32>
    %59 = vector.shape_cast %58 : vector<1x64x128xf32> to vector<64x128xf32>
    %60 = vector.shape_cast %57 : vector<64x128xf32> to vector<1x64x128xf32>
    tpu.vector_store %arg4[%c0_65, %c0_66, %c0_67], %60 {strides = array<i32>} : memref<1x64x128xf32, #tpu.memory_space<vmem>>, vector<1x64x128xf32>,
    return
  }
  func.func @transform_0(%arg0: i32) -> (i32, i32, i32, i32) {
    %c0_i32 = arith.constant 0 : i32
    %c0_i32_0 = arith.constant 0 : i32
    %c0_i32_1 = arith.constant 0 : i32
    %c0_i32_2 = arith.constant 0 : i32
    return %c0_i32, %arg0, %c0_i32_0, %c0_i32_1 : i32, i32, i32, i32
  }
  func.func @transform_1(%arg0: i32) -> (i32, i32, i32) {
    %c0_i32 = arith.constant 0 : i32
    %c0_i32_0 = arith.constant 0 : i32
    %c0_i32_1 = arith.constant 0 : i32
    %c0_i32_2 = arith.constant 0 : i32
    return %c0_i32, %c0_i32_0, %c0_i32_1 : i32, i32, i32
  }
  func.func @transform_2(%arg0: i32) -> (i32, i32) {
    %c0_i32 = arith.constant 0 : i32
    %c0_i32_0 = arith.constant 0 : i32
    %c0_i32_1 = arith.constant 0 : i32
    return %c0_i32, %c0_i32_0 : i32, i32
  }
  func.func @transform_3(%arg0: i32) -> (i32, i32, i32) {
    %c0_i32 = arith.constant 0 : i32
    %c0_i32_0 = arith.constant 0 : i32
    %c0_i32_1 = arith.constant 0 : i32
    return %arg0, %c0_i32, %c0_i32_0 : i32, i32, i32
  }
}

module attributes {stable_mosaic.version = 11 : i64} {
  func.func @_linear_kernel(%arg0: memref<128x512xf32, #tpu.memory_space<vmem>>, %arg1: memref<512x128xf32, #tpu.memory_space<vmem>>, %arg2: memref<1x128xf32, #tpu.memory_space<vmem>>, %arg3: memref<128x128xf32, #tpu.memory_space<vmem>>) attributes {dimension_semantics = [], scalar_prefetch = 0 : i64, scratch_operands = 0 : i64, tpu.core_type = #tpu.core_type<tc>} {
    %c0 = arith.constant 0 : index
    %c0_0 = arith.constant 0 : index
    %0 = vector.load %arg0[%c0, %c0_0] : memref<128x512xf32, #tpu.memory_space<vmem>>, vector<128x512xf32>
    %c0_1 = arith.constant 0 : index
    %c0_2 = arith.constant 0 : index
    %1 = vector.load %arg1[%c0_1, %c0_2] : memref<512x128xf32, #tpu.memory_space<vmem>>, vector<512x128xf32>
    %cst = arith.constant dense<0.000000e+00> : vector<128x128xf32>
    %2 = tpu.matmul %0, %1, %cst {dimension_numbers = #tpu.dot_dimension_numbers<[1], [0], [0], [1], [0, 0, 1, 1], [], []>} : vector<128x512xf32>, vector<512x128xf32>, vector<128x128xf32> -> vector<128x128xf32>
    %c0_3 = arith.constant 0 : index
    %c0_4 = arith.constant 0 : index
    %3 = vector.load %arg2[%c0_3, %c0_4] : memref<1x128xf32, #tpu.memory_space<vmem>>, vector<1x128xf32>
    %4 = vector.broadcast %3 : vector<1x128xf32> to vector<128x128xf32>
    %5 = arith.addf %2, %4 : vector<128x128xf32>
    %cst_5 = arith.constant 0.000000e+00 : f32
    %6 = vector.broadcast %cst_5 : f32 to vector<128x128xf32>
    %7 = arith.maximumf %5, %6 : vector<128x128xf32>
    %c0_6 = arith.constant 0 : index
    %c0_7 = arith.constant 0 : index
    %8 = vector.load %arg3[%c0_6, %c0_7] : memref<128x128xf32, #tpu.memory_space<vmem>>, vector<128x128xf32>
    tpu.vector_store %arg3[%c0_6, %c0_7], %7 {strides = array<i32>} : memref<128x128xf32, #tpu.memory_space<vmem>>, vector<128x128xf32>,
    return
  }
}

module attributes {stable_mosaic.version = 11 : i64} {
  func.func @_linear_kernel(%arg0: memref<128x128xf32, #tpu.memory_space<vmem>>, %arg1: memref<128x128xf32, #tpu.memory_space<vmem>>, %arg2: memref<1x128xf32, #tpu.memory_space<vmem>>, %arg3: memref<128x128xf32, #tpu.memory_space<vmem>>) attributes {dimension_semantics = [], scalar_prefetch = 0 : i64, scratch_operands = 0 : i64, tpu.core_type = #tpu.core_type<tc>} {
    %c0 = arith.constant 0 : index
    %c0_0 = arith.constant 0 : index
    %0 = vector.load %arg0[%c0, %c0_0] : memref<128x128xf32, #tpu.memory_space<vmem>>, vector<128x128xf32>
    %c0_1 = arith.constant 0 : index
    %c0_2 = arith.constant 0 : index
    %1 = vector.load %arg1[%c0_1, %c0_2] : memref<128x128xf32, #tpu.memory_space<vmem>>, vector<128x128xf32>
    %cst = arith.constant dense<0.000000e+00> : vector<128x128xf32>
    %2 = tpu.matmul %0, %1, %cst {dimension_numbers = #tpu.dot_dimension_numbers<[1], [0], [0], [1], [0, 0, 1, 1], [], []>} : vector<128x128xf32>, vector<128x128xf32>, vector<128x128xf32> -> vector<128x128xf32>
    %c0_3 = arith.constant 0 : index
    %c0_4 = arith.constant 0 : index
    %3 = vector.load %arg2[%c0_3, %c0_4] : memref<1x128xf32, #tpu.memory_space<vmem>>, vector<1x128xf32>
    %4 = vector.broadcast %3 : vector<1x128xf32> to vector<128x128xf32>
    %5 = arith.addf %2, %4 : vector<128x128xf32>
    %c0_5 = arith.constant 0 : index
    %c0_6 = arith.constant 0 : index
    %6 = vector.load %arg3[%c0_5, %c0_6] : memref<128x128xf32, #tpu.memory_space<vmem>>, vector<128x128xf32>
    tpu.vector_store %arg3[%c0_5, %c0_6], %5 {strides = array<i32>} : memref<128x128xf32, #tpu.memory_space<vmem>>, vector<128x128xf32>,
    return
  }
}

module attributes {stable_mosaic.version = 11 : i64} {
  func.func @_local_head_kernel(%arg0: i32, %arg1: memref<1x64x128xf32, #tpu.memory_space<vmem>>, %arg2: memref<128x128xf32, #tpu.memory_space<vmem>>, %arg3: memref<1x128xf32, #tpu.memory_space<vmem>>, %arg4: memref<1x64x128xf32, #tpu.memory_space<vmem>>) attributes {dimension_semantics = [#tpu.dimension_semantics<parallel>], iteration_bounds = array<i64: 2>, scalar_prefetch = 0 : i64, scratch_operands = 0 : i64, tpu.core_type = #tpu.core_type<tc>, window_params = [{transform_indices = @transform_0, window_bounds = array<i64: 1, 64, 128>}, {pipeline_mode = #tpu.pipeline_mode<synchronous>, transform_indices = @transform_1, window_bounds = array<i64: 128, 128>}, {pipeline_mode = #tpu.pipeline_mode<synchronous>, transform_indices = @transform_2, window_bounds = array<i64: 1, 128>}, {transform_indices = @transform_3, window_bounds = array<i64: 1, 64, 128>}]} {
    %c0 = arith.constant 0 : index
    %c0_0 = arith.constant 0 : index
    %c0_1 = arith.constant 0 : index
    %0 = vector.load %arg1[%c0, %c0_0, %c0_1] : memref<1x64x128xf32, #tpu.memory_space<vmem>>, vector<1x64x128xf32>
    %1 = vector.shape_cast %0 : vector<1x64x128xf32> to vector<64x128xf32>
    %cst = arith.constant 0.000000e+00 : f32
    %2 = vector.broadcast %cst : f32 to vector<64x128xf32>
    %3 = arith.maximumf %1, %2 : vector<64x128xf32>
    %c0_2 = arith.constant 0 : index
    %c0_3 = arith.constant 0 : index
    %4 = vector.load %arg2[%c0_2, %c0_3] : memref<128x128xf32, #tpu.memory_space<vmem>>, vector<128x128xf32>
    %cst_4 = arith.constant dense<0.000000e+00> : vector<64x128xf32>
    %5 = tpu.matmul %3, %4, %cst_4 {dimension_numbers = #tpu.dot_dimension_numbers<[1], [0], [0], [1], [0, 0, 1, 1], [], []>} : vector<64x128xf32>, vector<128x128xf32>, vector<64x128xf32> -> vector<64x128xf32>
    %c0_5 = arith.constant 0 : index
    %c0_6 = arith.constant 0 : index
    %6 = vector.load %arg3[%c0_5, %c0_6] : memref<1x128xf32, #tpu.memory_space<vmem>>, vector<1x128xf32>
    %7 = vector.broadcast %6 : vector<1x128xf32> to vector<64x128xf32>
    %8 = arith.addf %5, %7 : vector<64x128xf32>
    %cst_7 = arith.constant 2.000000e+01 : f32
    %9 = vector.broadcast %cst_7 : f32 to vector<64x128xf32>
    %10 = arith.cmpf ogt, %8, %9 : vector<64x128xf32>
    %cst_8 = arith.constant 2.000000e+01 : f32
    %11 = vector.broadcast %cst_8 : f32 to vector<64x128xf32>
    %12 = arith.minimumf %8, %11 : vector<64x128xf32>
    %13 = math.exp %12 : vector<64x128xf32>
    %cst_9 = arith.constant 1.000000e+00 : f32
    %14 = vector.broadcast %cst_9 : f32 to vector<64x128xf32>
    %15 = arith.addf %14, %13 : vector<64x128xf32>
    %16 = math.log %15 : vector<64x128xf32>
    %17 = arith.select %10, %8, %16 : vector<64x128xi1>, vector<64x128xf32>
    %18 = arith.mulf %1, %1 : vector<64x128xf32>
    %cst_10 = arith.constant dense<0.000000e+00> : vector<64xf32>
    %19 = vector.multi_reduction <add>, %18, %cst_10 [1] : vector<64x128xf32> to vector<64xf32>
    %20 = vector.shape_cast %19 : vector<64xf32> to vector<64x1xf32>
    %21 = math.sqrt %20 : vector<64x1xf32>
    %cst_11 = arith.constant 9.99999996E-13 : f32
    %22 = vector.broadcast %cst_11 : f32 to vector<64x1xf32>
    %23 = arith.maximumf %21, %22 : vector<64x1xf32>
    %24 = vector.broadcast %23 : vector<64x1xf32> to vector<64x128xf32>
    %25 = arith.divf %1, %24 : vector<64x128xf32>
    %26 = arith.mulf %25, %17 : vector<64x128xf32>
    %c0_12 = arith.constant 0 : index
    %c0_13 = arith.constant 0 : index
    %c0_14 = arith.constant 0 : index
    %27 = vector.load %arg4[%c0_12, %c0_13, %c0_14] : memref<1x64x128xf32, #tpu.memory_space<vmem>>, vector<1x64x128xf32>
    %28 = vector.shape_cast %27 : vector<1x64x128xf32> to vector<64x128xf32>
    %29 = vector.shape_cast %26 : vector<64x128xf32> to vector<1x64x128xf32>
    tpu.vector_store %arg4[%c0_12, %c0_13, %c0_14], %29 {strides = array<i32>} : memref<1x64x128xf32, #tpu.memory_space<vmem>>, vector<1x64x128xf32>,
    return
  }
  func.func @transform_0(%arg0: i32) -> (i32, i32, i32) {
    %c0_i32 = arith.constant 0 : i32
    %c0_i32_0 = arith.constant 0 : i32
    %c0_i32_1 = arith.constant 0 : i32
    return %arg0, %c0_i32, %c0_i32_0 : i32, i32, i32
  }
  func.func @transform_1(%arg0: i32) -> (i32, i32) {
    %c0_i32 = arith.constant 0 : i32
    %c0_i32_0 = arith.constant 0 : i32
    %c0_i32_1 = arith.constant 0 : i32
    return %c0_i32, %c0_i32_0 : i32, i32
  }
  func.func @transform_2(%arg0: i32) -> (i32, i32) {
    %c0_i32 = arith.constant 0 : i32
    %c0_i32_0 = arith.constant 0 : i32
    %c0_i32_1 = arith.constant 0 : i32
    return %c0_i32, %c0_i32_0 : i32, i32
  }
  func.func @transform_3(%arg0: i32) -> (i32, i32, i32) {
    %c0_i32 = arith.constant 0 : i32
    %c0_i32_0 = arith.constant 0 : i32
    %c0_i32_1 = arith.constant 0 : i32
    return %arg0, %c0_i32, %c0_i32_0 : i32, i32, i32
  }
}

module attributes {stable_mosaic.version = 11 : i64} {
  func.func @_gem_kernel(%arg0: i32, %arg1: memref<1x256x64xf32, #tpu.memory_space<vmem>>, %arg2: memref<1x1x64xf32, #tpu.memory_space<vmem>>) attributes {dimension_semantics = [#tpu.dimension_semantics<parallel>], iteration_bounds = array<i64: 2>, scalar_prefetch = 0 : i64, scratch_operands = 0 : i64, tpu.core_type = #tpu.core_type<tc>, window_params = [{transform_indices = @transform_0, window_bounds = array<i64: 1, 256, 64>}, {transform_indices = @transform_1, window_bounds = array<i64: 1, 1, 64>}]} {
    %c0 = arith.constant 0 : index
    %c0_0 = arith.constant 0 : index
    %c0_1 = arith.constant 0 : index
    %0 = vector.load %arg1[%c0, %c0_0, %c0_1] : memref<1x256x64xf32, #tpu.memory_space<vmem>>, vector<1x256x64xf32>
    %1 = vector.shape_cast %0 : vector<1x256x64xf32> to vector<256x64xf32>
    %cst = arith.constant 9.99999997E-7 : f32
    %2 = vector.broadcast %cst : f32 to vector<256x64xf32>
    %3 = arith.maximumf %1, %2 : vector<256x64xf32>
    %4 = arith.mulf %3, %3 : vector<256x64xf32>
    %5 = arith.mulf %4, %3 : vector<256x64xf32>
    %cst_2 = arith.constant dense<0.000000e+00> : vector<64xf32>
    %6 = vector.multi_reduction <add>, %5, %cst_2 [0] : vector<256x64xf32> to vector<64xf32>
    %7 = vector.shape_cast %6 : vector<64xf32> to vector<1x64xf32>
    %cst_3 = arith.constant 2.560000e+02 : f32
    %8 = vector.broadcast %cst_3 : f32 to vector<1x64xf32>
    %9 = arith.divf %7, %8 : vector<1x64xf32>
    %10 = math.log %9 : vector<1x64xf32>
    %cst_4 = arith.constant 3.000000e+00 : f32
    %11 = vector.broadcast %cst_4 : f32 to vector<1x64xf32>
    %12 = arith.divf %10, %11 : vector<1x64xf32>
    %13 = math.exp %12 : vector<1x64xf32>
    %c0_5 = arith.constant 0 : index
    %c0_6 = arith.constant 0 : index
    %c0_7 = arith.constant 0 : index
    %14 = vector.load %arg2[%c0_5, %c0_6, %c0_7] : memref<1x1x64xf32, #tpu.memory_space<vmem>>, vector<1x1x64xf32>
    %15 = vector.shape_cast %14 : vector<1x1x64xf32> to vector<1x64xf32>
    %16 = vector.shape_cast %13 : vector<1x64xf32> to vector<1x1x64xf32>
    tpu.vector_store %arg2[%c0_5, %c0_6, %c0_7], %16 {strides = array<i32>} : memref<1x1x64xf32, #tpu.memory_space<vmem>>, vector<1x1x64xf32>,
    return
  }
  func.func @transform_0(%arg0: i32) -> (i32, i32, i32) {
    %c0_i32 = arith.constant 0 : i32
    %c0_i32_0 = arith.constant 0 : i32
    %c0_i32_1 = arith.constant 0 : i32
    return %arg0, %c0_i32, %c0_i32_0 : i32, i32, i32
  }
  func.func @transform_1(%arg0: i32) -> (i32, i32, i32) {
    %c0_i32 = arith.constant 0 : i32
    %c0_i32_0 = arith.constant 0 : i32
    %c0_i32_1 = arith.constant 0 : i32
    return %arg0, %c0_i32, %c0_i32_0 : i32, i32, i32
  }
}

module attributes {stable_mosaic.version = 11 : i64} {
  func.func @_linear_kernel(%arg0: memref<8x64xf32, #tpu.memory_space<vmem>>, %arg1: memref<64x128xf32, #tpu.memory_space<vmem>>, %arg2: memref<1x128xf32, #tpu.memory_space<vmem>>, %arg3: memref<8x128xf32, #tpu.memory_space<vmem>>) attributes {dimension_semantics = [], scalar_prefetch = 0 : i64, scratch_operands = 0 : i64, tpu.core_type = #tpu.core_type<tc>} {
    %c0 = arith.constant 0 : index
    %c0_0 = arith.constant 0 : index
    %0 = vector.load %arg0[%c0, %c0_0] : memref<8x64xf32, #tpu.memory_space<vmem>>, vector<8x64xf32>
    %c0_1 = arith.constant 0 : index
    %c0_2 = arith.constant 0 : index
    %1 = vector.load %arg1[%c0_1, %c0_2] : memref<64x128xf32, #tpu.memory_space<vmem>>, vector<64x128xf32>
    %cst = arith.constant dense<0.000000e+00> : vector<8x128xf32>
    %2 = tpu.matmul %0, %1, %cst {dimension_numbers = #tpu.dot_dimension_numbers<[1], [0], [0], [1], [0, 0, 1, 1], [], []>} : vector<8x64xf32>, vector<64x128xf32>, vector<8x128xf32> -> vector<8x128xf32>
    %c0_3 = arith.constant 0 : index
    %c0_4 = arith.constant 0 : index
    %3 = vector.load %arg2[%c0_3, %c0_4] : memref<1x128xf32, #tpu.memory_space<vmem>>, vector<1x128xf32>
    %4 = vector.broadcast %3 : vector<1x128xf32> to vector<8x128xf32>
    %5 = arith.addf %2, %4 : vector<8x128xf32>
    %c0_5 = arith.constant 0 : index
    %c0_6 = arith.constant 0 : index
    %6 = vector.load %arg3[%c0_5, %c0_6] : memref<8x128xf32, #tpu.memory_space<vmem>>, vector<8x128xf32>
    tpu.vector_store %arg3[%c0_5, %c0_6], %5 {strides = array<i32>} : memref<8x128xf32, #tpu.memory_space<vmem>>, vector<8x128xf32>,
    return
  }
}

module attributes {stable_mosaic.version = 11 : i64} {
  func.func @_fusion_gap_kernel(%arg0: i32, %arg1: memref<1x64x128xf32, #tpu.memory_space<vmem>>, %arg2: memref<1x1x128xf32, #tpu.memory_space<vmem>>, %arg3: memref<1x1x256xf32, #tpu.memory_space<vmem>>) attributes {dimension_semantics = [#tpu.dimension_semantics<parallel>], iteration_bounds = array<i64: 2>, scalar_prefetch = 0 : i64, scratch_operands = 0 : i64, tpu.core_type = #tpu.core_type<tc>, window_params = [{transform_indices = @transform_0, window_bounds = array<i64: 1, 64, 128>}, {transform_indices = @transform_1, window_bounds = array<i64: 1, 1, 128>}, {transform_indices = @transform_2, window_bounds = array<i64: 1, 1, 256>}]} {
    %c0 = arith.constant 0 : index
    %c0_0 = arith.constant 0 : index
    %c0_1 = arith.constant 0 : index
    %0 = vector.load %arg1[%c0, %c0_0, %c0_1] : memref<1x64x128xf32, #tpu.memory_space<vmem>>, vector<1x64x128xf32>
    %1 = vector.shape_cast %0 : vector<1x64x128xf32> to vector<64x128xf32>
    %c0_2 = arith.constant 0 : index
    %c0_3 = arith.constant 0 : index
    %c0_4 = arith.constant 0 : index
    %2 = vector.load %arg2[%c0_2, %c0_3, %c0_4] : memref<1x1x128xf32, #tpu.memory_space<vmem>>, vector<1x1x128xf32>
    %3 = vector.shape_cast %2 : vector<1x1x128xf32> to vector<1x128xf32>
    %4 = arith.mulf %3, %3 : vector<1x128xf32>
    %cst = arith.constant dense<0.000000e+00> : vector<1xf32>
    %5 = vector.multi_reduction <add>, %4, %cst [1] : vector<1x128xf32> to vector<1xf32>
    %6 = vector.shape_cast %5 : vector<1xf32> to vector<1x1xf32>
    %7 = math.sqrt %6 : vector<1x1xf32>
    %cst_5 = arith.constant 9.99999997E-7 : f32
    %8 = vector.broadcast %cst_5 : f32 to vector<1x1xf32>
    %9 = arith.addf %7, %8 : vector<1x1xf32>
    %10 = vector.broadcast %9 : vector<1x1xf32> to vector<1x128xf32>
    %11 = arith.divf %3, %10 : vector<1x128xf32>
    %cst_6 = arith.constant dense<0.000000e+00> : vector<128xf32>
    %12 = vector.multi_reduction <add>, %1, %cst_6 [0] : vector<64x128xf32> to vector<128xf32>
    %13 = vector.shape_cast %12 : vector<128xf32> to vector<1x128xf32>
    %cst_7 = arith.constant 6.400000e+01 : f32
    %14 = vector.broadcast %cst_7 : f32 to vector<1x128xf32>
    %15 = arith.divf %13, %14 : vector<1x128xf32>
    %16 = arith.mulf %15, %11 : vector<1x128xf32>
    %cst_8 = arith.constant dense<0.000000e+00> : vector<1xf32>
    %17 = vector.multi_reduction <add>, %16, %cst_8 [1] : vector<1x128xf32> to vector<1xf32>
    %18 = vector.shape_cast %17 : vector<1xf32> to vector<1x1xf32>
    %19 = vector.broadcast %18 : vector<1x1xf32> to vector<1x128xf32>
    %20 = arith.mulf %19, %11 : vector<1x128xf32>
    %21 = arith.subf %15, %20 : vector<1x128xf32>
    %c0_9 = arith.constant 0 : index
    %c0_10 = arith.constant 0 : index
    %c0_11 = arith.constant 0 : index
    %22 = vector.load %arg3[%c0_9, %c0_10, %c0_11] : memref<1x1x256xf32, #tpu.memory_space<vmem>>, vector<1x1x128xf32>
    %23 = vector.shape_cast %22 : vector<1x1x128xf32> to vector<1x128xf32>
    %24 = vector.shape_cast %3 : vector<1x128xf32> to vector<1x1x128xf32>
    tpu.vector_store %arg3[%c0_9, %c0_10, %c0_11], %24 {strides = array<i32>} : memref<1x1x256xf32, #tpu.memory_space<vmem>>, vector<1x1x128xf32>,
    %c0_12 = arith.constant 0 : index
    %c0_13 = arith.constant 0 : index
    %c128 = arith.constant 128 : index
    %25 = vector.load %arg3[%c0_12, %c0_13, %c128] : memref<1x1x256xf32, #tpu.memory_space<vmem>>, vector<1x1x128xf32>
    %26 = vector.shape_cast %25 : vector<1x1x128xf32> to vector<1x128xf32>
    %27 = vector.shape_cast %21 : vector<1x128xf32> to vector<1x1x128xf32>
    tpu.vector_store %arg3[%c0_12, %c0_13, %c128], %27 {strides = array<i32>} : memref<1x1x256xf32, #tpu.memory_space<vmem>>, vector<1x1x128xf32>,
    return
  }
  func.func @transform_0(%arg0: i32) -> (i32, i32, i32) {
    %c0_i32 = arith.constant 0 : i32
    %c0_i32_0 = arith.constant 0 : i32
    %c0_i32_1 = arith.constant 0 : i32
    return %arg0, %c0_i32, %c0_i32_0 : i32, i32, i32
  }
  func.func @transform_1(%arg0: i32) -> (i32, i32, i32) {
    %c0_i32 = arith.constant 0 : i32
    %c0_i32_0 = arith.constant 0 : i32
    %c0_i32_1 = arith.constant 0 : i32
    return %arg0, %c0_i32, %c0_i32_0 : i32, i32, i32
  }
  func.func @transform_2(%arg0: i32) -> (i32, i32, i32) {
    %c0_i32 = arith.constant 0 : i32
    %c0_i32_0 = arith.constant 0 : i32
    %c0_i32_1 = arith.constant 0 : i32
    return %arg0, %c0_i32, %c0_i32_0 : i32, i32, i32
  }
}

module attributes {stable_mosaic.version = 11 : i64} {
  func.func @_linear_kernel(%arg0: memref<8x256xf32, #tpu.memory_space<vmem>>, %arg1: memref<256x64xf32, #tpu.memory_space<vmem>>, %arg2: memref<1x64xf32, #tpu.memory_space<vmem>>, %arg3: memref<8x64xf32, #tpu.memory_space<vmem>>) attributes {dimension_semantics = [], scalar_prefetch = 0 : i64, scratch_operands = 0 : i64, tpu.core_type = #tpu.core_type<tc>} {
    %c0 = arith.constant 0 : index
    %c0_0 = arith.constant 0 : index
    %0 = vector.load %arg0[%c0, %c0_0] : memref<8x256xf32, #tpu.memory_space<vmem>>, vector<8x256xf32>
    %c0_1 = arith.constant 0 : index
    %c0_2 = arith.constant 0 : index
    %1 = vector.load %arg1[%c0_1, %c0_2] : memref<256x64xf32, #tpu.memory_space<vmem>>, vector<256x64xf32>
    %cst = arith.constant dense<0.000000e+00> : vector<8x64xf32>
    %2 = tpu.matmul %0, %1, %cst {dimension_numbers = #tpu.dot_dimension_numbers<[1], [0], [0], [1], [0, 0, 1, 1], [], []>} : vector<8x256xf32>, vector<256x64xf32>, vector<8x64xf32> -> vector<8x64xf32>
    %c0_3 = arith.constant 0 : index
    %c0_4 = arith.constant 0 : index
    %3 = vector.load %arg2[%c0_3, %c0_4] : memref<1x64xf32, #tpu.memory_space<vmem>>, vector<1x64xf32>
    %4 = vector.broadcast %3 : vector<1x64xf32> to vector<8x64xf32>
    %5 = arith.addf %2, %4 : vector<8x64xf32>
    %c0_5 = arith.constant 0 : index
    %c0_6 = arith.constant 0 : index
    %6 = vector.load %arg3[%c0_5, %c0_6] : memref<8x64xf32, #tpu.memory_space<vmem>>, vector<8x64xf32>
    tpu.vector_store %arg3[%c0_5, %c0_6], %5 {strides = array<i32>} : memref<8x64xf32, #tpu.memory_space<vmem>>, vector<8x64xf32>,
    return
  }
}

</mosaic_0001>

<bundles_post_ra>
// kernel: dolg_forward.14
= control target key start
LH: loop header
LB: loop body
LE: loop exit
PB: predicated region body
PF: predicated region fallthrough
CT: control target
= control target key end

     0   :  { %8 = vsyncpa [#allocation3], 0  ;;  %s294_s0 = inlined_call_operand.vmem [shape: f32[8,160], index: 0, kind: input, shape index: {}]   ;;  %s295_s1 = inlined_call_operand.hbm [shape: f32[160,128], index: 1, kind: input, shape index: {}]   ;;  %s296_s2 = inlined_call_operand.hbm [shape: f32[1,128], index: 2, kind: input, shape index: {}]   ;;  %s297_s3 = inlined_call_operand.vmem [shape: f32[8,128], index: 3, kind: output, shape index: {}]  }
   0x1   :  { %9 = vsyncpa [#allocation5], 0  ;;  %s236_s12 = smov [#allocation2]   ;;  %s188_s16 = scalar_lea.hbm %s295_s1, 2560 }
   0x2   :  { %s17_s13 = sshll.u32 %s236_s12, 4  ;;  %p189_p0 = scmp.ne.s32.totalorder %s295_s1, %s188_s16  ;;  %s18_s13 = int_to_ptr.vmem [resolvable:$true] %s17_s13 }
   0x3   :  { %p192_p1 = scmp.lt.u32.totalorder %s188_s16, %s295_s1 }
   0x5   :  { %p194_p2 = pnand %p192_p1, %p189_p0 }
   0x7   :  { %197 = shalt.err (!%p194_p2)
}
   0x8   :  { %s198_s21 = scalar_lea.vmem %s18_s13, 2560  ;;  %p203_p4 = scmp.lt.s32.totalorder %s18_s13, %s18_s13 }
   0x9   :  { %p199_p3 = scmp.ne.s32.totalorder %s18_s13, %s198_s21  ;;  %p204_p5 = scmp.lt.s32.totalorder %s198_s21, %s198_s21 }
   0xb   :  { %p205_p6 = por %p204_p5, %p203_p4 }
   0xd   :  { %p206_p7 = pnand %p205_p6, %p199_p3 }
   0xf   :  { %209 = shalt.err (!%p206_p7)
}
  0x10   :  { %s237_s22 = smov 128   ;;  %s238_s23 = smov 8  }
  0x11   :  { %23 = dma.hbm_to_vmem [thread:$0]  %s295_s1, 2560, %s18_s13, [#allocation3], %s237_s22, %s237_s22, %s238_s23  }
  0x12   :  { %s239_s26 = smov [#allocation4]   ;;  %s210_s30 = scalar_lea.hbm %s296_s2, 16 }
  0x13   :  { %s30_s27 = sshll.u32 %s239_s26, 4  ;;  %p211_p8 = scmp.ne.s32.totalorder %s296_s2, %s210_s30  ;;  %s31_s27 = int_to_ptr.vmem [resolvable:$true] %s30_s27 }
  0x14   :  { %p214_p9 = scmp.lt.u32.totalorder %s210_s30, %s296_s2 }
  0x16   :  { %p216_p10 = pnand %p214_p9, %p211_p8 }
  0x18   :  { %219 = shalt.err (!%p216_p10)
}
  0x19   :  { %s220_s8 = scalar_lea.vmem %s31_s27, 16  ;;  %s224_s1 = scalar_lea.vmem %s31_s27, 32 }
  0x1a   :  { %p221_p11 = scmp.ne.s32.totalorder %s31_s27, %s220_s8  ;;  %p225_p12 = scmp.lt.s32.totalorder %s31_s27, %s31_s27 }
  0x1b   :  { %p226_p13 = scmp.lt.s32.totalorder %s224_s1, %s220_s8 }
  0x1d   :  { %p227_p0 = por %p226_p13, %p225_p12 }
  0x1f   :  { %p228_p1 = pnand %p227_p0, %p221_p11 }
  0x21   :  { %231 = shalt.err (!%p228_p1)
}
  0x22   :  { %33 = dma.hbm_to_vmem [thread:$0]  %s296_s2, 16, %s31_s27, [#allocation5]  }
  0x23   :  { %232 = dma.done.wait [#allocation3], 2560  }
  0x24   :  { %233 = vsyncadd [#allocation3], 4294964736 }
  0x25   :  { %234 = dma.done.wait [#allocation5], 16  }
  0x26   :  { %235 = vsyncadd [#allocation5], 4294967280  ;;  %v240_v0 = vmov 0.0|0.0   ;;  %v42_v1 = vld [vmem:[#allocation2] sm:$0xff]  ;;  %v43_v2 = vld [vmem:[#allocation2 + $0x8] sm:$0xff]  ;;  %vm69_vm0 = vcmask 261120  }
  0x27   :  { %153 = vmatprep.subr.bf16.mxu0 %v240_v0  ;;  %v44_v3 = vld [vmem:[#allocation2 + $0x10] sm:$0xff]  ;;  %v154_v4 = vpack.c.bf16 %v43_v2, %v42_v1  ;;  %v45_v5 = vld [vmem:[#allocation2 + $0x18] sm:$0xff]  ;;  %v46_v7 = vld [vmem:[#allocation2 + $0x20] sm:$0xff] }
  0x28   :  { %v157_v6 = vpack.c.bf16 %v45_v5, %v44_v3  ;;  %v47_v8 = vld [vmem:[#allocation2 + $0x28] sm:$0xff]  ;;  %v48_v11 = vld [vmem:[#allocation2 + $0x30] sm:$0xff]  ;;  %v49_v12 = vld [vmem:[#allocation2 + $0x38] sm:$0xff] }
  0x29   :  { %155 = vmatpush1.bf16.msra.mxu0 %v154_v4  ;;  %v41_v9 = vld [vmem:[%s294_s0 + $0x8] sm:$0xff]  ;;  %v160_v10 = vpack.c.bf16 %v47_v8, %v46_v7  ;;  %v163_v13 = vpack.c.bf16 %v49_v12, %v48_v11  ;;  %v50_v14 = vld [vmem:[#allocation2 + $0x40] sm:$0xff]  ;;  %v52_v17 = vld [vmem:[#allocation2 + $0x50] sm:$0xff] }
  0x2a   :  { %156 = vmatprep.subr.bf16.mxu0 %v240_v0  ;;  %152 = vmatprep.mubr.msk.f32.mxu0 %vm69_vm0, %v41_v9  ;;  %v51_v15 = vld [vmem:[#allocation2 + $0x48] sm:$0xff]  ;;  %v53_v18 = vld [vmem:[#allocation2 + $0x58] sm:$0xff]  ;;  %v54_v20 = vld [vmem:[#allocation2 + $0x60] sm:$0xff] }
  0x2b   :  { %v166_v16 = vpack.c.bf16 %v51_v15, %v50_v14  ;;  %v169_v19 = vpack.c.bf16 %v53_v18, %v52_v17  ;;  %v55_v21 = vld [vmem:[#allocation2 + $0x68] sm:$0xff]  ;;  %v56_v23 = vld [vmem:[#allocation2 + $0x70] sm:$0xff]  ;;  %v57_v24 = vld [vmem:[#allocation2 + $0x78] sm:$0xff] }
  0x2c   :  { %v172_v22 = vpack.c.bf16 %v55_v21, %v54_v20  ;;  %v175_v25 = vpack.c.bf16 %v57_v24, %v56_v23  ;;  %v58_v26 = vld [vmem:[#allocation2 + $0x80] sm:$0xff]  ;;  %v59_v27 = vld [vmem:[#allocation2 + $0x88] sm:$0xff]  ;;  %v60_v29 = vld [vmem:[#allocation2 + $0x90] sm:$0xff] }
  0x2d   :  { %158 = vmatpush1.bf16.msra.mxu0 %v157_v6  ;;  %v178_v28 = vpack.c.bf16 %v59_v27, %v58_v26  ;;  %v61_v30 = vld [vmem:[#allocation2 + $0x98] sm:$0xff]  ;;  %v40_v32 = vld [vmem:[%s294_s0] sm:$0xff] }
  0x2e   :  { %159 = vmatprep.subr.bf16.mxu0 %v240_v0  ;;  %v181_v31 = vpack.c.bf16 %v61_v30, %v60_v29  ;;  %v151_v33 = vld [vmem:[#allocation4] ss:$0 sm:$0xff] }
  0x31   :  { %161 = vmatpush1.bf16.msra.mxu0 %v160_v10 }
  0x32   :  { %162 = vmatprep.subr.bf16.mxu0 %v240_v0 }
  0x35   :  { %164 = vmatpush1.bf16.msra.mxu0 %v163_v13 }
  0x36   :  { %165 = vmatprep.subr.bf16.mxu0 %v240_v0 }
  0x39   :  { %167 = vmatpush1.bf16.msra.mxu0 %v166_v16 }
  0x3a   :  { %168 = vmatprep.subr.bf16.mxu0 %v240_v0 }
  0x3d   :  { %170 = vmatpush1.bf16.msra.mxu0 %v169_v19 }
  0x3e   :  { %171 = vmatprep.subr.bf16.mxu0 %v240_v0 }
  0x41   :  { %173 = vmatpush1.bf16.msra.mxu0 %v172_v22 }
  0x42   :  { %174 = vmatprep.subr.bf16.mxu0 %v240_v0 }
  0x45   :  { %176 = vmatpush1.bf16.msra.mxu0 %v175_v25 }
  0x46   :  { %177 = vmatprep.subr.bf16.mxu0 %v240_v0 }
  0x49   :  { %179 = vmatpush1.bf16.msra.mxu0 %v178_v28 }
  0x4a   :  { %180 = vmatprep.subr.bf16.mxu0 %v240_v0 }
  0x4d   :  { %182 = vmatpush1.bf16.msra.mxu0 %v181_v31 }
  0x50   :  { %138 = vmatmul.mubr.f32.vlgmr.msra.gmra.mrb[0].mxu0 %v40_v32 }
 0x123   :  { %v139_v34 = vpop.f32.mrb[0].mxu0 }
 0x124   :  { %v140_v35 = vadd.f32 %v151_v33, %v139_v34  ;;  %v141_v36 = vpop.f32.mrb[1].mxu0 }
 0x126   :  { %v143_v37 = vmax.f32 %v140_v35, 0.0 }
 0x128   :  { %144 = vst [vmem:[%s297_s3] sm:$0xff] %v143_v37 }
 0x129   :  { %149 = vsyncpa [#allocation3], 1 }
 0x12a   :  { %150 = vsyncpa [#allocation5], 1 }

// kernel: dolg_forward.16
= control target key start
LH: loop header
LB: loop body
LE: loop exit
PB: predicated region body
PF: predicated region fallthrough
CT: control target
= control target key end

     0   :  { %s522_s1 = inlined_call_operand.vmem [shape: f32[128,128], index: 1, kind: input, shape index: {}]   ;;  %s523_s0 = inlined_call_operand.vmem [shape: f32[128,128], index: 0, kind: input, shape index: {}]   ;;  %s524_s2 = inlined_call_operand.vmem [shape: f32[1,128], index: 2, kind: input, shape index: {}]   ;;  %s525_s3 = inlined_call_operand.vmem [shape: f32[128,128], index: 3, kind: output, shape index: {}]  }
   0x1   :  { %v30_v0 = vld [vmem:[%s522_s1] sm:$0xff]  ;;  %v31_v1 = vld [vmem:[%s522_s1 + $0x8] sm:$0xff]  ;;  %v32_v2 = vld [vmem:[%s522_s1 + $0x10] sm:$0xff] }
   0x2   :  { %v307_v3 = vpack.c.bf16 %v31_v1, %v30_v0  ;;  %v33_v4 = vld [vmem:[%s522_s1 + $0x18] sm:$0xff]  ;;  %v34_v6 = vld [vmem:[%s522_s1 + $0x20] sm:$0xff]  ;;  %v35_v7 = vld [vmem:[%s522_s1 + $0x28] sm:$0xff] }
   0x3   :  { %v311_v5 = vpack.c.bf16 %v33_v4, %v32_v2  ;;  %v315_v8 = vpack.c.bf16 %v35_v7, %v34_v6  ;;  %v14_v9 = vld [vmem:[%s523_s0] sm:$0xff]  ;;  %v36_v11 = vld [vmem:[%s522_s1 + $0x30] sm:$0xff]  ;;  %v37_v12 = vld [vmem:[%s522_s1 + $0x38] sm:$0xff] }
   0x4   :  { %308 = vmatprep.subr.bf16.mxu0 %v307_v3  ;;  %339 = vmatprep.subr.bf16.mxu1 %v307_v3  ;;  %v22_v10 = vld [vmem:[%s523_s0 + $0x40] sm:$0xff]  ;;  %v319_v13 = vpack.c.bf16 %v37_v12, %v36_v11  ;;  %v39_v15 = vld [vmem:[%s522_s1 + $0x48] sm:$0xff]  ;;  %v40_v17 = vld [vmem:[%s522_s1 + $0x50] sm:$0xff] }
   0x5   :  { %310 = vmatpush3.bf16.msra.mxu0 %v307_v3  ;;  %347 = vmatpush3.bf16.msra.mxu1 %v307_v3  ;;  %v38_v14 = vld [vmem:[%s522_s1 + $0x40] sm:$0xff]  ;;  %v41_v18 = vld [vmem:[%s522_s1 + $0x58] sm:$0xff]  ;;  %v43_v21 = vld [vmem:[%s522_s1 + $0x68] sm:$0xff] }
   0x6   :  { %312 = vmatprep.subr.bf16.mxu0 %v311_v5  ;;  %340 = vmatprep.subr.bf16.mxu1 %v311_v5  ;;  %v323_v16 = vpack.c.bf16 %v39_v15, %v38_v14  ;;  %v327_v19 = vpack.c.bf16 %v41_v18, %v40_v17  ;;  %v42_v20 = vld [vmem:[%s522_s1 + $0x60] sm:$0xff]  ;;  %v44_v23 = vld [vmem:[%s522_s1 + $0x70] sm:$0xff]  ;;  %v45_v24 = vld [vmem:[%s522_s1 + $0x78] sm:$0xff] }
   0x7   :  { %283 = vmatprep.mubr.f32.mxu0 %v14_v9  ;;  %295 = vmatprep.mubr.f32.mxu1 %v22_v10  ;;  %v331_v22 = vpack.c.bf16 %v43_v21, %v42_v20  ;;  %v335_v25 = vpack.c.bf16 %v45_v24, %v44_v23  ;;  %v15_v26 = vld [vmem:[%s523_s0 + $0x8] sm:$0xff]  ;;  %v16_v28 = vld [vmem:[%s523_s0 + $0x10] sm:$0xff]  ;;  %v17_v30 = vld [vmem:[%s523_s0 + $0x18] sm:$0xff] }
   0x8   :  { %v23_v27 = vld [vmem:[%s523_s0 + $0x48] sm:$0xff]  ;;  %v24_v29 = vld [vmem:[%s523_s0 + $0x50] sm:$0xff]  ;;  %v25_v31 = vld [vmem:[%s523_s0 + $0x58] sm:$0xff] }
   0x9   :  { %314 = vmatpush3.bf16.msra.mxu0 %v311_v5  ;;  %348 = vmatpush3.bf16.msra.mxu1 %v311_v5  ;;  %v18_v32 = vld [vmem:[%s523_s0 + $0x20] sm:$0xff]  ;;  %v19_v34 = vld [vmem:[%s523_s0 + $0x28] sm:$0xff]  ;;  %v20_v36 = vld [vmem:[%s523_s0 + $0x30] sm:$0xff] }
   0xa   :  { %316 = vmatprep.subr.bf16.mxu0 %v315_v8  ;;  %341 = vmatprep.subr.bf16.mxu1 %v315_v8  ;;  %v26_v33 = vld [vmem:[%s523_s0 + $0x60] sm:$0xff]  ;;  %v27_v35 = vld [vmem:[%s523_s0 + $0x68] sm:$0xff]  ;;  %v28_v37 = vld [vmem:[%s523_s0 + $0x70] sm:$0xff] }
   0xb   :  { %v21_v38 = vld [vmem:[%s523_s0 + $0x38] sm:$0xff]  ;;  %v218_v40 = vld [vmem:[%s524_s2] ss:$0 sm:$0xff] }
   0xc   :  { %v29_v39 = vld [vmem:[%s523_s0 + $0x78] sm:$0xff] }
   0xd   :  { %318 = vmatpush3.bf16.msra.mxu0 %v315_v8  ;;  %349 = vmatpush3.bf16.msra.mxu1 %v315_v8 }
   0xe   :  { %320 = vmatprep.subr.bf16.mxu0 %v319_v13  ;;  %342 = vmatprep.subr.bf16.mxu1 %v319_v13 }
  0x11   :  { %322 = vmatpush3.bf16.msra.mxu0 %v319_v13  ;;  %350 = vmatpush3.bf16.msra.mxu1 %v319_v13 }
  0x12   :  { %324 = vmatprep.subr.bf16.mxu0 %v323_v16  ;;  %343 = vmatprep.subr.bf16.mxu1 %v323_v16 }
  0x15   :  { %326 = vmatpush3.bf16.msra.mxu0 %v323_v16  ;;  %351 = vmatpush3.bf16.msra.mxu1 %v323_v16 }
  0x16   :  { %328 = vmatprep.subr.bf16.mxu0 %v327_v19  ;;  %344 = vmatprep.subr.bf16.mxu1 %v327_v19 }
  0x19   :  { %330 = vmatpush3.bf16.msra.mxu0 %v327_v19  ;;  %352 = vmatpush3.bf16.msra.mxu1 %v327_v19 }
  0x1a   :  { %332 = vmatprep.subr.bf16.mxu0 %v331_v22  ;;  %345 = vmatprep.subr.bf16.mxu1 %v331_v22 }
  0x1d   :  { %334 = vmatpush3.bf16.msra.mxu0 %v331_v22  ;;  %353 = vmatpush3.bf16.msra.mxu1 %v331_v22 }
  0x1e   :  { %336 = vmatprep.subr.bf16.mxu0 %v335_v25  ;;  %346 = vmatprep.subr.bf16.mxu1 %v335_v25 }
  0x21   :  { %338 = vmatpush3.bf16.msra.mxu0 %v335_v25  ;;  %354 = vmatpush3.bf16.msra.mxu1 %v335_v25 }
  0x24   :  { %284 = vmatmul.mubr.f32.vlgmr.msra.gmra.mrb[0].mxu0 %v15_v26  ;;  %296 = vmatmul.mubr.f32.vlgmr.msra.gmra.mrb[0].mxu1 %v23_v27 }
  0x25   :  { %286 = vmatprep.mubr.f32.mxu0 %v16_v28  ;;  %298 = vmatprep.mubr.f32.mxu1 %v24_v29 }
  0x28   :  { %287 = vmatmul.mubr.f32.gmra.mrb[2].mxu0 %v17_v30  ;;  %299 = vmatmul.mubr.f32.gmra.mrb[2].mxu1 %v25_v31 }
  0x29   :  { %289 = vmatprep.mubr.f32.mxu0 %v18_v32  ;;  %301 = vmatprep.mubr.f32.mxu1 %v26_v33 }
  0x2c   :  { %290 = vmatmul.mubr.f32.gmra.mrb[4].mxu0 %v19_v34  ;;  %302 = vmatmul.mubr.f32.gmra.mrb[4].mxu1 %v27_v35 }
  0x2d   :  { %292 = vmatprep.mubr.f32.mxu0 %v20_v36  ;;  %304 = vmatprep.mubr.f32.mxu1 %v28_v37 }
  0x30   :  { %293 = vmatmul.mubr.f32.gmra.mrb[6].mxu0 %v21_v38  ;;  %305 = vmatmul.mubr.f32.gmra.mrb[6].mxu1 %v29_v39 }
  0xf7   :  { %v285_v41 = vpop.f32.mrb[0].mxu0  ;;  %v297_v42 = vpop.f32.mrb[0].mxu1 }
  0xf8   :  { %v125_v43 = vadd.f32 %v285_v41, %v218_v40  ;;  %v165_v44 = vadd.f32 %v297_v42, %v218_v40  ;;  %v119_v45 = vpop.f32.mrb[1].mxu0  ;;  %v159_v46 = vpop.f32.mrb[1].mxu1 }
  0xf9   :  { %v120_v47 = vadd.f32 %v218_v40, %v119_v45  ;;  %v160_v48 = vadd.f32 %v218_v40, %v159_v46 }
  0xfa   :  { %199 = vst [vmem:[%s525_s3 + $0x8] sm:$0xff] %v125_v43  ;;  %207 = vst [vmem:[%s525_s3 + $0x48] sm:$0xff] %v165_v44 }
  0xfb   :  { %198 = vst [vmem:[%s525_s3] sm:$0xff] %v120_v47  ;;  %206 = vst [vmem:[%s525_s3 + $0x40] sm:$0xff] %v160_v48  ;;  %v288_v49 = vpop.f32.mrb[2].mxu0  ;;  %v300_v50 = vpop.f32.mrb[2].mxu1 }
  0xfc   :  { %v135_v51 = vadd.f32 %v288_v49, %v218_v40  ;;  %v175_v52 = vadd.f32 %v300_v50, %v218_v40  ;;  %v129_v53 = vpop.f32.mrb[3].mxu0  ;;  %v169_v54 = vpop.f32.mrb[3].mxu1 }
  0xfd   :  { %v130_v55 = vadd.f32 %v218_v40, %v129_v53  ;;  %v170_v56 = vadd.f32 %v218_v40, %v169_v54 }
  0xfe   :  { %201 = vst [vmem:[%s525_s3 + $0x18] sm:$0xff] %v135_v51  ;;  %209 = vst [vmem:[%s525_s3 + $0x58] sm:$0xff] %v175_v52 }
  0xff   :  { %200 = vst [vmem:[%s525_s3 + $0x10] sm:$0xff] %v130_v55  ;;  %208 = vst [vmem:[%s525_s3 + $0x50] sm:$0xff] %v170_v56  ;;  %v291_v57 = vpop.f32.mrb[4].mxu0  ;;  %v303_v58 = vpop.f32.mrb[4].mxu1 }
 0x100   :  { %v145_v59 = vadd.f32 %v291_v57, %v218_v40  ;;  %v185_v60 = vadd.f32 %v303_v58, %v218_v40  ;;  %v139_v61 = vpop.f32.mrb[5].mxu0  ;;  %v179_v62 = vpop.f32.mrb[5].mxu1 }
 0x101   :  { %v140_v63 = vadd.f32 %v218_v40, %v139_v61  ;;  %v180_v0 = vadd.f32 %v218_v40, %v179_v62 }
 0x102   :  { %203 = vst [vmem:[%s525_s3 + $0x28] sm:$0xff] %v145_v59  ;;  %211 = vst [vmem:[%s525_s3 + $0x68] sm:$0xff] %v185_v60 }
 0x103   :  { %202 = vst [vmem:[%s525_s3 + $0x20] sm:$0xff] %v140_v63  ;;  %210 = vst [vmem:[%s525_s3 + $0x60] sm:$0xff] %v180_v0  ;;  %v294_v1 = vpop.f32.mrb[6].mxu0  ;;  %v306_v2 = vpop.f32.mrb[6].mxu1 }
 0x104   :  { %v155_v3 = vadd.f32 %v294_v1, %v218_v40  ;;  %v195_v4 = vadd.f32 %v306_v2, %v218_v40  ;;  %v149_v5 = vpop.f32.mrb[7].mxu0  ;;  %v189_v6 = vpop.f32.mrb[7].mxu1 }
 0x105   :  { %v150_v7 = vadd.f32 %v218_v40, %v149_v5  ;;  %v190_v8 = vadd.f32 %v218_v40, %v189_v6 }
 0x106   :  { %205 = vst [vmem:[%s525_s3 + $0x38] sm:$0xff] %v155_v3  ;;  %213 = vst [vmem:[%s525_s3 + $0x78] sm:$0xff] %v195_v4 }
 0x107   :  { %204 = vst [vmem:[%s525_s3 + $0x30] sm:$0xff] %v150_v7  ;;  %212 = vst [vmem:[%s525_s3 + $0x70] sm:$0xff] %v190_v8 }

// kernel: dolg_forward.15
= control target key start
LH: loop header
LB: loop body
LE: loop exit
PB: predicated region body
PF: predicated region fallthrough
CT: control target
= control target key end

     0   :  { %s1173_s1 = inlined_call_operand.vmem [shape: f32[512,128], index: 1, kind: input, shape index: {}]   ;;  %s1174_s0 = inlined_call_operand.vmem [shape: f32[128,512], index: 0, kind: input, shape index: {}]   ;;  %s1175_s2 = inlined_call_operand.vmem [shape: f32[1,128], index: 2, kind: input, shape index: {}]   ;;  %s1176_s3 = inlined_call_operand.vmem [shape: f32[128,128], index: 3, kind: output, shape index: {}]  }
   0x1   :  { %v94_v0 = vld [vmem:[%s1173_s1 + $0x80] sm:$0xff]  ;;  %v95_v1 = vld [vmem:[%s1173_s1 + $0x88] sm:$0xff]  ;;  %v96_v11 = vld [vmem:[%s1173_s1 + $0x90] sm:$0xff] }
   0x2   :  { %v78_v2 = vld [vmem:[%s1173_s1] sm:$0xff]  ;;  %v636_v3 = vpack.c.bf16 %v95_v1, %v94_v0  ;;  %v79_v4 = vld [vmem:[%s1173_s1 + $0x8] sm:$0xff]  ;;  %v97_v13 = vld [vmem:[%s1173_s1 + $0x98] sm:$0xff] }
   0x3   :  { %v126_v5 = vld [vmem:[%s1173_s1 + $0x180] sm:$0xff]  ;;  %v127_v6 = vld [vmem:[%s1173_s1 + $0x188] sm:$0xff]  ;;  %v638_v7 = vpack.c.bf16 %v79_v4, %v78_v2  ;;  %v80_v14 = vld [vmem:[%s1173_s1 + $0x10] sm:$0xff]  ;;  %v640_v16 = vpack.c.bf16 %v97_v13, %v96_v11 }
   0x4   :  { %v668_v8 = vpack.c.bf16 %v127_v6, %v126_v5  ;;  %v110_v9 = vld [vmem:[%s1173_s1 + $0x100] sm:$0xff]  ;;  %v111_v10 = vld [vmem:[%s1173_s1 + $0x108] sm:$0xff]  ;;  %637 = vmatprep.subr.bf16.mxu0 %v636_v3  ;;  %v81_v15 = vld [vmem:[%s1173_s1 + $0x18] sm:$0xff] }
   0x5   :  { %v670_v12 = vpack.c.bf16 %v111_v10, %v110_v9  ;;  %639 = vmatpush3.bf16.msra.mxu0 %v638_v7  ;;  %v642_v17 = vpack.c.bf16 %v81_v15, %v80_v14  ;;  %v128_v18 = vld [vmem:[%s1173_s1 + $0x190] sm:$0xff]  ;;  %v129_v19 = vld [vmem:[%s1173_s1 + $0x198] sm:$0xff]  ;;  %v98_v23 = vld [vmem:[%s1173_s1 + $0xa0] sm:$0xff] }
   0x6   :  { %669 = vmatprep.subr.bf16.mxu1 %v668_v8  ;;  %v112_v20 = vld [vmem:[%s1173_s1 + $0x110] sm:$0xff]  ;;  %v672_v21 = vpack.c.bf16 %v129_v19, %v128_v18  ;;  %v113_v22 = vld [vmem:[%s1173_s1 + $0x118] sm:$0xff]  ;;  %v99_v24 = vld [vmem:[%s1173_s1 + $0xa8] sm:$0xff]  ;;  %641 = vmatprep.subr.bf16.mxu0 %v640_v16 }
   0x7   :  { %671 = vmatpush3.bf16.msra.mxu1 %v670_v12  ;;  %v674_v25 = vpack.c.bf16 %v113_v22, %v112_v20  ;;  %v644_v26 = vpack.c.bf16 %v99_v24, %v98_v23  ;;  %v82_v27 = vld [vmem:[%s1173_s1 + $0x20] sm:$0xff]  ;;  %v83_v28 = vld [vmem:[%s1173_s1 + $0x28] sm:$0xff]  ;;  %v100_v35 = vld [vmem:[%s1173_s1 + $0xb0] sm:$0xff] }
   0x8   :  { %v130_v29 = vld [vmem:[%s1173_s1 + $0x1a0] sm:$0xff]  ;;  %673 = vmatprep.subr.bf16.mxu1 %v672_v21  ;;  %v131_v30 = vld [vmem:[%s1173_s1 + $0x1a8] sm:$0xff]  ;;  %v646_v33 = vpack.c.bf16 %v83_v28, %v82_v27  ;;  %v101_v36 = vld [vmem:[%s1173_s1 + $0xb8] sm:$0xff] }
   0x9   :  { %v114_v31 = vld [vmem:[%s1173_s1 + $0x120] sm:$0xff]  ;;  %v115_v32 = vld [vmem:[%s1173_s1 + $0x128] sm:$0xff]  ;;  %643 = vmatpush3.bf16.msra.mxu0 %v642_v17  ;;  %v676_v34 = vpack.c.bf16 %v131_v30, %v130_v29  ;;  %v84_v37 = vld [vmem:[%s1173_s1 + $0x30] sm:$0xff]  ;;  %v648_v39 = vpack.c.bf16 %v101_v36, %v100_v35 }
   0xa   :  { %645 = vmatprep.subr.bf16.mxu0 %v644_v26  ;;  %v678_v38 = vpack.c.bf16 %v115_v32, %v114_v31  ;;  %v85_v40 = vld [vmem:[%s1173_s1 + $0x38] sm:$0xff]  ;;  %v132_v41 = vld [vmem:[%s1173_s1 + $0x1b0] sm:$0xff]  ;;  %v102_v46 = vld [vmem:[%s1173_s1 + $0xc0] sm:$0xff] }
   0xb   :  { %675 = vmatpush3.bf16.msra.mxu1 %v674_v25  ;;  %v133_v42 = vld [vmem:[%s1173_s1 + $0x1b8] sm:$0xff]  ;;  %v116_v44 = vld [vmem:[%s1173_s1 + $0x130] sm:$0xff]  ;;  %v103_v47 = vld [vmem:[%s1173_s1 + $0xc8] sm:$0xff]  ;;  %v650_v48 = vpack.c.bf16 %v85_v40, %v84_v37 }
   0xc   :  { %677 = vmatprep.subr.bf16.mxu1 %v676_v34  ;;  %v680_v43 = vpack.c.bf16 %v133_v42, %v132_v41  ;;  %v117_v45 = vld [vmem:[%s1173_s1 + $0x138] sm:$0xff]  ;;  %v134_v49 = vld [vmem:[%s1173_s1 + $0x1c0] sm:$0xff]  ;;  %v135_v50 = vld [vmem:[%s1173_s1 + $0x1c8] sm:$0xff]  ;;  %v652_v52 = vpack.c.bf16 %v103_v47, %v102_v46 }
   0xd   :  { %647 = vmatpush3.bf16.msra.mxu0 %v646_v33  ;;  %v682_v51 = vpack.c.bf16 %v117_v45, %v116_v44  ;;  %v86_v53 = vld [vmem:[%s1173_s1 + $0x40] sm:$0xff]  ;;  %v87_v54 = vld [vmem:[%s1173_s1 + $0x48] sm:$0xff]  ;;  %v684_v56 = vpack.c.bf16 %v135_v50, %v134_v49  ;;  %v104_v58 = vld [vmem:[%s1173_s1 + $0xd0] sm:$0xff] }
   0xe   :  { %649 = vmatprep.subr.bf16.mxu0 %v648_v39  ;;  %v118_v55 = vld [vmem:[%s1173_s1 + $0x140] sm:$0xff]  ;;  %v119_v57 = vld [vmem:[%s1173_s1 + $0x148] sm:$0xff]  ;;  %v105_v59 = vld [vmem:[%s1173_s1 + $0xd8] sm:$0xff]  ;;  %v654_v62 = vpack.c.bf16 %v87_v54, %v86_v53 }
   0xf   :  { %679 = vmatpush3.bf16.msra.mxu1 %v678_v38  ;;  %v136_v60 = vld [vmem:[%s1173_s1 + $0x1d0] sm:$0xff]  ;;  %v137_v61 = vld [vmem:[%s1173_s1 + $0x1d8] sm:$0xff]  ;;  %v686_v63 = vpack.c.bf16 %v119_v57, %v118_v55  ;;  %v656_v0 = vpack.c.bf16 %v105_v59, %v104_v58  ;;  %v106_v6 = vld [vmem:[%s1173_s1 + $0xe0] sm:$0xff] }
  0x10   :  { %681 = vmatprep.subr.bf16.mxu1 %v680_v43  ;;  %v88_v1 = vld [vmem:[%s1173_s1 + $0x50] sm:$0xff]  ;;  %v89_v2 = vld [vmem:[%s1173_s1 + $0x58] sm:$0xff]  ;;  %v688_v4 = vpack.c.bf16 %v137_v61, %v136_v60  ;;  %v107_v7 = vld [vmem:[%s1173_s1 + $0xe8] sm:$0xff] }
  0x11   :  { %651 = vmatpush3.bf16.msra.mxu0 %v650_v48  ;;  %v120_v3 = vld [vmem:[%s1173_s1 + $0x150] sm:$0xff]  ;;  %v121_v5 = vld [vmem:[%s1173_s1 + $0x158] sm:$0xff]  ;;  %v138_v8 = vld [vmem:[%s1173_s1 + $0x1e0] sm:$0xff]  ;;  %v658_v10 = vpack.c.bf16 %v89_v2, %v88_v1  ;;  %v660_v14 = vpack.c.bf16 %v107_v7, %v106_v6 }
  0x12   :  { %653 = vmatprep.subr.bf16.mxu0 %v652_v52  ;;  %v139_v9 = vld [vmem:[%s1173_s1 + $0x1e8] sm:$0xff]  ;;  %v90_v11 = vld [vmem:[%s1173_s1 + $0x60] sm:$0xff]  ;;  %v690_v13 = vpack.c.bf16 %v121_v5, %v120_v3  ;;  %v108_v19 = vld [vmem:[%s1173_s1 + $0xf0] sm:$0xff] }
  0x13   :  { %683 = vmatpush3.bf16.msra.mxu1 %v682_v51  ;;  %v91_v12 = vld [vmem:[%s1173_s1 + $0x68] sm:$0xff]  ;;  %v122_v15 = vld [vmem:[%s1173_s1 + $0x160] sm:$0xff]  ;;  %v692_v18 = vpack.c.bf16 %v139_v9, %v138_v8  ;;  %v109_v20 = vld [vmem:[%s1173_s1 + $0xf8] sm:$0xff] }
  0x14   :  { %685 = vmatprep.subr.bf16.mxu1 %v684_v56  ;;  %v123_v16 = vld [vmem:[%s1173_s1 + $0x168] sm:$0xff]  ;;  %v17_v21 = vld [vmem:[%s1174_s0 + $0x18] sm:$0xff]  ;;  %v140_v22 = vld [vmem:[%s1173_s1 + $0x1f0] sm:$0xff]  ;;  %v662_v24 = vpack.c.bf16 %v91_v12, %v90_v11  ;;  %v664_v26 = vpack.c.bf16 %v109_v20, %v108_v19 }
  0x15   :  { %655 = vmatpush3.bf16.msra.mxu0 %v654_v62  ;;  %v15_v17 = vld [vmem:[%s1174_s0 + $0x8] sm:$0xff]  ;;  %v141_v23 = vld [vmem:[%s1173_s1 + $0x1f8] sm:$0xff]  ;;  %358 = vmatprep.mubr.f32.mxu1 %v17_v21  ;;  %v694_v25 = vpack.c.bf16 %v123_v16, %v122_v15  ;;  %v92_v27 = vld [vmem:[%s1173_s1 + $0x70] sm:$0xff] }
  0x16   :  { %657 = vmatprep.subr.bf16.mxu0 %v656_v0  ;;  %213 = vmatprep.mubr.f32.mxu0 %v15_v17  ;;  %v93_v28 = vld [vmem:[%s1173_s1 + $0x78] sm:$0xff]  ;;  %v696_v29 = vpack.c.bf16 %v141_v23, %v140_v22  ;;  %v124_v30 = vld [vmem:[%s1173_s1 + $0x170] sm:$0xff]  ;;  %v14_v34 = vld [vmem:[%s1174_s0] sm:$0xff] }
  0x17   :  { %687 = vmatpush3.bf16.msra.mxu1 %v686_v63  ;;  %v125_v31 = vld [vmem:[%s1173_s1 + $0x178] sm:$0xff]  ;;  %v666_v32 = vpack.c.bf16 %v93_v28, %v92_v27  ;;  %v16_v35 = vld [vmem:[%s1174_s0 + $0x10] sm:$0xff]  ;;  %v19_v36 = vld [vmem:[%s1174_s0 + $0x28] sm:$0xff] }
  0x18   :  { %689 = vmatprep.subr.bf16.mxu1 %v688_v4  ;;  %v698_v33 = vpack.c.bf16 %v125_v31, %v124_v30  ;;  %v21_v37 = vld [vmem:[%s1174_s0 + $0x38] sm:$0xff]  ;;  %v18_v38 = vld [vmem:[%s1174_s0 + $0x20] sm:$0xff]  ;;  %v20_v39 = vld [vmem:[%s1174_s0 + $0x30] sm:$0xff] }
  0x19   :  { %659 = vmatpush3.bf16.msra.mxu0 %v658_v10  ;;  %v23_v40 = vld [vmem:[%s1174_s0 + $0x48] sm:$0xff]  ;;  %v25_v41 = vld [vmem:[%s1174_s0 + $0x58] sm:$0xff]  ;;  %v22_v42 = vld [vmem:[%s1174_s0 + $0x40] sm:$0xff] }
  0x1a   :  { %661 = vmatprep.subr.bf16.mxu0 %v660_v14  ;;  %v24_v43 = vld [vmem:[%s1174_s0 + $0x50] sm:$0xff]  ;;  %v27_v44 = vld [vmem:[%s1174_s0 + $0x68] sm:$0xff]  ;;  %v29_v45 = vld [vmem:[%s1174_s0 + $0x78] sm:$0xff] }
  0x1b   :  { %691 = vmatpush3.bf16.msra.mxu1 %v690_v13  ;;  %v26_v46 = vld [vmem:[%s1174_s0 + $0x60] sm:$0xff]  ;;  %v28_v47 = vld [vmem:[%s1174_s0 + $0x70] sm:$0xff]  ;;  %v31_v48 = vld [vmem:[%s1174_s0 + $0x88] sm:$0xff] }
  0x1c   :  { %693 = vmatprep.subr.bf16.mxu1 %v692_v18  ;;  %v33_v49 = vld [vmem:[%s1174_s0 + $0x98] sm:$0xff]  ;;  %v30_v50 = vld [vmem:[%s1174_s0 + $0x80] sm:$0xff]  ;;  %v32_v51 = vld [vmem:[%s1174_s0 + $0x90] sm:$0xff] }
  0x1d   :  { %663 = vmatpush3.bf16.msra.mxu0 %v662_v24  ;;  %v35_v52 = vld [vmem:[%s1174_s0 + $0xa8] sm:$0xff]  ;;  %v37_v53 = vld [vmem:[%s1174_s0 + $0xb8] sm:$0xff]  ;;  %v34_v54 = vld [vmem:[%s1174_s0 + $0xa0] sm:$0xff] }
  0x1e   :  { %665 = vmatprep.subr.bf16.mxu0 %v664_v26  ;;  %v36_v55 = vld [vmem:[%s1174_s0 + $0xb0] sm:$0xff]  ;;  %v39_v56 = vld [vmem:[%s1174_s0 + $0xc8] sm:$0xff]  ;;  %v41_v57 = vld [vmem:[%s1174_s0 + $0xd8] sm:$0xff] }
  0x1f   :  { %695 = vmatpush3.bf16.msra.mxu1 %v694_v25  ;;  %v38_v58 = vld [vmem:[%s1174_s0 + $0xc0] sm:$0xff]  ;;  %v40_v59 = vld [vmem:[%s1174_s0 + $0xd0] sm:$0xff]  ;;  %v43_v60 = vld [vmem:[%s1174_s0 + $0xe8] sm:$0xff] }
  0x20   :  { %697 = vmatprep.subr.bf16.mxu1 %v696_v29  ;;  %v45_v61 = vld [vmem:[%s1174_s0 + $0xf8] sm:$0xff]  ;;  %v42_v62 = vld [vmem:[%s1174_s0 + $0xe0] sm:$0xff]  ;;  %v44_v63 = vld [vmem:[%s1174_s0 + $0xf0] sm:$0xff] }
  0x21   :  { %667 = vmatpush3.bf16.msra.mxu0 %v666_v32  ;;  %v47_v0 = vld [vmem:[%s1174_s0 + $0x108] sm:$0xff]  ;;  %v49_v1 = vld [vmem:[%s1174_s0 + $0x118] sm:$0xff]  ;;  %v46_v2 = vld [vmem:[%s1174_s0 + $0x100] sm:$0xff] }
  0x22   :  { %v48_v3 = vld [vmem:[%s1174_s0 + $0x110] sm:$0xff]  ;;  %v51_v4 = vld [vmem:[%s1174_s0 + $0x128] sm:$0xff]  ;;  %v53_v5 = vld [vmem:[%s1174_s0 + $0x138] sm:$0xff] }
  0x23   :  { %699 = vmatpush3.bf16.msra.mxu1 %v698_v33  ;;  %v50_v6 = vld [vmem:[%s1174_s0 + $0x120] sm:$0xff]  ;;  %v52_v7 = vld [vmem:[%s1174_s0 + $0x130] sm:$0xff]  ;;  %v55_v8 = vld [vmem:[%s1174_s0 + $0x148] sm:$0xff] }
  0x24   :  { %214 = vmatmul.mubr.f32.vlgmr.msra.gmra.mrb[0].mxu0 %v14_v34  ;;  %v57_v9 = vld [vmem:[%s1174_s0 + $0x158] sm:$0xff]  ;;  %v54_v10 = vld [vmem:[%s1174_s0 + $0x140] sm:$0xff]  ;;  %v56_v11 = vld [vmem:[%s1174_s0 + $0x150] sm:$0xff] }
  0x25   :  { %218 = vmatprep.mubr.f32.mxu0 %v19_v36  ;;  %v59_v12 = vld [vmem:[%s1174_s0 + $0x168] sm:$0xff]  ;;  %v61_v13 = vld [vmem:[%s1174_s0 + $0x178] sm:$0xff]  ;;  %v58_v14 = vld [vmem:[%s1174_s0 + $0x160] sm:$0xff] }
  0x26   :  { %359 = vmatmul.mubr.f32.vlgmr.msra.gmra.mrb[0].mxu1 %v16_v35  ;;  %v60_v15 = vld [vmem:[%s1174_s0 + $0x170] sm:$0xff]  ;;  %v63_v16 = vld [vmem:[%s1174_s0 + $0x188] sm:$0xff]  ;;  %v65_v17 = vld [vmem:[%s1174_s0 + $0x198] sm:$0xff] }
  0x27   :  { %363 = vmatprep.mubr.f32.mxu1 %v21_v37  ;;  %v62_v18 = vld [vmem:[%s1174_s0 + $0x180] sm:$0xff]  ;;  %v64_v19 = vld [vmem:[%s1174_s0 + $0x190] sm:$0xff]  ;;  %v67_v20 = vld [vmem:[%s1174_s0 + $0x1a8] sm:$0xff] }
  0x28   :  { %219 = vmatmul.mubr.f32.gmra.mrb[2].mxu0 %v18_v38  ;;  %v69_v21 = vld [vmem:[%s1174_s0 + $0x1b8] sm:$0xff]  ;;  %v66_v22 = vld [vmem:[%s1174_s0 + $0x1a0] sm:$0xff]  ;;  %v68_v23 = vld [vmem:[%s1174_s0 + $0x1b0] sm:$0xff] }
  0x29   :  { %223 = vmatprep.mubr.f32.mxu0 %v23_v40  ;;  %v71_v24 = vld [vmem:[%s1174_s0 + $0x1c8] sm:$0xff]  ;;  %v73_v25 = vld [vmem:[%s1174_s0 + $0x1d8] sm:$0xff]  ;;  %v70_v26 = vld [vmem:[%s1174_s0 + $0x1c0] sm:$0xff] }
  0x2a   :  { %364 = vmatmul.mubr.f32.gmra.mrb[2].mxu1 %v20_v39  ;;  %v72_v27 = vld [vmem:[%s1174_s0 + $0x1d0] sm:$0xff]  ;;  %v75_v28 = vld [vmem:[%s1174_s0 + $0x1e8] sm:$0xff]  ;;  %v77_v29 = vld [vmem:[%s1174_s0 + $0x1f8] sm:$0xff] }
  0x2b   :  { %368 = vmatprep.mubr.f32.mxu1 %v25_v41  ;;  %v74_v30 = vld [vmem:[%s1174_s0 + $0x1e0] sm:$0xff]  ;;  %v76_v31 = vld [vmem:[%s1174_s0 + $0x1f0] sm:$0xff] }
  0x2c   :  { %224 = vmatmul.mubr.f32.gmra.mrb[4].mxu0 %v22_v42  ;;  %v1107_v33 = vld [vmem:[%s1175_s2] ss:$0 sm:$0xff] }
  0x2d   :  { %228 = vmatprep.mubr.f32.mxu0 %v27_v44 }
  0x2e   :  { %369 = vmatmul.mubr.f32.gmra.mrb[4].mxu1 %v24_v43 }
  0x2f   :  { %373 = vmatprep.mubr.f32.mxu1 %v29_v45 }
  0x30   :  { %229 = vmatmul.mubr.f32.gmra.mrb[6].mxu0 %v26_v46 }
  0x31   :  { %233 = vmatprep.mubr.f32.mxu0 %v31_v48 }
  0x32   :  { %374 = vmatmul.mubr.f32.gmra.mrb[6].mxu1 %v28_v47 }
  0x33   :  { %378 = vmatprep.mubr.f32.mxu1 %v33_v49 }
  0x34   :  { %234 = vmatmul.mubr.f32.gmra.mrb[8].mxu0 %v30_v50 }
  0x35   :  { %238 = vmatprep.mubr.f32.mxu0 %v35_v52 }
  0x36   :  { %379 = vmatmul.mubr.f32.gmra.mrb[8].mxu1 %v32_v51 }
  0x37   :  { %383 = vmatprep.mubr.f32.mxu1 %v37_v53 }
  0x38   :  { %239 = vmatmul.mubr.f32.gmra.mrb[10].mxu0 %v34_v54 }
  0x39   :  { %243 = vmatprep.mubr.f32.mxu0 %v39_v56 }
  0x3a   :  { %384 = vmatmul.mubr.f32.gmra.mrb[10].mxu1 %v36_v55 }
  0x3b   :  { %388 = vmatprep.mubr.f32.mxu1 %v41_v57 }
  0x3c   :  { %244 = vmatmul.mubr.f32.gmra.mrb[12].mxu0 %v38_v58 }
  0x3d   :  { %248 = vmatprep.mubr.f32.mxu0 %v43_v60 }
  0x3e   :  { %389 = vmatmul.mubr.f32.gmra.mrb[12].mxu1 %v40_v59 }
  0x3f   :  { %393 = vmatprep.mubr.f32.mxu1 %v45_v61 }
  0x40   :  { %249 = vmatmul.mubr.f32.gmra.mrb[14].mxu0 %v42_v62 }
  0x41   :  { %253 = vmatprep.mubr.f32.mxu0 %v47_v0 }
  0x42   :  { %394 = vmatmul.mubr.f32.gmra.mrb[14].mxu1 %v44_v63 }
  0x43   :  { %398 = vmatprep.mubr.f32.mxu1 %v49_v1 }
  0x44   :  { %254 = vmatmul.mubr.f32.gmra.mrb[16].mxu0 %v46_v2 }
  0x45   :  { %258 = vmatprep.mubr.f32.mxu0 %v51_v4 }
  0x46   :  { %399 = vmatmul.mubr.f32.gmra.mrb[16].mxu1 %v48_v3 }
  0x47   :  { %403 = vmatprep.mubr.f32.mxu1 %v53_v5 }
  0x48   :  { %259 = vmatmul.mubr.f32.gmra.mrb[18].mxu0 %v50_v6 }
  0x49   :  { %263 = vmatprep.mubr.f32.mxu0 %v55_v8 }
  0x4a   :  { %404 = vmatmul.mubr.f32.gmra.mrb[18].mxu1 %v52_v7 }
  0x4b   :  { %408 = vmatprep.mubr.f32.mxu1 %v57_v9 }
  0x4c   :  { %264 = vmatmul.mubr.f32.gmra.mrb[20].mxu0 %v54_v10 }
  0x4d   :  { %268 = vmatprep.mubr.f32.mxu0 %v59_v12 }
  0x4e   :  { %409 = vmatmul.mubr.f32.gmra.mrb[20].mxu1 %v56_v11 }
  0x4f   :  { %413 = vmatprep.mubr.f32.mxu1 %v61_v13 }
  0x50   :  { %269 = vmatmul.mubr.f32.gmra.mrb[22].mxu0 %v58_v14 }
  0x51   :  { %273 = vmatprep.mubr.f32.mxu0 %v63_v16 }
  0x52   :  { %414 = vmatmul.mubr.f32.gmra.mrb[22].mxu1 %v60_v15 }
  0x53   :  { %418 = vmatprep.mubr.f32.mxu1 %v65_v17 }
  0x54   :  { %274 = vmatmul.mubr.f32.gmra.mrb[24].mxu0 %v62_v18 }
  0x55   :  { %278 = vmatprep.mubr.f32.mxu0 %v67_v20 }
  0x56   :  { %419 = vmatmul.mubr.f32.gmra.mrb[24].mxu1 %v64_v19 }
  0x57   :  { %423 = vmatprep.mubr.f32.mxu1 %v69_v21 }
  0x58   :  { %279 = vmatmul.mubr.f32.gmra.mrb[26].mxu0 %v66_v22 }
  0x59   :  { %283 = vmatprep.mubr.f32.mxu0 %v71_v24 }
  0x5a   :  { %424 = vmatmul.mubr.f32.gmra.mrb[26].mxu1 %v68_v23 }
  0x5b   :  { %428 = vmatprep.mubr.f32.mxu1 %v73_v25 }
  0x5c   :  { %284 = vmatmul.mubr.f32.gmra.mrb[28].mxu0 %v70_v26 }
  0x5d   :  { %288 = vmatprep.mubr.f32.mxu0 %v75_v28 }
  0x5e   :  { %429 = vmatmul.mubr.f32.gmra.mrb[28].mxu1 %v72_v27 }
  0x5f   :  { %433 = vmatprep.mubr.f32.mxu1 %v77_v29 }
  0x60   :  { %289 = vmatmul.mubr.f32.gmra.mrb[30].mxu0 %v74_v30 }
  0x62   :  { %434 = vmatmul.mubr.f32.gmra.mrb[30].mxu1 %v76_v31 }
  0xf7   :  { %v508_v32 = vpop.f32.mrb[0].mxu0 }
  0xf8   :  { %v509_v34 = vpop.f32.mrb[1].mxu0 }
  0xf9   :  { %v588_v35 = vpop.f32.mrb[0].mxu1  ;;  %v510_v36 = vadd.f32 %v509_v34, %v508_v32 }
  0xfa   :  { %v589_v37 = vpop.f32.mrb[1].mxu1 }
  0xfb   :  { %v590_v38 = vadd.f32 %v589_v37, %v588_v35  ;;  %v216_v39 = vadd.f32 %v510_v36, %v1107_v33  ;;  %v511_v40 = vpop.f32.mrb[2].mxu0 }
  0xfc   :  { %v512_v41 = vpop.f32.mrb[3].mxu0 }
  0xfd   :  { %v591_v42 = vpop.f32.mrb[2].mxu1  ;;  %v361_v43 = vadd.f32 %v590_v38, %v216_v39  ;;  %v513_v44 = vadd.f32 %v512_v41, %v511_v40 }
  0xfe   :  { %v592_v45 = vpop.f32.mrb[3].mxu1 }
  0xff   :  { %v593_v46 = vadd.f32 %v592_v45, %v591_v42  ;;  %v439_v47 = vmax.f32 %v361_v43, 0.0  ;;  %v221_v48 = vadd.f32 %v513_v44, %v1107_v33  ;;  %v514_v49 = vpop.f32.mrb[4].mxu0 }
 0x100   :  { %v515_v50 = vpop.f32.mrb[5].mxu0 }
 0x101   :  { %v594_v51 = vpop.f32.mrb[4].mxu1  ;;  %455 = vst [vmem:[%s1176_s3] sm:$0xff] %v439_v47  ;;  %v366_v52 = vadd.f32 %v593_v46, %v221_v48  ;;  %v516_v53 = vadd.f32 %v515_v50, %v514_v49 }
 0x102   :  { %v595_v54 = vpop.f32.mrb[5].mxu1 }
 0x103   :  { %v596_v55 = vadd.f32 %v595_v54, %v594_v51  ;;  %v440_v56 = vmax.f32 %v366_v52, 0.0  ;;  %v226_v57 = vadd.f32 %v516_v53, %v1107_v33  ;;  %v517_v58 = vpop.f32.mrb[6].mxu0 }
 0x104   :  { %v518_v59 = vpop.f32.mrb[7].mxu0 }
 0x105   :  { %v597_v60 = vpop.f32.mrb[6].mxu1  ;;  %456 = vst [vmem:[%s1176_s3 + $0x8] sm:$0xff] %v440_v56  ;;  %v371_v61 = vadd.f32 %v596_v55, %v226_v57  ;;  %v519_v62 = vadd.f32 %v518_v59, %v517_v58 }
 0x106   :  { %v598_v63 = vpop.f32.mrb[7].mxu1 }
 0x107   :  { %v599_v0 = vadd.f32 %v598_v63, %v597_v60  ;;  %v441_v1 = vmax.f32 %v371_v61, 0.0  ;;  %v231_v2 = vadd.f32 %v519_v62, %v1107_v33  ;;  %v520_v3 = vpop.f32.mrb[8].mxu0 }
 0x108   :  { %v521_v4 = vpop.f32.mrb[9].mxu0 }
 0x109   :  { %v600_v5 = vpop.f32.mrb[8].mxu1  ;;  %457 = vst [vmem:[%s1176_s3 + $0x10] sm:$0xff] %v441_v1  ;;  %v376_v6 = vadd.f32 %v599_v0, %v231_v2  ;;  %v522_v7 = vadd.f32 %v521_v4, %v520_v3 }
 0x10a   :  { %v601_v8 = vpop.f32.mrb[9].mxu1 }
 0x10b   :  { %v602_v9 = vadd.f32 %v601_v8, %v600_v5  ;;  %v442_v10 = vmax.f32 %v376_v6, 0.0  ;;  %v236_v11 = vadd.f32 %v522_v7, %v1107_v33  ;;  %v523_v12 = vpop.f32.mrb[10].mxu0 }
 0x10c   :  { %v524_v13 = vpop.f32.mrb[11].mxu0 }
 0x10d   :  { %v603_v14 = vpop.f32.mrb[10].mxu1  ;;  %458 = vst [vmem:[%s1176_s3 + $0x18] sm:$0xff] %v442_v10  ;;  %v381_v15 = vadd.f32 %v602_v9, %v236_v11  ;;  %v525_v16 = vadd.f32 %v524_v13, %v523_v12 }
 0x10e   :  { %v604_v17 = vpop.f32.mrb[11].mxu1 }
 0x10f   :  { %v605_v18 = vadd.f32 %v604_v17, %v603_v14  ;;  %v443_v19 = vmax.f32 %v381_v15, 0.0  ;;  %v241_v20 = vadd.f32 %v525_v16, %v1107_v33  ;;  %v526_v21 = vpop.f32.mrb[12].mxu0 }
 0x110   :  { %v527_v22 = vpop.f32.mrb[13].mxu0 }
 0x111   :  { %v606_v23 = vpop.f32.mrb[12].mxu1  ;;  %459 = vst [vmem:[%s1176_s3 + $0x20] sm:$0xff] %v443_v19  ;;  %v386_v24 = vadd.f32 %v605_v18, %v241_v20  ;;  %v528_v25 = vadd.f32 %v527_v22, %v526_v21 }
 0x112   :  { %v607_v26 = vpop.f32.mrb[13].mxu1 }
 0x113   :  { %v608_v27 = vadd.f32 %v607_v26, %v606_v23  ;;  %v444_v28 = vmax.f32 %v386_v24, 0.0  ;;  %v246_v29 = vadd.f32 %v528_v25, %v1107_v33  ;;  %v529_v30 = vpop.f32.mrb[14].mxu0 }
 0x114   :  { %v530_v31 = vpop.f32.mrb[15].mxu0 }
 0x115   :  { %v609_v32 = vpop.f32.mrb[14].mxu1  ;;  %460 = vst [vmem:[%s1176_s3 + $0x28] sm:$0xff] %v444_v28  ;;  %v391_v34 = vadd.f32 %v608_v27, %v246_v29  ;;  %v531_v35 = vadd.f32 %v530_v31, %v529_v30 }
 0x116   :  { %v610_v36 = vpop.f32.mrb[15].mxu1 }
 0x117   :  { %v611_v37 = vadd.f32 %v610_v36, %v609_v32  ;;  %v445_v38 = vmax.f32 %v391_v34, 0.0  ;;  %v251_v39 = vadd.f32 %v531_v35, %v1107_v33  ;;  %v532_v40 = vpop.f32.mrb[16].mxu0 }
 0x118   :  { %v533_v41 = vpop.f32.mrb[17].mxu0 }
 0x119   :  { %v612_v42 = vpop.f32.mrb[16].mxu1  ;;  %461 = vst [vmem:[%s1176_s3 + $0x30] sm:$0xff] %v445_v38  ;;  %v396_v43 = vadd.f32 %v611_v37, %v251_v39  ;;  %v534_v44 = vadd.f32 %v533_v41, %v532_v40 }
 0x11a   :  { %v613_v45 = vpop.f32.mrb[17].mxu1 }
 0x11b   :  { %v614_v46 = vadd.f32 %v613_v45, %v612_v42  ;;  %v446_v47 = vmax.f32 %v396_v43, 0.0  ;;  %v256_v48 = vadd.f32 %v534_v44, %v1107_v33  ;;  %v535_v49 = vpop.f32.mrb[18].mxu0 }
 0x11c   :  { %v536_v50 = vpop.f32.mrb[19].mxu0 }
 0x11d   :  { %v615_v51 = vpop.f32.mrb[18].mxu1  ;;  %462 = vst [vmem:[%s1176_s3 + $0x38] sm:$0xff] %v446_v47  ;;  %v401_v52 = vadd.f32 %v614_v46, %v256_v48  ;;  %v537_v53 = vadd.f32 %v536_v50, %v535_v49 }
 0x11e   :  { %v616_v54 = vpop.f32.mrb[19].mxu1 }
 0x11f   :  { %v617_v55 = vadd.f32 %v616_v54, %v615_v51  ;;  %v447_v56 = vmax.f32 %v401_v52, 0.0  ;;  %v261_v57 = vadd.f32 %v537_v53, %v1107_v33  ;;  %v538_v58 = vpop.f32.mrb[20].mxu0 }
 0x120   :  { %v539_v59 = vpop.f32.mrb[21].mxu0 }
 0x121   :  { %v618_v60 = vpop.f32.mrb[20].mxu1  ;;  %463 = vst [vmem:[%s1176_s3 + $0x40] sm:$0xff] %v447_v56  ;;  %v406_v61 = vadd.f32 %v617_v55, %v261_v57  ;;  %v540_v62 = vadd.f32 %v539_v59, %v538_v58 }
 0x122   :  { %v619_v63 = vpop.f32.mrb[21].mxu1 }
 0x123   :  { %v620_v0 = vadd.f32 %v619_v63, %v618_v60  ;;  %v448_v1 = vmax.f32 %v406_v61, 0.0  ;;  %v266_v2 = vadd.f32 %v540_v62, %v1107_v33  ;;  %v541_v3 = vpop.f32.mrb[22].mxu0 }
 0x124   :  { %v542_v4 = vpop.f32.mrb[23].mxu0 }
 0x125   :  { %v621_v5 = vpop.f32.mrb[22].mxu1  ;;  %464 = vst [vmem:[%s1176_s3 + $0x48] sm:$0xff] %v448_v1  ;;  %v411_v6 = vadd.f32 %v620_v0, %v266_v2  ;;  %v543_v7 = vadd.f32 %v542_v4, %v541_v3 }
 0x126   :  { %v622_v8 = vpop.f32.mrb[23].mxu1 }
 0x127   :  { %v623_v9 = vadd.f32 %v622_v8, %v621_v5  ;;  %v449_v10 = vmax.f32 %v411_v6, 0.0  ;;  %v271_v11 = vadd.f32 %v543_v7, %v1107_v33  ;;  %v544_v12 = vpop.f32.mrb[24].mxu0 }
 0x128   :  { %v545_v13 = vpop.f32.mrb[25].mxu0 }
 0x129   :  { %v624_v14 = vpop.f32.mrb[24].mxu1  ;;  %465 = vst [vmem:[%s1176_s3 + $0x50] sm:$0xff] %v449_v10  ;;  %v416_v15 = vadd.f32 %v623_v9, %v271_v11  ;;  %v546_v16 = vadd.f32 %v545_v13, %v544_v12 }
 0x12a   :  { %v625_v17 = vpop.f32.mrb[25].mxu1 }
 0x12b   :  { %v626_v18 = vadd.f32 %v625_v17, %v624_v14  ;;  %v450_v19 = vmax.f32 %v416_v15, 0.0  ;;  %v276_v20 = vadd.f32 %v546_v16, %v1107_v33  ;;  %v547_v21 = vpop.f32.mrb[26].mxu0 }
 0x12c   :  { %v548_v22 = vpop.f32.mrb[27].mxu0 }
 0x12d   :  { %v627_v23 = vpop.f32.mrb[26].mxu1  ;;  %466 = vst [vmem:[%s1176_s3 + $0x58] sm:$0xff] %v450_v19  ;;  %v421_v24 = vadd.f32 %v626_v18, %v276_v20  ;;  %v549_v25 = vadd.f32 %v548_v22, %v547_v21 }
 0x12e   :  { %v628_v26 = vpop.f32.mrb[27].mxu1 }
 0x12f   :  { %v629_v27 = vadd.f32 %v628_v26, %v627_v23  ;;  %v451_v28 = vmax.f32 %v421_v24, 0.0  ;;  %v281_v29 = vadd.f32 %v549_v25, %v1107_v33  ;;  %v550_v30 = vpop.f32.mrb[28].mxu0 }
 0x130   :  { %v551_v31 = vpop.f32.mrb[29].mxu0 }
 0x131   :  { %v630_v32 = vpop.f32.mrb[28].mxu1  ;;  %467 = vst [vmem:[%s1176_s3 + $0x60] sm:$0xff] %v451_v28  ;;  %v426_v34 = vadd.f32 %v629_v27, %v281_v29  ;;  %v552_v35 = vadd.f32 %v551_v31, %v550_v30 }
 0x132   :  { %v631_v36 = vpop.f32.mrb[29].mxu1 }
 0x133   :  { %v632_v37 = vadd.f32 %v631_v36, %v630_v32  ;;  %v452_v38 = vmax.f32 %v426_v34, 0.0  ;;  %v286_v39 = vadd.f32 %v552_v35, %v1107_v33  ;;  %v553_v40 = vpop.f32.mrb[30].mxu0 }
 0x134   :  { %v554_v41 = vpop.f32.mrb[31].mxu0 }
 0x135   :  { %v633_v42 = vpop.f32.mrb[30].mxu1  ;;  %468 = vst [vmem:[%s1176_s3 + $0x68] sm:$0xff] %v452_v38  ;;  %v431_v43 = vadd.f32 %v632_v37, %v286_v39  ;;  %v555_v44 = vadd.f32 %v554_v41, %v553_v40 }
 0x136   :  { %v634_v45 = vpop.f32.mrb[31].mxu1 }
 0x137   :  { %v635_v46 = vadd.f32 %v634_v45, %v633_v42  ;;  %v453_v47 = vmax.f32 %v431_v43, 0.0  ;;  %v291_v48 = vadd.f32 %v555_v44, %v1107_v33 }
 0x139   :  { %469 = vst [vmem:[%s1176_s3 + $0x70] sm:$0xff] %v453_v47  ;;  %v436_v49 = vadd.f32 %v635_v46, %v291_v48 }
 0x13b   :  { %v454_v50 = vmax.f32 %v436_v49, 0.0 }
 0x13d   :  { %470 = vst [vmem:[%s1176_s3 + $0x78] sm:$0xff] %v454_v50 }

// kernel: dolg_forward.17
= control target key start
LH: loop header
LB: loop body
LE: loop exit
PB: predicated region body
PF: predicated region fallthrough
CT: control target
= control target key end

     0   :  { %s784_s12 = smov 0   ;;  %s1025_s0 = inlined_call_operand.vmem [shape: f32[2,64,128], index: 0, kind: input, shape index: {}]   ;;  %s1026_s1 = inlined_call_operand.vmem [shape: f32[128,128], index: 1, kind: input, shape index: {}]   ;;  %s1027_s2 = inlined_call_operand.vmem [shape: f32[1,128], index: 2, kind: input, shape index: {}]   ;;  %s1028_s3 = inlined_call_operand.vmem [shape: f32[2,64,128], index: 3, kind: output, shape index: {}]  }
   0x1 LB: > { %s554_s13 = sadd.s32 4294967295, %s762_s12   ;;  %p558_p0 = scmp.ge.s32.totalorder %s762_s12, 1  ;;  %s762_s12 = sphi %s784_s12, %s13_s12  }
   0x2   : > { %p137_p1 = scmp.lt.s32.totalorder %s762_s12, 3 }
   0x4   : > { %p138_p2 = pnand %p558_p0, %p137_p1 }
   0x5   : > { %v187_v0 = vld [vmem:[%s1026_s1] sm:$0xff] (!%p138_p2)  ;;  %v188_v1 = vld [vmem:[%s1026_s1 + $0x8] sm:$0xff] (!%p138_p2)  ;;  %v189_v2 = vld [vmem:[%s1026_s1 + $0x10] sm:$0xff] (!%p138_p2)  ;;  %p161_p3 = scmp.lt.s32.totalorder (!%p138_p2), %s554_s13, 1 }
   0x6   : > { %141 = sbr.rel (%p138_p2) target bundleno = 295 (0x127), region = 32  ;;  %v636_v3 = vpack.c.bf16 (!%p138_p2), %v188_v1, %v187_v0  ;;  %v190_v4 = vld [vmem:[%s1026_s1 + $0x18] sm:$0xff] (!%p138_p2)  ;;  %v191_v6 = vld [vmem:[%s1026_s1 + $0x20] sm:$0xff] (!%p138_p2)  ;;  %v192_v7 = vld [vmem:[%s1026_s1 + $0x28] sm:$0xff] (!%p138_p2) }
   0x7   : > { %v640_v5 = vpack.c.bf16 (!%p138_p2), %v190_v4, %v189_v2  ;;  %v644_v8 = vpack.c.bf16 (!%p138_p2), %v192_v7, %v191_v6  ;;  %v193_v9 = vld [vmem:[%s1026_s1 + $0x30] sm:$0xff] (!%p138_p2)  ;;  %v194_v10 = vld [vmem:[%s1026_s1 + $0x38] sm:$0xff] (!%p138_p2)  ;;  %v195_v19 = vld [vmem:[%s1026_s1 + $0x40] sm:$0xff] (!%p138_p2) }
   0x8   : > { %637 = vmatprep.subr.bf16.mxu0 (!%p138_p2), %v636_v3  ;;  %668 = vmatprep.subr.bf16.mxu1 (!%p138_p2), %v636_v3  ;;  %v648_v18 = vpack.c.bf16 (!%p138_p2), %v194_v10, %v193_v9  ;;  %v196_v20 = vld [vmem:[%s1026_s1 + $0x48] sm:$0xff] (!%p138_p2)  ;;  %v197_v26 = vld [vmem:[%s1026_s1 + $0x50] sm:$0xff] (!%p138_p2)  ;;  %v198_v27 = vld [vmem:[%s1026_s1 + $0x58] sm:$0xff] (!%p138_p2) }
   0x9   : > { %639 = vmatpush3.bf16.msra.mxu0 (!%p138_p2), %v636_v3  ;;  %676 = vmatpush3.bf16.msra.mxu1 (!%p138_p2), %v636_v3  ;;  %v652_v25 = vpack.c.bf16 (!%p138_p2), %v196_v20, %v195_v19  ;;  %v656_v31 = vpack.c.bf16 (!%p138_p2), %v198_v27, %v197_v26  ;;  %v199_v32 = vld [vmem:[%s1026_s1 + $0x60] sm:$0xff] (!%p138_p2)  ;;  %v200_v33 = vld [vmem:[%s1026_s1 + $0x68] sm:$0xff] (!%p138_p2)  ;;  %v201_v39 = vld [vmem:[%s1026_s1 + $0x70] sm:$0xff] (!%p138_p2) }
   0xa   : > { %641 = vmatprep.subr.bf16.mxu0 (!%p138_p2), %v640_v5  ;;  %669 = vmatprep.subr.bf16.mxu1 (!%p138_p2), %v640_v5  ;;  %v660_v38 = vpack.c.bf16 (!%p138_p2), %v200_v33, %v199_v32  ;;  %v202_v40 = vld [vmem:[%s1026_s1 + $0x78] sm:$0xff] (!%p138_p2) }
   0xb   : > { %v664_v41 = vpack.c.bf16 (!%p138_p2), %v202_v40, %v201_v39 }
   0xd   : > { %s1030_s13 = smov (!%p161_p3, %s554_s13), 1  ;;  %643 = vmatpush3.bf16.msra.mxu0 %v640_v5  ;;  %677 = vmatpush3.bf16.msra.mxu1 %v640_v5 }
   0xe   : > { %s566_s26 = sshll.u32 %s1030_s13, 6  ;;  %645 = vmatprep.subr.bf16.mxu0 %v644_v8  ;;  %670 = vmatprep.subr.bf16.mxu1 %v644_v8 }
   0xf   : > { %s821_s4 = scalar_lea.vmem %s1025_s0, %s566_s26  ;;  %s995_s30 = scalar_lea.vmem %s1028_s3, %s566_s26 }
  0x10   : > { %v827_v11 = vld [vmem:[%s821_s4] sm:$0xff]  ;;  %v835_v15 = vld [vmem:[%s821_s4 + $0x10] sm:$0xff]  ;;  %v848_v21 = vld [vmem:[%s821_s4 + $0x8] sm:$0xff] }
  0x11   : > { %v830_v12 = vld [vmem:[%s821_s4 + $0x20] sm:$0xff]  ;;  %v179_v13 = vmax.f32 %v827_v11, 0.0  ;;  %v379_v16 = vmul.f32 %v827_v11, %v827_v11  ;;  %v381_v17 = vmul.f32 %v835_v15, %v835_v15  ;;  %v851_v22 = vld [vmem:[%s821_s4 + $0x18] sm:$0xff]  ;;  %v380_v24 = vmul.f32 %v848_v21, %v848_v21  ;;  %647 = vmatpush3.bf16.msra.mxu0 %v644_v8  ;;  %678 = vmatpush3.bf16.msra.mxu1 %v644_v8  ;;  %v864_v28 = vld [vmem:[%s821_s4 + $0x28] sm:$0xff] }
  0x12   : > { %v183_v14 = vmax.f32 %v830_v12, 0.0  ;;  %v382_v23 = vmul.f32 %v851_v22, %v851_v22  ;;  %649 = vmatprep.subr.bf16.mxu0 %v648_v18  ;;  %671 = vmatprep.subr.bf16.mxu1 %v648_v18  ;;  %v384_v29 = vmul.f32 %v864_v28, %v864_v28  ;;  %v383_v30 = vmul.f32 %v830_v12, %v830_v12  ;;  %v877_v34 = vld [vmem:[%s821_s4 + $0x30] sm:$0xff]  ;;  %v880_v35 = vld [vmem:[%s821_s4 + $0x38] sm:$0xff] }
  0x13   : > { %624 = vmatprep.mubr.f32.mxu0 %v179_v13  ;;  %391 = vadd.xlane.f32.xlu1 %v381_v17  ;;  %v386_v36 = vmul.f32 %v880_v35, %v880_v35  ;;  %v385_v37 = vmul.f32 %v877_v34, %v877_v34  ;;  %v180_v42 = vmax.f32 %v848_v21, 0.0  ;;  %v184_v43 = vmax.f32 %v864_v28, 0.0 }
  0x14   : > { %630 = vmatprep.mubr.f32.mxu1 %v183_v14  ;;  %387 = vadd.xlane.f32.xlu0 %v379_v16  ;;  %v181_v44 = vmax.f32 %v835_v15, 0.0  ;;  %v185_v45 = vmax.f32 %v877_v34, 0.0  ;;  %v182_v46 = vmax.f32 %v851_v22, 0.0  ;;  %v186_v47 = vmax.f32 %v880_v35, 0.0 }
  0x15   : > { %651 = vmatpush3.bf16.msra.mxu0 %v648_v18  ;;  %679 = vmatpush3.bf16.msra.mxu1 %v648_v18  ;;  %v563_v18 = vld [vmem:[%s1027_s2] ss:$0 sm:$0xff] }
  0x16   : > { %653 = vmatprep.subr.bf16.mxu0 %v652_v25  ;;  %672 = vmatprep.subr.bf16.mxu1 %v652_v25 }
  0x17   : > { %393 = vadd.xlane.f32.xlu1 %v382_v23 }
  0x18   : > { %389 = vadd.xlane.f32.xlu0 %v380_v24 }
  0x19   : > { %655 = vmatpush3.bf16.msra.mxu0 %v652_v25  ;;  %680 = vmatpush3.bf16.msra.mxu1 %v652_v25 }
  0x1a   : > { %657 = vmatprep.subr.bf16.mxu0 %v656_v31  ;;  %673 = vmatprep.subr.bf16.mxu1 %v656_v31 }
  0x1b   : > { %397 = vadd.xlane.f32.xlu1 %v384_v29 }
  0x1c   : > { %395 = vadd.xlane.f32.xlu0 %v383_v30 }
  0x1d   : > { %659 = vmatpush3.bf16.msra.mxu0 %v656_v31  ;;  %681 = vmatpush3.bf16.msra.mxu1 %v656_v31 }
  0x1e   : > { %661 = vmatprep.subr.bf16.mxu0 %v660_v38  ;;  %674 = vmatprep.subr.bf16.mxu1 %v660_v38 }
  0x1f   : > { %401 = vadd.xlane.f32.xlu1 %v386_v36 }
  0x20   : > { %399 = vadd.xlane.f32.xlu0 %v385_v37 }
  0x21   : > { %663 = vmatpush3.bf16.msra.mxu0 %v660_v38  ;;  %682 = vmatpush3.bf16.msra.mxu1 %v660_v38 }
  0x22   : > { %665 = vmatprep.subr.bf16.mxu0 %v664_v41  ;;  %675 = vmatprep.subr.bf16.mxu1 %v664_v41 }
  0x25   : > { %667 = vmatpush3.bf16.msra.mxu0 %v664_v41  ;;  %683 = vmatpush3.bf16.msra.mxu1 %v664_v41 }
  0x28   : > { %625 = vmatmul.mubr.f32.vlgmr.msra.gmra.mrb[0].mxu0 %v180_v42  ;;  %631 = vmatmul.mubr.f32.vlgmr.msra.gmra.mrb[0].mxu1 %v184_v43 }
  0x29   : > { %627 = vmatprep.mubr.f32.mxu0 %v181_v44  ;;  %633 = vmatprep.mubr.f32.mxu1 %v185_v45 }
  0x2c   : > { %628 = vmatmul.mubr.f32.gmra.mrb[2].mxu0 %v182_v46  ;;  %634 = vmatmul.mubr.f32.gmra.mrb[2].mxu1 %v186_v47 }
  0xa0   : > { %v392_v48 = vpop.xlane.xlu1 %391 }
  0xa1   : > { %v388_v49 = vpop.xlane.xlu0 %387  ;;  %692 = vrsqrt.f32 %v392_v48  ;;  %vm419_vm0 = vcmp.eq.f32.partialorder %v392_v48, inf  ;;  %vm421_vm2 = vcmp.eq.f32.partialorder %v392_v48, 0.0  ;;  %v422_v61 = vand.u32 2147483648, %v392_v48 }
  0xa2   : > { %694 = vrsqrt.f32 %v388_v49  ;;  %vm405_vm1 = vcmp.eq.f32.partialorder %v388_v49, inf  ;;  %v408_v0 = vand.u32 2147483648, %v388_v49  ;;  %vm407_vm4 = vcmp.eq.f32.partialorder %v388_v49, 0.0 }
  0xa4   : > { %v394_v50 = vpop.xlane.xlu1 %393 }
  0xa5   : > { %696 = vrsqrt.f32 %v394_v50  ;;  %v898_v51 = vpop.xlane.xlu0 %389  ;;  %vm426_vm3 = vcmp.eq.f32.partialorder %v394_v50, inf  ;;  %v429_v3 = vand.u32 2147483648, %v394_v50  ;;  %vm428_vm5 = vcmp.eq.f32.partialorder %v394_v50, 0.0 }
  0xa6   : > { %698 = vrsqrt.f32 %v898_v51  ;;  %vm412_vm6 = vcmp.eq.f32.partialorder %v898_v51, inf  ;;  %vm414_vm7 = vcmp.eq.f32.partialorder %v898_v51, 0.0  ;;  %v415_v14 = vand.u32 2147483648, %v898_v51 }
  0xa8   : > { %v900_v52 = vpop.xlane.xlu1 %397 }
  0xa9   : > { %v903_v53 = vpop.xlane.xlu0 %395  ;;  %700 = vrsqrt.f32 %v900_v52  ;;  %vm440_vm8 = vcmp.eq.f32.partialorder %v900_v52, inf  ;;  %vm442_vm9 = vcmp.eq.f32.partialorder %v900_v52, 0.0  ;;  %v443_v16 = vand.u32 2147483648, %v900_v52 }
  0xaa   : > { %702 = vrsqrt.f32 %v903_v53  ;;  %vm433_vm10 = vcmp.eq.f32.partialorder %v903_v53, inf  ;;  %v436_v17 = vand.u32 2147483648, %v903_v53  ;;  %vm435_vm11 = vcmp.eq.f32.partialorder %v903_v53, 0.0 }
  0xab   : > { %v693_v54 = vpop.eup %692 }
  0xac   : > { %v695_v55 = vpop.eup %694  ;;  %v418_v57 = vmul.f32 %v693_v54, %v392_v48  ;;  %v906_v59 = vpop.xlane.xlu1 %401 }
  0xad   : > { %v404_v58 = vmul.f32 %v695_v55, %v388_v49  ;;  %v908_v60 = vpop.xlane.xlu0 %399  ;;  %704 = vrsqrt.f32 %v906_v59  ;;  %vm454_vm12 = vcmp.eq.f32.partialorder %v906_v59, inf  ;;  %vm456_vm13 = vcmp.eq.f32.partialorder %v906_v59, 0.0 }
  0xae   : > { %v420_v63 = vsel %vm419_vm0, %v392_v48, %v418_v57  ;;  %706 = vrsqrt.f32 %v908_v60  ;;  %v457_v26 = vand.u32 2147483648, %v906_v59  ;;  %vm447_vm14 = vcmp.eq.f32.partialorder %v908_v60, inf }
  0xaf   : > { %v697_v56 = vpop.eup %696  ;;  %v406_v1 = vsel %vm405_vm1, %v388_v49, %v404_v58  ;;  %v423_v4 = vsel %vm421_vm2, %v422_v61, %v420_v63  ;;  %vm449_vm15 = vcmp.eq.f32.partialorder %v908_v60, 0.0  ;;  %v450_v31 = vand.u32 2147483648, %v908_v60 }
  0xb0   : > { %v425_v62 = vmul.f32 %v697_v56, %v394_v50  ;;  %v699_v2 = vpop.eup %698  ;;  %v409_v6 = vsel %vm407_vm4, %v408_v0, %v406_v1  ;;  %v461_v9 = vmax.f32 %v423_v4, 1e-12 }
  0xb1   : > { %v411_v7 = vmul.f32 %v699_v2, %v898_v51  ;;  %v459_v13 = vmax.f32 %v409_v6, 1e-12 }
  0xb2   : > { %v427_v5 = vsel %vm426_vm3, %v394_v50, %v425_v62  ;;  %708 = vrcp.f32 %v461_v9 }
  0xb3   : > { %v701_v8 = vpop.eup %700  ;;  %v430_v10 = vsel %vm428_vm5, %v429_v3, %v427_v5  ;;  %v413_v23 = vsel %vm412_vm6, %v898_v51, %v411_v7  ;;  %710 = vrcp.f32 %v459_v13 }
  0xb4   : > { %v703_v19 = vpop.eup %702  ;;  %v462_v20 = vmax.f32 %v430_v10, 1e-12  ;;  %v439_v24 = vmul.f32 %v701_v8, %v900_v52  ;;  %v416_v38 = vsel %vm414_vm7, %v415_v14, %v413_v23 }
  0xb5   : > { %v432_v39 = vmul.f32 %v703_v19, %v903_v53 }
  0xb6   : > { %712 = vrcp.f32 %v462_v20  ;;  %v441_v42 = vsel %vm440_vm8, %v900_v52, %v439_v24 }
  0xb7   : > { %v705_v25 = vpop.eup %704  ;;  %v444_v1 = vsel %vm442_vm9, %v443_v16, %v441_v42  ;;  %v434_v2 = vsel %vm433_vm10, %v903_v53, %v432_v39 }
  0xb8   : > { %v707_v30 = vpop.eup %706  ;;  %v453_v45 = vmul.f32 %v705_v25, %v906_v59  ;;  %v437_v10 = vsel %vm435_vm11, %v436_v17, %v434_v2  ;;  %v464_v23 = vmax.f32 %v444_v1, 1e-12 }
  0xb9   : > { %v446_v46 = vmul.f32 %v707_v30, %v908_v60 }
  0xba   : > { %v455_v4 = vsel %vm454_vm12, %v906_v59, %v453_v45 }
  0xbb   : > { %v448_v52 = vsel %vm447_vm14, %v908_v60, %v446_v46  ;;  %v458_v19 = vsel %vm456_vm13, %v457_v26, %v455_v4 }
  0xbc   : > { %v709_v9 = vpop.eup %708  ;;  %v451_v24 = vsel %vm449_vm15, %v450_v31, %v448_v52  ;;  %v466_v53 = vmax.f32 %v458_v19, 1e-12 }
  0xbd   : > { %v711_v16 = vpop.eup %710  ;;  %v465_v17 = vmax.f32 %v451_v24, 1e-12 }
  0xbe   : > { %v468_v2 = vmul.f32 %v711_v16, %v827_v11 }
  0xc0   : > { %v713_v25 = vpop.eup %712 }
  0xfb   : > { %v626_v27 = vpop.f32.mrb[0].mxu0  ;;  %v632_v29 = vpop.f32.mrb[0].mxu1 }
  0xfc   : > { %v934_v32 = vadd.f32 %v626_v27, %v563_v18  ;;  %v936_v33 = vadd.f32 %v632_v29, %v563_v18  ;;  %v276_v36 = vpop.f32.mrb[1].mxu0  ;;  %v296_v37 = vpop.f32.mrb[1].mxu1  ;;  %v463_v27 = vmax.f32 %v437_v10, 1e-12 }
  0xfd   : > { %v941_v40 = vadd.f32 %v563_v18, %v276_v36  ;;  %v943_v41 = vadd.f32 %v563_v18, %v296_v37 }
  0xfe   : > { %v324_v43 = vmin.f32 %v934_v32, 20.0  ;;  %v328_v44 = vmin.f32 %v936_v33, 20.0  ;;  %vm316_vm0 = vcmp.gt.f32.partialorder %v934_v32, 20.0  ;;  %vm320_vm1 = vcmp.gt.f32.partialorder %v936_v33, 20.0 }
  0xff   : > { %v323_v47 = vmin.f32 %v941_v40, 20.0  ;;  %v327_v48 = vmin.f32 %v943_v41, 20.0  ;;  %v629_v49 = vpop.f32.mrb[2].mxu0  ;;  %v635_v50 = vpop.f32.mrb[2].mxu1  ;;  %vm315_vm2 = vcmp.gt.f32.partialorder %v941_v40, 20.0  ;;  %vm319_vm3 = vcmp.gt.f32.partialorder %v943_v41, 20.0 }
 0x100   : > { %v333_v51 = vmul.f32 1.442695, %v324_v43  ;;  %v341_v54 = vmul.f32 1.442695, %v328_v44  ;;  %v954_v55 = vadd.f32 %v629_v49, %v563_v18  ;;  %v956_v56 = vadd.f32 %v635_v50, %v563_v18  ;;  %v286_v57 = vpop.f32.mrb[3].mxu0  ;;  %v306_v58 = vpop.f32.mrb[3].mxu1 }
 0x101   : > { %v331_v61 = vmul.f32 1.442695, %v323_v47  ;;  %v339_v62 = vmul.f32 1.442695, %v327_v48  ;;  %v958_v63 = vadd.f32 %v563_v18, %v286_v57  ;;  %v960_v0 = vadd.f32 %v563_v18, %v306_v58 }
 0x102   : > { %714 = vpow2.f32 %v333_v51  ;;  %v326_v3 = vmin.f32 %v954_v55, 20.0  ;;  %v330_v5 = vmin.f32 %v956_v56, 20.0  ;;  %v460_v18 = vmax.f32 %v416_v38, 1e-12 }
 0x103   : > { %716 = vpow2.f32 %v341_v54  ;;  %v325_v6 = vmin.f32 %v958_v63, 20.0  ;;  %v329_v8 = vmin.f32 %v960_v0, 20.0  ;;  %v472_v58 = vmul.f32 %v709_v9, %v835_v15 }
 0x104   : > { %718 = vpow2.f32 %v331_v61  ;;  %v337_v7 = vmul.f32 1.442695, %v326_v3  ;;  %v345_v13 = vmul.f32 1.442695, %v330_v5  ;;  %v474_v3 = vmul.f32 %v713_v25, %v851_v22 }
 0x105   : > { %720 = vpow2.f32 %v339_v62  ;;  %v335_v14 = vmul.f32 1.442695, %v325_v6  ;;  %v343_v20 = vmul.f32 1.442695, %v329_v8  ;;  %vm318_vm4 = vcmp.gt.f32.partialorder %v954_v55, 20.0 }
 0x106   : > { %722 = vpow2.f32 %v337_v7  ;;  %vm322_vm5 = vcmp.gt.f32.partialorder %v956_v56, 20.0  ;;  %vm317_vm6 = vcmp.gt.f32.partialorder %v958_v63, 20.0  ;;  %vm321_vm7 = vcmp.gt.f32.partialorder %v960_v0, 20.0 }
 0x107   : > { %724 = vpow2.f32 %v345_v13 }
 0x108   : > { %726 = vpow2.f32 %v335_v14 }
 0x109   : > { %728 = vpow2.f32 %v343_v20 }
 0x10a   : > { %730 = vrcp.f32 %v460_v18 }
 0x10b   : > { %732 = vrcp.f32 %v464_v23 }
 0x10c   : > { %v715_v29 = vpop.eup %714  ;;  %734 = vrcp.f32 %v463_v27 }
 0x10d   : > { %v717_v30 = vpop.eup %716  ;;  %736 = vrcp.f32 %v466_v53  ;;  %v348_v59 = vadd.f32 1.0, %v715_v29 }
 0x10e   : > { %v719_v26 = vpop.eup %718  ;;  %738 = vrcp.f32 %v465_v17  ;;  %v352_v36 = vadd.f32 1.0, %v717_v30 }
 0x10f   : > { %v721_v37 = vpop.eup %720  ;;  %740 = vlog2.f32 %v348_v59  ;;  %v347_v60 = vadd.f32 1.0, %v719_v26 }
 0x110   : > { %v723_v31 = vpop.eup %722  ;;  %742 = vlog2.f32 %v352_v36  ;;  %v351_v38 = vadd.f32 1.0, %v721_v37 }
 0x111   : > { %v725_v39 = vpop.eup %724  ;;  %744 = vlog2.f32 %v347_v60  ;;  %v350_v42 = vadd.f32 1.0, %v723_v31 }
 0x112   : > { %v727_v43 = vpop.eup %726  ;;  %746 = vlog2.f32 %v351_v38  ;;  %v354_v44 = vadd.f32 1.0, %v725_v39 }
 0x113   : > { %v729_v45 = vpop.eup %728  ;;  %748 = vlog2.f32 %v350_v42  ;;  %v349_v46 = vadd.f32 1.0, %v727_v43 }
 0x114   : > { %v731_v47 = vpop.eup %730  ;;  %750 = vlog2.f32 %v354_v44  ;;  %v353_v48 = vadd.f32 1.0, %v729_v45 }
 0x115   : > { %v733_v49 = vpop.eup %732  ;;  %752 = vlog2.f32 %v349_v46  ;;  %v470_v1 = vmul.f32 %v731_v47, %v848_v21 }
 0x116   : > { %v735_v50 = vpop.eup %734  ;;  %754 = vlog2.f32 %v353_v48  ;;  %v478_v6 = vmul.f32 %v733_v49, %v864_v28 }
 0x117   : > { %v737_v51 = vpop.eup %736  ;;  %v476_v52 = vmul.f32 %v735_v50, %v830_v12 }
 0x118   : > { %v739_v54 = vpop.eup %738  ;;  %v482_v21 = vmul.f32 %v737_v51, %v880_v35 }
 0x119   : > { %v741_v57 = vpop.eup %740 }
 0x11a   : > { %v743_v61 = vpop.eup %742  ;;  %v358_v62 = vmul.f32 0.6931472, %v741_v57 }
 0x11b   : > { %v745_v4 = vpop.eup %744  ;;  %v366_v5 = vmul.f32 0.6931472, %v743_v61 }
 0x11c   : > { %v747_v7 = vpop.eup %746  ;;  %v372_v11 = vsel %vm316_vm0, %v934_v32, %v358_v62  ;;  %v356_v15 = vmul.f32 0.6931472, %v745_v4 }
 0x11d   : > { %v749_v22 = vpop.eup %748  ;;  %v484_v8 = vmul.f32 %v470_v1, %v372_v11  ;;  %v376_v12 = vsel %vm320_vm1, %v936_v33, %v366_v5  ;;  %v364_v28 = vmul.f32 0.6931472, %v747_v7 }
 0x11e   : > { %v751_v9 = vpop.eup %750  ;;  %v488_v10 = vmul.f32 %v478_v6, %v376_v12  ;;  %v371_v13 = vsel %vm315_vm2, %v941_v40, %v356_v15  ;;  %v362_v32 = vmul.f32 0.6931472, %v749_v22 }
 0x11f   : > { %v753_v14 = vpop.eup %752  ;;  %492 = vst [vmem:[%s995_s30 + $0x8] sm:$0xff] %v484_v8  ;;  %v483_v35 = vmul.f32 %v468_v2, %v371_v13  ;;  %v375_v16 = vsel %vm319_vm3, %v943_v41, %v364_v28  ;;  %v370_v33 = vmul.f32 0.6931472, %v751_v9 }
 0x120   : > { %v755_v18 = vpop.eup %754  ;;  %496 = vst [vmem:[%s995_s30 + $0x28] sm:$0xff] %v488_v10  ;;  %v487_v19 = vmul.f32 %v476_v52, %v375_v16  ;;  %v374_v20 = vsel %vm318_vm4, %v954_v55, %v362_v32  ;;  %v360_v40 = vmul.f32 0.6931472, %v753_v14  ;;  %v480_v55 = vmul.f32 %v739_v54, %v877_v34 }
 0x121   : > { %491 = vst [vmem:[%s995_s30] sm:$0xff] %v483_v35  ;;  %v486_v23 = vmul.f32 %v474_v3, %v374_v20  ;;  %v378_v24 = vsel %vm322_vm5, %v956_v56, %v370_v33  ;;  %v368_v41 = vmul.f32 0.6931472, %v755_v18 }
 0x122   : > { %495 = vst [vmem:[%s995_s30 + $0x20] sm:$0xff] %v487_v19  ;;  %v490_v25 = vmul.f32 %v482_v21, %v378_v24  ;;  %v373_v27 = vsel %vm317_vm6, %v958_v63, %v360_v40 }
 0x123   : > { %494 = vst [vmem:[%s995_s30 + $0x18] sm:$0xff] %v486_v23  ;;  %v485_v53 = vmul.f32 %v472_v58, %v373_v27  ;;  %v377_v17 = vsel %vm321_vm7, %v960_v0, %v368_v41 }
 0x124   : > { %498 = vst [vmem:[%s995_s30 + $0x38] sm:$0xff] %v490_v25  ;;  %v489_v29 = vmul.f32 %v480_v55, %v377_v17 }
 0x125   : > { %493 = vst [vmem:[%s995_s30 + $0x10] sm:$0xff] %v485_v53 }
 0x126   : > { %497 = vst [vmem:[%s995_s30 + $0x30] sm:$0xff] %v489_v29 }
 0x127 PF: > { %s13_s12 = sadd.s32 1, %s762_s12  }
 0x128   : > { %p10_p4 = scmp.ge.s32.totalorder %s13_s12, 4  }
 0x12a   :  { %12 = sbr.rel (!%p10_p4) target bundleno = 1 (0x1), region = 62 }

// kernel: dolg_forward.13
= control target key start
LH: loop header
LB: loop body
LE: loop exit
PB: predicated region body
PF: predicated region fallthrough
CT: control target
= control target key end

     0   :  { %s2855_s12 = smov 0   ;;  %s2857_s13 = smov 0   ;;  %s4072_s0 = inlined_call_operand.vmem [shape: f32[9,2,64,160], index: 0, kind: input, shape index: {}]   ;;  %s4073_s1 = inlined_call_operand.vmem [shape: f32[9,160,128], index: 1, kind: input, shape index: {}]   ;;  %s4074_s2 = inlined_call_operand.vmem [shape: f32[1,128], index: 2, kind: input, shape index: {}]   ;;  %s4075_s3 = inlined_call_operand.vmem [shape: f32[2,64,128], index: 3, kind: output, shape index: {}]  }
   0x1   :  { %s2859_s14 = smov 0  }
   0x2 LB: > { %s2119_s15 = sadd.s32 4294967295, %s2832_s14   ;;  %s2872_s16 = sadd.s32 1, %s2832_s14   ;;  %s2832_s14 = sphi %s2859_s14, %s4078_s14   ;;  %s2828_s13 = sphi %s2857_s13, %s4077_s13   ;;  %s2824_s12 = sphi %s2855_s12, %s4076_s12  }
   0x3   : > { %s17_s17 = ssub.s32 %s2832_s14, %s2872_s16  ;;  %s20_s18 = sadd.s32 1, %s2828_s13 }
   0x4   : > { %p18_p0 = scmp.eq.s32.totalorder %s17_s17, 0  ;;  %p27_p1 = scmp.ne.s32.totalorder %s2828_s13, %s2824_s12 }
   0x5   : > { %p28_p2 = scmp.eq.s32.totalorder %s2832_s14, 0  ;;  %p2122_p4 = scmp.ge.s32.totalorder %s2832_s14, 2 }
   0x6   : > { %s2881_s19 = scalar_select %p18_p0, %s2828_s13, %s20_s18  }
   0x7   : > { %p29_p3 = por %p28_p2, %p27_p1  ;;  %127 = sbr.rel (%p2122_p4) target bundleno = 91 (0x5b), region = 24 }
   0xe   : > { %130 = sbr.rel (!%p29_p3) target bundleno = 91 (0x5b), region = 28  ;;  %s132_s20 = sand.u32 (%p29_p3), 1, %s2828_s13  }
   0xf   : > { %s2491_s21 = sshll.u32 (%p29_p3), %s2832_s14, 7  ;;  %s2783_s22 = smul.u32 (%p29_p3), 1152, %s132_s20 }
  0x10   : > { %s2889_s25 = scalar_lea.vmem (%p29_p3), %s4072_s0, %s2491_s21 }
  0x11   : > { %v150_v0 = vld [vmem:[%s2889_s25] sm:$0xff] (%p29_p3)  ;;  %v152_v1 = vld [vmem:[%s2889_s25 + $0x8] sm:$0xff] (%p29_p3)  ;;  %v154_v2 = vld [vmem:[%s2889_s25 + $0x10] sm:$0xff] (%p29_p3)  ;;  %s2897_s26 = scalar_lea.vmem (%p29_p3), [#allocation2], %s2783_s22 }
  0x12   : > { %v156_v3 = vld [vmem:[%s2889_s25 + $0x18] sm:$0xff] (%p29_p3)  ;;  %v158_v4 = vld [vmem:[%s2889_s25 + $0x20] sm:$0xff] (%p29_p3)  ;;  %v160_v5 = vld [vmem:[%s2889_s25 + $0x28] sm:$0xff] (%p29_p3)  ;;  %151 = vst [vmem:[%s2897_s26] sm:$0xff] (%p29_p3), %v150_v0 }
  0x13   : > { %153 = vst [vmem:[%s2897_s26 + $0x8] sm:$0xff] (%p29_p3), %v152_v1  ;;  %155 = vst [vmem:[%s2897_s26 + $0x10] sm:$0xff] (%p29_p3), %v154_v2  ;;  %v162_v6 = vld [vmem:[%s2889_s25 + $0x30] sm:$0xff] (%p29_p3)  ;;  %v164_v7 = vld [vmem:[%s2889_s25 + $0x38] sm:$0xff] (%p29_p3) }
  0x14   : > { %157 = vst [vmem:[%s2897_s26 + $0x18] sm:$0xff] (%p29_p3), %v156_v3  ;;  %159 = vst [vmem:[%s2897_s26 + $0x20] sm:$0xff] (%p29_p3), %v158_v4  ;;  %v166_v8 = vld [vmem:[%s2889_s25 + $0x40] sm:$0xff] (%p29_p3)  ;;  %v168_v9 = vld [vmem:[%s2889_s25 + $0x48] sm:$0xff] (%p29_p3) }
  0x15   : > { %161 = vst [vmem:[%s2897_s26 + $0x28] sm:$0xff] %v160_v5  ;;  %163 = vst [vmem:[%s2897_s26 + $0x30] sm:$0xff] %v162_v6  ;;  %v170_v10 = vld [vmem:[%s2889_s25 + $0x50] sm:$0xff]  ;;  %v172_v11 = vld [vmem:[%s2889_s25 + $0x58] sm:$0xff] }
  0x16   : > { %165 = vst [vmem:[%s2897_s26 + $0x38] sm:$0xff] %v164_v7  ;;  %167 = vst [vmem:[%s2897_s26 + $0x40] sm:$0xff] %v166_v8  ;;  %v174_v12 = vld [vmem:[%s2889_s25 + $0x60] sm:$0xff]  ;;  %v176_v13 = vld [vmem:[%s2889_s25 + $0x68] sm:$0xff] }
  0x17   : > { %169 = vst [vmem:[%s2897_s26 + $0x48] sm:$0xff] %v168_v9  ;;  %171 = vst [vmem:[%s2897_s26 + $0x50] sm:$0xff] %v170_v10  ;;  %v178_v14 = vld [vmem:[%s2889_s25 + $0x70] sm:$0xff]  ;;  %v180_v15 = vld [vmem:[%s2889_s25 + $0x78] sm:$0xff] }
  0x18   : > { %173 = vst [vmem:[%s2897_s26 + $0x58] sm:$0xff] %v172_v11  ;;  %175 = vst [vmem:[%s2897_s26 + $0x60] sm:$0xff] %v174_v12  ;;  %v182_v16 = vld [vmem:[%s2889_s25 + $0x100] sm:$0xff]  ;;  %v184_v17 = vld [vmem:[%s2889_s25 + $0x108] sm:$0xff] }
  0x19   : > { %177 = vst [vmem:[%s2897_s26 + $0x68] sm:$0xff] %v176_v13  ;;  %179 = vst [vmem:[%s2897_s26 + $0x70] sm:$0xff] %v178_v14  ;;  %v186_v18 = vld [vmem:[%s2889_s25 + $0x110] sm:$0xff]  ;;  %v188_v19 = vld [vmem:[%s2889_s25 + $0x118] sm:$0xff] }
  0x1a   : > { %181 = vst [vmem:[%s2897_s26 + $0x78] sm:$0xff] %v180_v15  ;;  %183 = vst [vmem:[%s2897_s26 + $0x80] sm:$0xff] %v182_v16  ;;  %v190_v20 = vld [vmem:[%s2889_s25 + $0x120] sm:$0xff]  ;;  %v192_v21 = vld [vmem:[%s2889_s25 + $0x128] sm:$0xff] }
  0x1b   : > { %185 = vst [vmem:[%s2897_s26 + $0x88] sm:$0xff] %v184_v17  ;;  %187 = vst [vmem:[%s2897_s26 + $0x90] sm:$0xff] %v186_v18  ;;  %v194_v22 = vld [vmem:[%s2889_s25 + $0x130] sm:$0xff]  ;;  %v196_v23 = vld [vmem:[%s2889_s25 + $0x138] sm:$0xff] }
  0x1c   : > { %189 = vst [vmem:[%s2897_s26 + $0x98] sm:$0xff] %v188_v19  ;;  %191 = vst [vmem:[%s2897_s26 + $0xa0] sm:$0xff] %v190_v20  ;;  %v198_v24 = vld [vmem:[%s2889_s25 + $0x140] sm:$0xff]  ;;  %v200_v25 = vld [vmem:[%s2889_s25 + $0x148] sm:$0xff] }
  0x1d   : > { %193 = vst [vmem:[%s2897_s26 + $0xa8] sm:$0xff] %v192_v21  ;;  %195 = vst [vmem:[%s2897_s26 + $0xb0] sm:$0xff] %v194_v22  ;;  %v202_v26 = vld [vmem:[%s2889_s25 + $0x150] sm:$0xff]  ;;  %v204_v27 = vld [vmem:[%s2889_s25 + $0x158] sm:$0xff] }
  0x1e   : > { %197 = vst [vmem:[%s2897_s26 + $0xb8] sm:$0xff] %v196_v23  ;;  %199 = vst [vmem:[%s2897_s26 + $0xc0] sm:$0xff] %v198_v24  ;;  %v206_v28 = vld [vmem:[%s2889_s25 + $0x160] sm:$0xff]  ;;  %v208_v29 = vld [vmem:[%s2889_s25 + $0x168] sm:$0xff] }
  0x1f   : > { %201 = vst [vmem:[%s2897_s26 + $0xc8] sm:$0xff] %v200_v25  ;;  %203 = vst [vmem:[%s2897_s26 + $0xd0] sm:$0xff] %v202_v26  ;;  %v210_v30 = vld [vmem:[%s2889_s25 + $0x170] sm:$0xff]  ;;  %v212_v31 = vld [vmem:[%s2889_s25 + $0x178] sm:$0xff] }
  0x20   : > { %205 = vst [vmem:[%s2897_s26 + $0xd8] sm:$0xff] %v204_v27  ;;  %207 = vst [vmem:[%s2897_s26 + $0xe0] sm:$0xff] %v206_v28  ;;  %v214_v32 = vld [vmem:[%s2889_s25 + $0x200] sm:$0xff]  ;;  %v216_v33 = vld [vmem:[%s2889_s25 + $0x208] sm:$0xff] }
  0x21   : > { %209 = vst [vmem:[%s2897_s26 + $0xe8] sm:$0xff] %v208_v29  ;;  %211 = vst [vmem:[%s2897_s26 + $0xf0] sm:$0xff] %v210_v30  ;;  %v218_v34 = vld [vmem:[%s2889_s25 + $0x210] sm:$0xff]  ;;  %v220_v35 = vld [vmem:[%s2889_s25 + $0x218] sm:$0xff] }
  0x22   : > { %213 = vst [vmem:[%s2897_s26 + $0xf8] sm:$0xff] %v212_v31  ;;  %215 = vst [vmem:[%s2897_s26 + $0x100] sm:$0xff] %v214_v32  ;;  %v222_v36 = vld [vmem:[%s2889_s25 + $0x220] sm:$0xff]  ;;  %v224_v37 = vld [vmem:[%s2889_s25 + $0x228] sm:$0xff] }
  0x23   : > { %217 = vst [vmem:[%s2897_s26 + $0x108] sm:$0xff] %v216_v33  ;;  %219 = vst [vmem:[%s2897_s26 + $0x110] sm:$0xff] %v218_v34  ;;  %v226_v38 = vld [vmem:[%s2889_s25 + $0x230] sm:$0xff]  ;;  %v228_v39 = vld [vmem:[%s2889_s25 + $0x238] sm:$0xff] }
  0x24   : > { %221 = vst [vmem:[%s2897_s26 + $0x118] sm:$0xff] %v220_v35  ;;  %223 = vst [vmem:[%s2897_s26 + $0x120] sm:$0xff] %v222_v36  ;;  %v230_v40 = vld [vmem:[%s2889_s25 + $0x240] sm:$0xff]  ;;  %v232_v41 = vld [vmem:[%s2889_s25 + $0x248] sm:$0xff] }
  0x25   : > { %225 = vst [vmem:[%s2897_s26 + $0x128] sm:$0xff] %v224_v37  ;;  %227 = vst [vmem:[%s2897_s26 + $0x130] sm:$0xff] %v226_v38  ;;  %v234_v42 = vld [vmem:[%s2889_s25 + $0x250] sm:$0xff]  ;;  %v236_v43 = vld [vmem:[%s2889_s25 + $0x258] sm:$0xff] }
  0x26   : > { %229 = vst [vmem:[%s2897_s26 + $0x138] sm:$0xff] %v228_v39  ;;  %231 = vst [vmem:[%s2897_s26 + $0x140] sm:$0xff] %v230_v40  ;;  %v238_v44 = vld [vmem:[%s2889_s25 + $0x260] sm:$0xff]  ;;  %v240_v45 = vld [vmem:[%s2889_s25 + $0x268] sm:$0xff] }
  0x27   : > { %233 = vst [vmem:[%s2897_s26 + $0x148] sm:$0xff] %v232_v41  ;;  %235 = vst [vmem:[%s2897_s26 + $0x150] sm:$0xff] %v234_v42  ;;  %v242_v46 = vld [vmem:[%s2889_s25 + $0x270] sm:$0xff]  ;;  %v244_v47 = vld [vmem:[%s2889_s25 + $0x278] sm:$0xff] }
  0x28   : > { %237 = vst [vmem:[%s2897_s26 + $0x158] sm:$0xff] %v236_v43  ;;  %239 = vst [vmem:[%s2897_s26 + $0x160] sm:$0xff] %v238_v44  ;;  %v246_v48 = vld [vmem:[%s2889_s25 + $0x300] sm:$0xff]  ;;  %v248_v49 = vld [vmem:[%s2889_s25 + $0x308] sm:$0xff] }
  0x29   : > { %241 = vst [vmem:[%s2897_s26 + $0x168] sm:$0xff] %v240_v45  ;;  %243 = vst [vmem:[%s2897_s26 + $0x170] sm:$0xff] %v242_v46  ;;  %v250_v50 = vld [vmem:[%s2889_s25 + $0x310] sm:$0xff]  ;;  %v252_v51 = vld [vmem:[%s2889_s25 + $0x318] sm:$0xff] }
  0x2a   : > { %245 = vst [vmem:[%s2897_s26 + $0x178] sm:$0xff] %v244_v47  ;;  %247 = vst [vmem:[%s2897_s26 + $0x180] sm:$0xff] %v246_v48  ;;  %v254_v52 = vld [vmem:[%s2889_s25 + $0x320] sm:$0xff]  ;;  %v256_v53 = vld [vmem:[%s2889_s25 + $0x328] sm:$0xff] }
  0x2b   : > { %249 = vst [vmem:[%s2897_s26 + $0x188] sm:$0xff] %v248_v49  ;;  %251 = vst [vmem:[%s2897_s26 + $0x190] sm:$0xff] %v250_v50  ;;  %v258_v54 = vld [vmem:[%s2889_s25 + $0x330] sm:$0xff]  ;;  %v260_v55 = vld [vmem:[%s2889_s25 + $0x338] sm:$0xff] }
  0x2c   : > { %253 = vst [vmem:[%s2897_s26 + $0x198] sm:$0xff] %v252_v51  ;;  %255 = vst [vmem:[%s2897_s26 + $0x1a0] sm:$0xff] %v254_v52  ;;  %v262_v56 = vld [vmem:[%s2889_s25 + $0x340] sm:$0xff]  ;;  %v264_v57 = vld [vmem:[%s2889_s25 + $0x348] sm:$0xff] }
  0x2d   : > { %257 = vst [vmem:[%s2897_s26 + $0x1a8] sm:$0xff] %v256_v53  ;;  %259 = vst [vmem:[%s2897_s26 + $0x1b0] sm:$0xff] %v258_v54  ;;  %v266_v58 = vld [vmem:[%s2889_s25 + $0x350] sm:$0xff]  ;;  %v268_v59 = vld [vmem:[%s2889_s25 + $0x358] sm:$0xff] }
  0x2e   : > { %261 = vst [vmem:[%s2897_s26 + $0x1b8] sm:$0xff] %v260_v55  ;;  %263 = vst [vmem:[%s2897_s26 + $0x1c0] sm:$0xff] %v262_v56  ;;  %v270_v60 = vld [vmem:[%s2889_s25 + $0x360] sm:$0xff]  ;;  %v272_v61 = vld [vmem:[%s2889_s25 + $0x368] sm:$0xff] }
  0x2f   : > { %265 = vst [vmem:[%s2897_s26 + $0x1c8] sm:$0xff] %v264_v57  ;;  %267 = vst [vmem:[%s2897_s26 + $0x1d0] sm:$0xff] %v266_v58  ;;  %v274_v62 = vld [vmem:[%s2889_s25 + $0x370] sm:$0xff]  ;;  %v276_v63 = vld [vmem:[%s2889_s25 + $0x378] sm:$0xff] }
  0x30   : > { %269 = vst [vmem:[%s2897_s26 + $0x1d8] sm:$0xff] %v268_v59  ;;  %271 = vst [vmem:[%s2897_s26 + $0x1e0] sm:$0xff] %v270_v60  ;;  %v278_v0 = vld [vmem:[%s2889_s25 + $0x400] sm:$0xff]  ;;  %v280_v1 = vld [vmem:[%s2889_s25 + $0x408] sm:$0xff] }
  0x31   : > { %273 = vst [vmem:[%s2897_s26 + $0x1e8] sm:$0xff] %v272_v61  ;;  %275 = vst [vmem:[%s2897_s26 + $0x1f0] sm:$0xff] %v274_v62  ;;  %v282_v2 = vld [vmem:[%s2889_s25 + $0x410] sm:$0xff]  ;;  %v284_v3 = vld [vmem:[%s2889_s25 + $0x418] sm:$0xff] }
  0x32   : > { %277 = vst [vmem:[%s2897_s26 + $0x1f8] sm:$0xff] %v276_v63  ;;  %279 = vst [vmem:[%s2897_s26 + $0x200] sm:$0xff] %v278_v0  ;;  %v286_v4 = vld [vmem:[%s2889_s25 + $0x420] sm:$0xff]  ;;  %v288_v5 = vld [vmem:[%s2889_s25 + $0x428] sm:$0xff] }
  0x33   : > { %281 = vst [vmem:[%s2897_s26 + $0x208] sm:$0xff] %v280_v1  ;;  %283 = vst [vmem:[%s2897_s26 + $0x210] sm:$0xff] %v282_v2  ;;  %v290_v6 = vld [vmem:[%s2889_s25 + $0x430] sm:$0xff]  ;;  %v292_v7 = vld [vmem:[%s2889_s25 + $0x438] sm:$0xff] }
  0x34   : > { %285 = vst [vmem:[%s2897_s26 + $0x218] sm:$0xff] %v284_v3  ;;  %287 = vst [vmem:[%s2897_s26 + $0x220] sm:$0xff] %v286_v4  ;;  %v294_v8 = vld [vmem:[%s2889_s25 + $0x440] sm:$0xff]  ;;  %v296_v9 = vld [vmem:[%s2889_s25 + $0x448] sm:$0xff] }
  0x35   : > { %289 = vst [vmem:[%s2897_s26 + $0x228] sm:$0xff] %v288_v5  ;;  %291 = vst [vmem:[%s2897_s26 + $0x230] sm:$0xff] %v290_v6  ;;  %v298_v10 = vld [vmem:[%s2889_s25 + $0x450] sm:$0xff]  ;;  %v300_v11 = vld [vmem:[%s2889_s25 + $0x458] sm:$0xff] }
  0x36   : > { %293 = vst [vmem:[%s2897_s26 + $0x238] sm:$0xff] %v292_v7  ;;  %295 = vst [vmem:[%s2897_s26 + $0x240] sm:$0xff] %v294_v8  ;;  %v302_v12 = vld [vmem:[%s2889_s25 + $0x460] sm:$0xff]  ;;  %v304_v13 = vld [vmem:[%s2889_s25 + $0x468] sm:$0xff] }
  0x37   : > { %297 = vst [vmem:[%s2897_s26 + $0x248] sm:$0xff] %v296_v9  ;;  %299 = vst [vmem:[%s2897_s26 + $0x250] sm:$0xff] %v298_v10  ;;  %v306_v14 = vld [vmem:[%s2889_s25 + $0x470] sm:$0xff]  ;;  %v308_v15 = vld [vmem:[%s2889_s25 + $0x478] sm:$0xff] }
  0x38   : > { %301 = vst [vmem:[%s2897_s26 + $0x258] sm:$0xff] %v300_v11  ;;  %303 = vst [vmem:[%s2897_s26 + $0x260] sm:$0xff] %v302_v12  ;;  %v310_v16 = vld [vmem:[%s2889_s25 + $0x500] sm:$0xff]  ;;  %v312_v17 = vld [vmem:[%s2889_s25 + $0x508] sm:$0xff] }
  0x39   : > { %305 = vst [vmem:[%s2897_s26 + $0x268] sm:$0xff] %v304_v13  ;;  %307 = vst [vmem:[%s2897_s26 + $0x270] sm:$0xff] %v306_v14  ;;  %v314_v18 = vld [vmem:[%s2889_s25 + $0x510] sm:$0xff]  ;;  %v316_v19 = vld [vmem:[%s2889_s25 + $0x518] sm:$0xff] }
  0x3a   : > { %309 = vst [vmem:[%s2897_s26 + $0x278] sm:$0xff] %v308_v15  ;;  %311 = vst [vmem:[%s2897_s26 + $0x280] sm:$0xff] %v310_v16  ;;  %v318_v20 = vld [vmem:[%s2889_s25 + $0x520] sm:$0xff]  ;;  %v320_v21 = vld [vmem:[%s2889_s25 + $0x528] sm:$0xff] }
  0x3b   : > { %313 = vst [vmem:[%s2897_s26 + $0x288] sm:$0xff] %v312_v17  ;;  %315 = vst [vmem:[%s2897_s26 + $0x290] sm:$0xff] %v314_v18  ;;  %v322_v22 = vld [vmem:[%s2889_s25 + $0x530] sm:$0xff]  ;;  %v324_v23 = vld [vmem:[%s2889_s25 + $0x538] sm:$0xff] }
  0x3c   : > { %317 = vst [vmem:[%s2897_s26 + $0x298] sm:$0xff] %v316_v19  ;;  %319 = vst [vmem:[%s2897_s26 + $0x2a0] sm:$0xff] %v318_v20  ;;  %v326_v24 = vld [vmem:[%s2889_s25 + $0x540] sm:$0xff]  ;;  %v328_v25 = vld [vmem:[%s2889_s25 + $0x548] sm:$0xff] }
  0x3d   : > { %321 = vst [vmem:[%s2897_s26 + $0x2a8] sm:$0xff] %v320_v21  ;;  %323 = vst [vmem:[%s2897_s26 + $0x2b0] sm:$0xff] %v322_v22  ;;  %v330_v26 = vld [vmem:[%s2889_s25 + $0x550] sm:$0xff]  ;;  %v332_v27 = vld [vmem:[%s2889_s25 + $0x558] sm:$0xff] }
  0x3e   : > { %325 = vst [vmem:[%s2897_s26 + $0x2b8] sm:$0xff] %v324_v23  ;;  %327 = vst [vmem:[%s2897_s26 + $0x2c0] sm:$0xff] %v326_v24  ;;  %v334_v28 = vld [vmem:[%s2889_s25 + $0x560] sm:$0xff]  ;;  %v336_v29 = vld [vmem:[%s2889_s25 + $0x568] sm:$0xff] }
  0x3f   : > { %329 = vst [vmem:[%s2897_s26 + $0x2c8] sm:$0xff] %v328_v25  ;;  %331 = vst [vmem:[%s2897_s26 + $0x2d0] sm:$0xff] %v330_v26  ;;  %v338_v30 = vld [vmem:[%s2889_s25 + $0x570] sm:$0xff]  ;;  %v340_v31 = vld [vmem:[%s2889_s25 + $0x578] sm:$0xff] }
  0x40   : > { %333 = vst [vmem:[%s2897_s26 + $0x2d8] sm:$0xff] %v332_v27  ;;  %335 = vst [vmem:[%s2897_s26 + $0x2e0] sm:$0xff] %v334_v28  ;;  %v342_v32 = vld [vmem:[%s2889_s25 + $0x600] sm:$0xff]  ;;  %v344_v33 = vld [vmem:[%s2889_s25 + $0x608] sm:$0xff] }
  0x41   : > { %337 = vst [vmem:[%s2897_s26 + $0x2e8] sm:$0xff] %v336_v29  ;;  %339 = vst [vmem:[%s2897_s26 + $0x2f0] sm:$0xff] %v338_v30  ;;  %v346_v34 = vld [vmem:[%s2889_s25 + $0x610] sm:$0xff]  ;;  %v348_v35 = vld [vmem:[%s2889_s25 + $0x618] sm:$0xff] }
  0x42   : > { %341 = vst [vmem:[%s2897_s26 + $0x2f8] sm:$0xff] %v340_v31  ;;  %343 = vst [vmem:[%s2897_s26 + $0x300] sm:$0xff] %v342_v32  ;;  %v350_v36 = vld [vmem:[%s2889_s25 + $0x620] sm:$0xff]  ;;  %v352_v37 = vld [vmem:[%s2889_s25 + $0x628] sm:$0xff] }
  0x43   : > { %345 = vst [vmem:[%s2897_s26 + $0x308] sm:$0xff] %v344_v33  ;;  %347 = vst [vmem:[%s2897_s26 + $0x310] sm:$0xff] %v346_v34  ;;  %v354_v38 = vld [vmem:[%s2889_s25 + $0x630] sm:$0xff]  ;;  %v356_v39 = vld [vmem:[%s2889_s25 + $0x638] sm:$0xff] }
  0x44   : > { %349 = vst [vmem:[%s2897_s26 + $0x318] sm:$0xff] %v348_v35  ;;  %351 = vst [vmem:[%s2897_s26 + $0x320] sm:$0xff] %v350_v36  ;;  %v358_v40 = vld [vmem:[%s2889_s25 + $0x640] sm:$0xff]  ;;  %v360_v41 = vld [vmem:[%s2889_s25 + $0x648] sm:$0xff] }
  0x45   : > { %353 = vst [vmem:[%s2897_s26 + $0x328] sm:$0xff] %v352_v37  ;;  %355 = vst [vmem:[%s2897_s26 + $0x330] sm:$0xff] %v354_v38  ;;  %v362_v42 = vld [vmem:[%s2889_s25 + $0x650] sm:$0xff]  ;;  %v364_v43 = vld [vmem:[%s2889_s25 + $0x658] sm:$0xff] }
  0x46   : > { %357 = vst [vmem:[%s2897_s26 + $0x338] sm:$0xff] %v356_v39  ;;  %359 = vst [vmem:[%s2897_s26 + $0x340] sm:$0xff] %v358_v40  ;;  %v366_v44 = vld [vmem:[%s2889_s25 + $0x660] sm:$0xff]  ;;  %v368_v45 = vld [vmem:[%s2889_s25 + $0x668] sm:$0xff] }
  0x47   : > { %361 = vst [vmem:[%s2897_s26 + $0x348] sm:$0xff] %v360_v41  ;;  %363 = vst [vmem:[%s2897_s26 + $0x350] sm:$0xff] %v362_v42  ;;  %v370_v46 = vld [vmem:[%s2889_s25 + $0x670] sm:$0xff]  ;;  %v372_v47 = vld [vmem:[%s2889_s25 + $0x678] sm:$0xff] }
  0x48   : > { %365 = vst [vmem:[%s2897_s26 + $0x358] sm:$0xff] %v364_v43  ;;  %367 = vst [vmem:[%s2897_s26 + $0x360] sm:$0xff] %v366_v44  ;;  %v374_v48 = vld [vmem:[%s2889_s25 + $0x700] sm:$0xff]  ;;  %v376_v49 = vld [vmem:[%s2889_s25 + $0x708] sm:$0xff] }
  0x49   : > { %369 = vst [vmem:[%s2897_s26 + $0x368] sm:$0xff] %v368_v45  ;;  %371 = vst [vmem:[%s2897_s26 + $0x370] sm:$0xff] %v370_v46  ;;  %v378_v50 = vld [vmem:[%s2889_s25 + $0x710] sm:$0xff]  ;;  %v380_v51 = vld [vmem:[%s2889_s25 + $0x718] sm:$0xff] }
  0x4a   : > { %373 = vst [vmem:[%s2897_s26 + $0x378] sm:$0xff] %v372_v47  ;;  %375 = vst [vmem:[%s2897_s26 + $0x380] sm:$0xff] %v374_v48  ;;  %v382_v52 = vld [vmem:[%s2889_s25 + $0x720] sm:$0xff]  ;;  %v384_v53 = vld [vmem:[%s2889_s25 + $0x728] sm:$0xff] }
  0x4b   : > { %377 = vst [vmem:[%s2897_s26 + $0x388] sm:$0xff] %v376_v49  ;;  %379 = vst [vmem:[%s2897_s26 + $0x390] sm:$0xff] %v378_v50  ;;  %v386_v54 = vld [vmem:[%s2889_s25 + $0x730] sm:$0xff]  ;;  %v388_v55 = vld [vmem:[%s2889_s25 + $0x738] sm:$0xff] }
  0x4c   : > { %381 = vst [vmem:[%s2897_s26 + $0x398] sm:$0xff] %v380_v51  ;;  %383 = vst [vmem:[%s2897_s26 + $0x3a0] sm:$0xff] %v382_v52  ;;  %v390_v56 = vld [vmem:[%s2889_s25 + $0x740] sm:$0xff]  ;;  %v392_v57 = vld [vmem:[%s2889_s25 + $0x748] sm:$0xff] }
  0x4d   : > { %385 = vst [vmem:[%s2897_s26 + $0x3a8] sm:$0xff] %v384_v53  ;;  %387 = vst [vmem:[%s2897_s26 + $0x3b0] sm:$0xff] %v386_v54  ;;  %v394_v58 = vld [vmem:[%s2889_s25 + $0x750] sm:$0xff]  ;;  %v396_v59 = vld [vmem:[%s2889_s25 + $0x758] sm:$0xff] }
  0x4e   : > { %389 = vst [vmem:[%s2897_s26 + $0x3b8] sm:$0xff] %v388_v55  ;;  %391 = vst [vmem:[%s2897_s26 + $0x3c0] sm:$0xff] %v390_v56  ;;  %v398_v60 = vld [vmem:[%s2889_s25 + $0x760] sm:$0xff]  ;;  %v400_v61 = vld [vmem:[%s2889_s25 + $0x768] sm:$0xff] }
  0x4f   : > { %393 = vst [vmem:[%s2897_s26 + $0x3c8] sm:$0xff] %v392_v57  ;;  %395 = vst [vmem:[%s2897_s26 + $0x3d0] sm:$0xff] %v394_v58  ;;  %v402_v62 = vld [vmem:[%s2889_s25 + $0x770] sm:$0xff]  ;;  %v404_v63 = vld [vmem:[%s2889_s25 + $0x778] sm:$0xff] }
  0x50   : > { %397 = vst [vmem:[%s2897_s26 + $0x3d8] sm:$0xff] %v396_v59  ;;  %399 = vst [vmem:[%s2897_s26 + $0x3e0] sm:$0xff] %v398_v60  ;;  %v406_v0 = vld [vmem:[%s2889_s25 + $0x800] sm:$0xff]  ;;  %v408_v1 = vld [vmem:[%s2889_s25 + $0x808] sm:$0xff] }
  0x51   : > { %401 = vst [vmem:[%s2897_s26 + $0x3e8] sm:$0xff] %v400_v61  ;;  %403 = vst [vmem:[%s2897_s26 + $0x3f0] sm:$0xff] %v402_v62  ;;  %v410_v2 = vld [vmem:[%s2889_s25 + $0x810] sm:$0xff]  ;;  %v412_v3 = vld [vmem:[%s2889_s25 + $0x818] sm:$0xff] }
  0x52   : > { %405 = vst [vmem:[%s2897_s26 + $0x3f8] sm:$0xff] %v404_v63  ;;  %407 = vst [vmem:[%s2897_s26 + $0x400] sm:$0xff] %v406_v0  ;;  %v414_v4 = vld [vmem:[%s2889_s25 + $0x820] sm:$0xff]  ;;  %v416_v5 = vld [vmem:[%s2889_s25 + $0x828] sm:$0xff] }
  0x53   : > { %409 = vst [vmem:[%s2897_s26 + $0x408] sm:$0xff] %v408_v1  ;;  %411 = vst [vmem:[%s2897_s26 + $0x410] sm:$0xff] %v410_v2  ;;  %v418_v6 = vld [vmem:[%s2889_s25 + $0x830] sm:$0xff]  ;;  %v420_v7 = vld [vmem:[%s2889_s25 + $0x838] sm:$0xff] }
  0x54   : > { %413 = vst [vmem:[%s2897_s26 + $0x418] sm:$0xff] %v412_v3  ;;  %415 = vst [vmem:[%s2897_s26 + $0x420] sm:$0xff] %v414_v4  ;;  %v422_v8 = vld [vmem:[%s2889_s25 + $0x840] sm:$0xff]  ;;  %v424_v9 = vld [vmem:[%s2889_s25 + $0x848] sm:$0xff] }
  0x55   : > { %417 = vst [vmem:[%s2897_s26 + $0x428] sm:$0xff] %v416_v5  ;;  %419 = vst [vmem:[%s2897_s26 + $0x430] sm:$0xff] %v418_v6  ;;  %v426_v10 = vld [vmem:[%s2889_s25 + $0x850] sm:$0xff]  ;;  %v428_v11 = vld [vmem:[%s2889_s25 + $0x858] sm:$0xff] }
  0x56   : > { %421 = vst [vmem:[%s2897_s26 + $0x438] sm:$0xff] %v420_v7  ;;  %423 = vst [vmem:[%s2897_s26 + $0x440] sm:$0xff] %v422_v8  ;;  %v430_v12 = vld [vmem:[%s2889_s25 + $0x860] sm:$0xff]  ;;  %v432_v13 = vld [vmem:[%s2889_s25 + $0x868] sm:$0xff] }
  0x57   : > { %425 = vst [vmem:[%s2897_s26 + $0x448] sm:$0xff] %v424_v9  ;;  %427 = vst [vmem:[%s2897_s26 + $0x450] sm:$0xff] %v426_v10  ;;  %v434_v14 = vld [vmem:[%s2889_s25 + $0x870] sm:$0xff]  ;;  %v436_v15 = vld [vmem:[%s2889_s25 + $0x878] sm:$0xff] }
  0x58   : > { %429 = vst [vmem:[%s2897_s26 + $0x458] sm:$0xff] %v428_v11  ;;  %431 = vst [vmem:[%s2897_s26 + $0x460] sm:$0xff] %v430_v12 }
  0x59   : > { %433 = vst [vmem:[%s2897_s26 + $0x468] sm:$0xff] %v432_v13  ;;  %435 = vst [vmem:[%s2897_s26 + $0x470] sm:$0xff] %v434_v14 }
  0x5a   : > { %437 = vst [vmem:[%s2897_s26 + $0x478] sm:$0xff] %v436_v15 }
  0x5b PF: > { %p2125_p5 = scmp.ge.s32.totalorder %s2832_s14, 1  ;;  %p442_p6 = scmp.lt.s32.totalorder %s2832_s14, 3 }
  0x5d   : > { %p443_p7 = pnand %p2125_p5, %p442_p6 }
  0x5e   : > { %v2144_v16 = vld [vmem:[%s4073_s1 + $0xa0] sm:$0xff] (!%p443_p7)  ;;  %v2145_v17 = vld [vmem:[%s4073_s1 + $0xa8] sm:$0xff] (!%p443_p7)  ;;  %v2834_v19 = vmov (!%p443_p7), 0.0|0.0   ;;  %v2146_v22 = vld [vmem:[%s4073_s1 + $0xb0] sm:$0xff] (!%p443_p7)  ;;  %s449_s22 = sand.u32 (!%p443_p7), 1, %s2824_s12   ;;  %vm551_vm0 = vcmask (!%p443_p7), 261120  }
  0x5f   : > { %446 = sbr.rel (%p443_p7) target bundleno = 526 (0x20e), region = 51  ;;  %v493_v18 = vld [vmem:[%s4073_s1] sm:$0xff] (!%p443_p7)  ;;  %2493 = vmatprep.subr.bf16.mxu0 (!%p443_p7), %v2834_v19  ;;  %2523 = vmatprep.subr.bf16.mxu1 (!%p443_p7), %v2834_v19  ;;  %v2494_v20 = vpack.c.bf16 (!%p443_p7), %v2145_v17, %v2144_v16  ;;  %v494_v21 = vld [vmem:[%s4073_s1 + $0x8] sm:$0xff] (!%p443_p7)  ;;  %v2147_v23 = vld [vmem:[%s4073_s1 + $0xb8] sm:$0xff] (!%p443_p7)  ;;  %p472_p8 = scmp.lt.s32.totalorder (!%p443_p7), %s2119_s15, 1 }
  0x60   : > { %v2524_v24 = vpack.c.bf16 (!%p443_p7), %v494_v21, %v493_v18  ;;  %v495_v25 = vld [vmem:[%s4073_s1 + $0x10] sm:$0xff] (!%p443_p7)  ;;  %v496_v26 = vld [vmem:[%s4073_s1 + $0x18] sm:$0xff] (!%p443_p7)  ;;  %v2497_v27 = vpack.c.bf16 (!%p443_p7), %v2147_v23, %v2146_v22  ;;  %v2148_v29 = vld [vmem:[%s4073_s1 + $0xc0] sm:$0xff] (!%p443_p7)  ;;  %s2784_s30 = smul.u32 (!%p443_p7), 1152, %s449_s22 }
  0x61   : > { %2495 = vmatpush1.bf16.msra.mxu0 (!%p443_p7), %v2494_v20  ;;  %v2527_v28 = vpack.c.bf16 (!%p443_p7), %v496_v26, %v495_v25  ;;  %v2149_v30 = vld [vmem:[%s4073_s1 + $0xc8] sm:$0xff] (!%p443_p7)  ;;  %v497_v31 = vld [vmem:[%s4073_s1 + $0x20] sm:$0xff] (!%p443_p7)  ;;  %v2150_v35 = vld [vmem:[%s4073_s1 + $0xd0] sm:$0xff] (!%p443_p7) }
  0x62   : > { %2525 = vmatpush1.bf16.msra.mxu1 (!%p443_p7), %v2524_v24  ;;  %2496 = vmatprep.subr.bf16.mxu0 (!%p443_p7), %v2834_v19  ;;  %v498_v32 = vld [vmem:[%s4073_s1 + $0x28] sm:$0xff] (!%p443_p7)  ;;  %v2500_v33 = vpack.c.bf16 (!%p443_p7), %v2149_v30, %v2148_v29  ;;  %v2151_v36 = vld [vmem:[%s4073_s1 + $0xd8] sm:$0xff] (!%p443_p7)  ;;  %v499_v37 = vld [vmem:[%s4073_s1 + $0x30] sm:$0xff] (!%p443_p7)  ;;  %s3252_s26 = scalar_lea.vmem (!%p443_p7), [#allocation2], %s2784_s30 }
  0x63   : > { %2526 = vmatprep.subr.bf16.mxu1 (!%p443_p7), %v2834_v19  ;;  %v2530_v34 = vpack.c.bf16 (!%p443_p7), %v498_v32, %v497_v31  ;;  %v500_v38 = vld [vmem:[%s4073_s1 + $0x38] sm:$0xff] (!%p443_p7)  ;;  %v2503_v39 = vpack.c.bf16 (!%p443_p7), %v2151_v36, %v2150_v35  ;;  %v2152_v41 = vld [vmem:[%s4073_s1 + $0xe0] sm:$0xff] (!%p443_p7)  ;;  %v2153_v42 = vld [vmem:[%s4073_s1 + $0xe8] sm:$0xff] (!%p443_p7) }
  0x64   : > { %v2533_v40 = vpack.c.bf16 (!%p443_p7), %v500_v38, %v499_v37  ;;  %v501_v43 = vld [vmem:[%s4073_s1 + $0x40] sm:$0xff] (!%p443_p7)  ;;  %v502_v44 = vld [vmem:[%s4073_s1 + $0x48] sm:$0xff] (!%p443_p7)  ;;  %v2506_v47 = vpack.c.bf16 (!%p443_p7), %v2153_v42, %v2152_v41  ;;  %v2154_v49 = vld [vmem:[%s4073_s1 + $0xf0] sm:$0xff] (!%p443_p7) }
  0x65   : > { %2498 = vmatpush1.bf16.msra.mxu0 (!%p443_p7), %v2497_v27  ;;  %v2129_v45 = vld [vmem:[%s3252_s26 + $0x88] sm:$0xff] (!%p443_p7)  ;;  %v2536_v48 = vpack.c.bf16 (!%p443_p7), %v502_v44, %v501_v43  ;;  %v2155_v50 = vld [vmem:[%s4073_s1 + $0xf8] sm:$0xff] (!%p443_p7)  ;;  %v503_v51 = vld [vmem:[%s4073_s1 + $0x50] sm:$0xff] (!%p443_p7) }
  0x66   : > { %2528 = vmatpush1.bf16.msra.mxu1 %v2527_v28  ;;  %2499 = vmatprep.subr.bf16.mxu0 %v2834_v19  ;;  %v478_v46 = vld [vmem:[%s3252_s26 + $0x8] sm:$0xff]  ;;  %v504_v52 = vld [vmem:[%s4073_s1 + $0x58] sm:$0xff]  ;;  %v2509_v53 = vpack.c.bf16 %v2155_v50, %v2154_v49  ;;  %v2156_v55 = vld [vmem:[%s4073_s1 + $0x100] sm:$0xff]  ;;  %s4080_s15 = smov (!%p472_p8, %s2119_s15), 1 }
  0x67   : > { %2529 = vmatprep.subr.bf16.mxu1 %v2834_v19  ;;  %2164 = vmatprep.mubr.msk.f32.mxu0 %vm551_vm0, %v2129_v45  ;;  %v2539_v54 = vpack.c.bf16 %v504_v52, %v503_v51  ;;  %v2157_v56 = vld [vmem:[%s4073_s1 + $0x108] sm:$0xff]  ;;  %v505_v57 = vld [vmem:[%s4073_s1 + $0x60] sm:$0xff]  ;;  %v2158_v61 = vld [vmem:[%s4073_s1 + $0x110] sm:$0xff] }
  0x68   : > { %2172 = vmatprep.mubr.msk.f32.mxu1 %vm551_vm0, %v478_v46  ;;  %v506_v58 = vld [vmem:[%s4073_s1 + $0x68] sm:$0xff]  ;;  %v2512_v59 = vpack.c.bf16 %v2157_v56, %v2156_v55  ;;  %v2159_v62 = vld [vmem:[%s4073_s1 + $0x118] sm:$0xff]  ;;  %v507_v63 = vld [vmem:[%s4073_s1 + $0x70] sm:$0xff] }
  0x69   : > { %2501 = vmatpush1.bf16.msra.mxu0 %v2500_v33  ;;  %v2542_v60 = vpack.c.bf16 %v506_v58, %v505_v57  ;;  %v508_v0 = vld [vmem:[%s4073_s1 + $0x78] sm:$0xff]  ;;  %v2515_v1 = vpack.c.bf16 %v2159_v62, %v2158_v61  ;;  %v2160_v3 = vld [vmem:[%s4073_s1 + $0x120] sm:$0xff]  ;;  %v2161_v4 = vld [vmem:[%s4073_s1 + $0x128] sm:$0xff] }
  0x6a   : > { %2531 = vmatpush1.bf16.msra.mxu1 %v2530_v34  ;;  %2502 = vmatprep.subr.bf16.mxu0 %v2834_v19  ;;  %v2545_v2 = vpack.c.bf16 %v508_v0, %v507_v63  ;;  %v509_v5 = vld [vmem:[%s4073_s1 + $0x80] sm:$0xff]  ;;  %v510_v6 = vld [vmem:[%s4073_s1 + $0x88] sm:$0xff]  ;;  %v2518_v7 = vpack.c.bf16 %v2161_v4, %v2160_v3  ;;  %v2162_v9 = vld [vmem:[%s4073_s1 + $0x130] sm:$0xff] }
  0x6b   : > { %2532 = vmatprep.subr.bf16.mxu1 %v2834_v19  ;;  %v2548_v8 = vpack.c.bf16 %v510_v6, %v509_v5  ;;  %v2163_v10 = vld [vmem:[%s4073_s1 + $0x138] sm:$0xff]  ;;  %v511_v11 = vld [vmem:[%s4073_s1 + $0x90] sm:$0xff]  ;;  %v2196_v15 = vld [vmem:[%s4073_s1 + $0x140] sm:$0xff] }
  0x6c   : > { %v512_v12 = vld [vmem:[%s4073_s1 + $0x98] sm:$0xff]  ;;  %v2521_v13 = vpack.c.bf16 %v2163_v10, %v2162_v9  ;;  %v2197_v16 = vld [vmem:[%s4073_s1 + $0x148] sm:$0xff]  ;;  %v2240_v17 = vld [vmem:[%s4073_s1 + $0x1e0] sm:$0xff] }
  0x6d   : > { %2504 = vmatpush1.bf16.msra.mxu0 %v2503_v39  ;;  %v2551_v14 = vpack.c.bf16 %v512_v12, %v511_v11  ;;  %v2241_v18 = vld [vmem:[%s4073_s1 + $0x1e8] sm:$0xff]  ;;  %v2128_v20 = vld [vmem:[%s3252_s26 + $0x80] sm:$0xff]  ;;  %v2554_v21 = vpack.c.bf16 %v2197_v16, %v2196_v15  ;;  %v2198_v24 = vld [vmem:[%s4073_s1 + $0x150] sm:$0xff] }
  0x6e   : > { %2534 = vmatpush1.bf16.msra.mxu1 %v2533_v40  ;;  %2505 = vmatprep.subr.bf16.mxu0 %v2834_v19  ;;  %v477_v22 = vld [vmem:[%s3252_s26] sm:$0xff]  ;;  %v2584_v23 = vpack.c.bf16 %v2241_v18, %v2240_v17  ;;  %v2199_v25 = vld [vmem:[%s4073_s1 + $0x158] sm:$0xff]  ;;  %v2242_v26 = vld [vmem:[%s4073_s1 + $0x1f0] sm:$0xff] }
  0x6f   : > { %2535 = vmatprep.subr.bf16.mxu1 %v2834_v19  ;;  %v2243_v27 = vld [vmem:[%s4073_s1 + $0x1f8] sm:$0xff]  ;;  %v2557_v29 = vpack.c.bf16 %v2199_v25, %v2198_v24  ;;  %v2130_v31 = vld [vmem:[%s3252_s26 + $0x90] sm:$0xff]  ;;  %v2200_v33 = vld [vmem:[%s4073_s1 + $0x160] sm:$0xff] }
  0x70   : > { %v2131_v28 = vld [vmem:[%s3252_s26 + $0x98] sm:$0xff]  ;;  %v2587_v32 = vpack.c.bf16 %v2243_v27, %v2242_v26  ;;  %v2201_v34 = vld [vmem:[%s4073_s1 + $0x168] sm:$0xff]  ;;  %v479_v35 = vld [vmem:[%s3252_s26 + $0x10] sm:$0xff] }
  0x71   : > { %2507 = vmatpush1.bf16.msra.mxu0 %v2506_v47  ;;  %v480_v30 = vld [vmem:[%s3252_s26 + $0x18] sm:$0xff]  ;;  %v2244_v36 = vld [vmem:[%s4073_s1 + $0x200] sm:$0xff]  ;;  %v2245_v37 = vld [vmem:[%s4073_s1 + $0x208] sm:$0xff]  ;;  %v2560_v39 = vpack.c.bf16 %v2201_v34, %v2200_v33 }
  0x72   : > { %2537 = vmatpush1.bf16.msra.mxu1 %v2536_v48  ;;  %2508 = vmatprep.subr.bf16.mxu0 %v2834_v19  ;;  %v2133_v38 = vld [vmem:[%s3252_s26 + $0xa8] sm:$0xff]  ;;  %v2132_v41 = vld [vmem:[%s3252_s26 + $0xa0] sm:$0xff]  ;;  %v2590_v42 = vpack.c.bf16 %v2245_v37, %v2244_v36  ;;  %v2202_v43 = vld [vmem:[%s4073_s1 + $0x170] sm:$0xff] }
  0x73   : > { %2538 = vmatprep.subr.bf16.mxu1 %v2834_v19  ;;  %v482_v40 = vld [vmem:[%s3252_s26 + $0x28] sm:$0xff]  ;;  %v2203_v44 = vld [vmem:[%s4073_s1 + $0x178] sm:$0xff]  ;;  %v481_v45 = vld [vmem:[%s3252_s26 + $0x20] sm:$0xff] }
  0x74   : > { %v2246_v46 = vld [vmem:[%s4073_s1 + $0x210] sm:$0xff]  ;;  %v2247_v47 = vld [vmem:[%s4073_s1 + $0x218] sm:$0xff]  ;;  %v2563_v49 = vpack.c.bf16 %v2203_v44, %v2202_v43  ;;  %v2248_v56 = vld [vmem:[%s4073_s1 + $0x220] sm:$0xff] }
  0x75   : > { %2510 = vmatpush1.bf16.msra.mxu0 %v2509_v53  ;;  %v2135_v48 = vld [vmem:[%s3252_s26 + $0xb8] sm:$0xff]  ;;  %v2134_v51 = vld [vmem:[%s3252_s26 + $0xb0] sm:$0xff]  ;;  %v2593_v52 = vpack.c.bf16 %v2247_v47, %v2246_v46  ;;  %v2204_v53 = vld [vmem:[%s4073_s1 + $0x180] sm:$0xff] }
  0x76   : > { %2540 = vmatpush1.bf16.msra.mxu1 %v2539_v54  ;;  %2511 = vmatprep.subr.bf16.mxu0 %v2834_v19  ;;  %v484_v50 = vld [vmem:[%s3252_s26 + $0x38] sm:$0xff]  ;;  %v2205_v54 = vld [vmem:[%s4073_s1 + $0x188] sm:$0xff]  ;;  %v483_v55 = vld [vmem:[%s3252_s26 + $0x30] sm:$0xff] }
  0x77   : > { %2541 = vmatprep.subr.bf16.mxu1 %v2834_v19  ;;  %v2249_v57 = vld [vmem:[%s4073_s1 + $0x228] sm:$0xff]  ;;  %v2136_v61 = vld [vmem:[%s3252_s26 + $0xc0] sm:$0xff]  ;;  %v2206_v63 = vld [vmem:[%s4073_s1 + $0x190] sm:$0xff] }
  0x78   : > { %v2137_v58 = vld [vmem:[%s3252_s26 + $0xc8] sm:$0xff]  ;;  %v2596_v62 = vpack.c.bf16 %v2249_v57, %v2248_v56  ;;  %v2207_v0 = vld [vmem:[%s4073_s1 + $0x198] sm:$0xff]  ;;  %v2208_v9 = vld [vmem:[%s4073_s1 + $0x1a0] sm:$0xff] }
  0x79   : > { %2513 = vmatpush1.bf16.msra.mxu0 %v2512_v59  ;;  %v2566_v59 = vpack.c.bf16 %v2205_v54, %v2204_v53  ;;  %v2251_v3 = vld [vmem:[%s4073_s1 + $0x238] sm:$0xff]  ;;  %v2569_v5 = vpack.c.bf16 %v2207_v0, %v2206_v63  ;;  %v2209_v10 = vld [vmem:[%s4073_s1 + $0x1a8] sm:$0xff]  ;;  %v487_v11 = vld [vmem:[%s3252_s26 + $0x50] sm:$0xff] }
  0x7a   : > { %2543 = vmatpush1.bf16.msra.mxu1 %v2542_v60  ;;  %2514 = vmatprep.subr.bf16.mxu0 %v2834_v19  ;;  %v486_v60 = vld [vmem:[%s3252_s26 + $0x48] sm:$0xff]  ;;  %v2139_v4 = vld [vmem:[%s3252_s26 + $0xd8] sm:$0xff]  ;;  %v2252_v12 = vld [vmem:[%s4073_s1 + $0x240] sm:$0xff]  ;;  %v2572_v15 = vpack.c.bf16 %v2209_v10, %v2208_v9 }
  0x7b   : > { %2544 = vmatprep.subr.bf16.mxu1 %v2834_v19  ;;  %v488_v6 = vld [vmem:[%s3252_s26 + $0x58] sm:$0xff]  ;;  %v490_v16 = vld [vmem:[%s3252_s26 + $0x68] sm:$0xff]  ;;  %v2140_v17 = vld [vmem:[%s3252_s26 + $0xe0] sm:$0xff] }
  0x7c   : > { %v2255_v24 = vld [vmem:[%s4073_s1 + $0x258] sm:$0xff]  ;;  %v2256_v33 = vld [vmem:[%s4073_s1 + $0x260] sm:$0xff]  ;;  %v2257_v34 = vld [vmem:[%s4073_s1 + $0x268] sm:$0xff] }
  0x7d   : > { %2516 = vmatpush1.bf16.msra.mxu0 %v2515_v1  ;;  %v485_v1 = vld [vmem:[%s3252_s26 + $0x40] sm:$0xff]  ;;  %v2143_v25 = vld [vmem:[%s3252_s26 + $0xf8] sm:$0xff]  ;;  %v2225_v37 = vld [vmem:[%s3252_s26 + $0x188] sm:$0xff] }
  0x7e   : > { %2546 = vmatpush1.bf16.msra.mxu1 %v2545_v2  ;;  %2517 = vmatprep.subr.bf16.mxu0 %v2834_v19  ;;  %v2250_v2 = vld [vmem:[%s4073_s1 + $0x230] sm:$0xff]  ;;  %v492_v27 = vld [vmem:[%s3252_s26 + $0x78] sm:$0xff]  ;;  %v2285_v46 = vld [vmem:[%s4073_s1 + $0x288] sm:$0xff] }
  0x7f   : > { %2547 = vmatprep.subr.bf16.mxu1 %v2834_v19  ;;  %v2328_v47 = vld [vmem:[%s4073_s1 + $0x320] sm:$0xff]  ;;  %v2286_v53 = vld [vmem:[%s4073_s1 + $0x290] sm:$0xff]  ;;  %v2287_v54 = vld [vmem:[%s4073_s1 + $0x298] sm:$0xff] }
  0x80   : > { %v2330_v56 = vld [vmem:[%s4073_s1 + $0x330] sm:$0xff]  ;;  %v2331_v57 = vld [vmem:[%s4073_s1 + $0x338] sm:$0xff]  ;;  %v2288_v63 = vld [vmem:[%s4073_s1 + $0x2a0] sm:$0xff] }
  0x81   : > { %2519 = vmatpush1.bf16.msra.mxu0 %v2518_v7  ;;  %v2138_v7 = vld [vmem:[%s3252_s26 + $0xd0] sm:$0xff]  ;;  %v2289_v0 = vld [vmem:[%s4073_s1 + $0x2a8] sm:$0xff]  ;;  %v2291_v10 = vld [vmem:[%s4073_s1 + $0x2b8] sm:$0xff] }
  0x82   : > { %2549 = vmatpush1.bf16.msra.mxu1 %v2548_v8  ;;  %2520 = vmatprep.subr.bf16.mxu0 %v2834_v19  ;;  %v2599_v8 = vpack.c.bf16 %v2251_v3, %v2250_v2  ;;  %v2332_v2 = vld [vmem:[%s4073_s1 + $0x340] sm:$0xff]  ;;  %v2333_v3 = vld [vmem:[%s4073_s1 + $0x348] sm:$0xff]  ;;  %v2290_v9 = vld [vmem:[%s4073_s1 + $0x2b0] sm:$0xff] }
  0x83   : > { %2550 = vmatprep.subr.bf16.mxu1 %v2834_v19 }
  0x85   : > { %2522 = vmatpush1.bf16.msra.mxu0 %v2521_v13  ;;  %v2253_v13 = vld [vmem:[%s4073_s1 + $0x248] sm:$0xff] }
  0x86   : > { %2552 = vmatpush1.bf16.msra.mxu1 %v2551_v14  ;;  %2553 = vmatprep.subr.bf16.mxu0 %v2834_v19  ;;  %v2141_v14 = vld [vmem:[%s3252_s26 + $0xe8] sm:$0xff]  ;;  %v2602_v18 = vpack.c.bf16 %v2253_v13, %v2252_v12  ;;  %v2334_v12 = vld [vmem:[%s4073_s1 + $0x350] sm:$0xff]  ;;  %v2335_v13 = vld [vmem:[%s4073_s1 + $0x358] sm:$0xff] }
  0x87   : > { %2583 = vmatprep.subr.bf16.mxu1 %v2834_v19 }
  0x88   : > { %641 = vmatmul.mubr.f32.vlgmr.msra.gmra.mrb[0].mxu0 %v2128_v20  ;;  %v2210_v20 = vld [vmem:[%s4073_s1 + $0x1b0] sm:$0xff] }
  0x89   : > { %770 = vmatmul.mubr.f32.vlgmr.msra.gmra.mrb[0].mxu1 %v477_v22  ;;  %2555 = vmatpush1.bf16.msra.mxu0 %v2554_v21  ;;  %v2211_v21 = vld [vmem:[%s4073_s1 + $0x1b8] sm:$0xff]  ;;  %v489_v22 = vld [vmem:[%s3252_s26 + $0x60] sm:$0xff] }
  0x8a   : > { %2585 = vmatpush1.bf16.msra.mxu1 %v2584_v23  ;;  %2556 = vmatprep.subr.bf16.mxu0 %v2834_v19  ;;  %v2254_v23 = vld [vmem:[%s4073_s1 + $0x250] sm:$0xff]  ;;  %v2575_v26 = vpack.c.bf16 %v2211_v21, %v2210_v20  ;;  %v2292_v20 = vld [vmem:[%s4073_s1 + $0x2c0] sm:$0xff]  ;;  %v2293_v21 = vld [vmem:[%s4073_s1 + $0x2c8] sm:$0xff] }
  0x8b   : > { %2586 = vmatprep.subr.bf16.mxu1 %v2834_v19  ;;  %2165 = vmatprep.mubr.msk.f32.mxu0 %vm551_vm0, %v2131_v28  ;;  %v2142_v28 = vld [vmem:[%s3252_s26 + $0xf0] sm:$0xff] }
  0x8c   : > { %2173 = vmatprep.mubr.msk.f32.mxu1 %vm551_vm0, %v480_v30  ;;  %646 = vmatmul.mubr.f32.gmra.mrb[2].mxu0 %v2130_v31  ;;  %v2212_v30 = vld [vmem:[%s4073_s1 + $0x1c0] sm:$0xff]  ;;  %v2213_v31 = vld [vmem:[%s4073_s1 + $0x1c8] sm:$0xff] }
  0x8d   : > { %2558 = vmatpush1.bf16.msra.mxu0 %v2557_v29  ;;  %775 = vmatmul.mubr.f32.gmra.mrb[2].mxu1 %v479_v35  ;;  %v2605_v29 = vpack.c.bf16 %v2255_v24, %v2254_v23  ;;  %v2181_v35 = vld [vmem:[%s3252_s26 + $0x108] sm:$0xff]  ;;  %v2578_v36 = vpack.c.bf16 %v2213_v31, %v2212_v30  ;;  %v2336_v23 = vld [vmem:[%s4073_s1 + $0x360] sm:$0xff]  ;;  %v2294_v30 = vld [vmem:[%s4073_s1 + $0x2d0] sm:$0xff] }
  0x8e   : > { %2588 = vmatpush1.bf16.msra.mxu1 %v2587_v32  ;;  %2559 = vmatprep.subr.bf16.mxu0 %v2834_v19  ;;  %v491_v32 = vld [vmem:[%s3252_s26 + $0x70] sm:$0xff]  ;;  %v2337_v24 = vld [vmem:[%s4073_s1 + $0x368] sm:$0xff]  ;;  %v2295_v31 = vld [vmem:[%s4073_s1 + $0x2d8] sm:$0xff] }
  0x8f   : > { %2589 = vmatprep.subr.bf16.mxu1 %v2834_v19  ;;  %2166 = vmatprep.mubr.msk.f32.mxu0 %vm551_vm0, %v2133_v38  ;;  %v2608_v38 = vpack.c.bf16 %v2257_v34, %v2256_v33  ;;  %v2338_v33 = vld [vmem:[%s4073_s1 + $0x370] sm:$0xff]  ;;  %v2339_v34 = vld [vmem:[%s4073_s1 + $0x378] sm:$0xff] }
  0x90   : > { %2174 = vmatprep.mubr.msk.f32.mxu1 %vm551_vm0, %v482_v40  ;;  %651 = vmatmul.mubr.f32.gmra.mrb[4].mxu0 %v2132_v41  ;;  %v2215_v40 = vld [vmem:[%s4073_s1 + $0x1d8] sm:$0xff]  ;;  %v2258_v41 = vld [vmem:[%s4073_s1 + $0x270] sm:$0xff] }
  0x91   : > { %2561 = vmatpush1.bf16.msra.mxu0 %v2560_v39  ;;  %780 = vmatmul.mubr.f32.gmra.mrb[4].mxu1 %v481_v45  ;;  %v2214_v39 = vld [vmem:[%s4073_s1 + $0x1d0] sm:$0xff]  ;;  %v2284_v45 = vld [vmem:[%s4073_s1 + $0x280] sm:$0xff] }
  0x92   : > { %2591 = vmatpush1.bf16.msra.mxu1 %v2590_v42  ;;  %2562 = vmatprep.subr.bf16.mxu0 %v2834_v19  ;;  %v2259_v42 = vld [vmem:[%s4073_s1 + $0x278] sm:$0xff]  ;;  %v2581_v43 = vpack.c.bf16 %v2215_v40, %v2214_v39  ;;  %v2234_v39 = vld [vmem:[%s3252_s26 + $0x1d0] sm:$0xff]  ;;  %v2296_v40 = vld [vmem:[%s4073_s1 + $0x2e0] sm:$0xff] }
  0x93   : > { %2592 = vmatprep.subr.bf16.mxu1 %v2834_v19  ;;  %2167 = vmatprep.mubr.msk.f32.mxu0 %vm551_vm0, %v2135_v48  ;;  %v2611_v44 = vpack.c.bf16 %v2259_v42, %v2258_v41  ;;  %v2329_v48 = vld [vmem:[%s4073_s1 + $0x328] sm:$0xff] }
  0x94   : > { %2175 = vmatprep.mubr.msk.f32.mxu1 %vm551_vm0, %v484_v50  ;;  %656 = vmatmul.mubr.f32.gmra.mrb[6].mxu0 %v2134_v51  ;;  %v2614_v50 = vpack.c.bf16 %v2285_v46, %v2284_v45  ;;  %v2224_v51 = vld [vmem:[%s3252_s26 + $0x180] sm:$0xff]  ;;  %v2297_v41 = vld [vmem:[%s4073_s1 + $0x2e8] sm:$0xff] }
  0x95   : > { %2564 = vmatpush1.bf16.msra.mxu0 %v2563_v49  ;;  %785 = vmatmul.mubr.f32.gmra.mrb[6].mxu1 %v483_v55  ;;  %v2180_v49 = vld [vmem:[%s3252_s26 + $0x100] sm:$0xff]  ;;  %v2183_v55 = vld [vmem:[%s3252_s26 + $0x118] sm:$0xff]  ;;  %v2193_v42 = vld [vmem:[%s3252_s26 + $0x168] sm:$0xff] }
  0x96   : > { %2594 = vmatpush1.bf16.msra.mxu1 %v2593_v52  ;;  %2565 = vmatprep.subr.bf16.mxu0 %v2834_v19  ;;  %v2644_v52 = vpack.c.bf16 %v2329_v48, %v2328_v47  ;;  %v2192_v45 = vld [vmem:[%s3252_s26 + $0x160] sm:$0xff]  ;;  %v2237_v46 = vld [vmem:[%s3252_s26 + $0x1e8] sm:$0xff]  ;;  %v2632_v47 = vpack.c.bf16 %v2297_v41, %v2296_v40  ;;  %v2379_v40 = vld [vmem:[%s4073_s1 + $0x3f8] sm:$0xff] }
  0x97   : > { %2595 = vmatprep.subr.bf16.mxu1 %v2834_v19  ;;  %2168 = vmatprep.mubr.msk.f32.mxu0 %vm551_vm0, %v2137_v58  ;;  %v2182_v58 = vld [vmem:[%s3252_s26 + $0x110] sm:$0xff]  ;;  %v2275_v41 = vld [vmem:[%s3252_s26 + $0x238] sm:$0xff] }
  0x98   : > { %2176 = vmatprep.mubr.msk.f32.mxu1 %vm551_vm0, %v486_v60  ;;  %661 = vmatmul.mubr.f32.gmra.mrb[8].mxu0 %v2136_v61  ;;  %v2617_v60 = vpack.c.bf16 %v2287_v54, %v2286_v53  ;;  %v2647_v61 = vpack.c.bf16 %v2331_v57, %v2330_v56  ;;  %v2342_v53 = vld [vmem:[%s4073_s1 + $0x390] sm:$0xff]  ;;  %v2343_v54 = vld [vmem:[%s4073_s1 + $0x398] sm:$0xff] }
  0x99   : > { %2567 = vmatpush1.bf16.msra.mxu0 %v2566_v59  ;;  %790 = vmatmul.mubr.f32.gmra.mrb[8].mxu1 %v485_v1  ;;  %v2227_v59 = vld [vmem:[%s3252_s26 + $0x198] sm:$0xff]  ;;  %v2185_v1 = vld [vmem:[%s3252_s26 + $0x128] sm:$0xff] }
  0x9a   : > { %2597 = vmatpush1.bf16.msra.mxu1 %v2596_v62  ;;  %2568 = vmatprep.subr.bf16.mxu0 %v2834_v19  ;;  %v2226_v62 = vld [vmem:[%s3252_s26 + $0x190] sm:$0xff]  ;;  %v2239_v56 = vld [vmem:[%s3252_s26 + $0x1f8] sm:$0xff] }
  0x9b   : > { %2598 = vmatprep.subr.bf16.mxu1 %v2834_v19  ;;  %2169 = vmatprep.mubr.msk.f32.mxu0 %vm551_vm0, %v2139_v4  ;;  %v2184_v4 = vld [vmem:[%s3252_s26 + $0x120] sm:$0xff] }
  0x9c   : > { %2177 = vmatprep.mubr.msk.f32.mxu1 %vm551_vm0, %v488_v6  ;;  %666 = vmatmul.mubr.f32.gmra.mrb[10].mxu0 %v2138_v7  ;;  %v2620_v6 = vpack.c.bf16 %v2289_v0, %v2288_v63  ;;  %v2650_v7 = vpack.c.bf16 %v2333_v3, %v2332_v2  ;;  %v2345_v63 = vld [vmem:[%s4073_s1 + $0x3a8] sm:$0xff] }
  0x9d   : > { %2570 = vmatpush1.bf16.msra.mxu0 %v2569_v5  ;;  %795 = vmatmul.mubr.f32.gmra.mrb[10].mxu1 %v487_v11  ;;  %v2229_v5 = vld [vmem:[%s3252_s26 + $0x1a8] sm:$0xff]  ;;  %v2187_v11 = vld [vmem:[%s3252_s26 + $0x138] sm:$0xff] }
  0x9e   : > { %2600 = vmatpush1.bf16.msra.mxu1 %v2599_v8  ;;  %2571 = vmatprep.subr.bf16.mxu0 %v2834_v19  ;;  %v2228_v8 = vld [vmem:[%s3252_s26 + $0x1a0] sm:$0xff]  ;;  %v2269_v0 = vld [vmem:[%s3252_s26 + $0x208] sm:$0xff] }
  0x9f   : > { %2601 = vmatprep.subr.bf16.mxu1 %v2834_v19  ;;  %2170 = vmatprep.mubr.msk.f32.mxu0 %vm551_vm0, %v2141_v14  ;;  %v2186_v14 = vld [vmem:[%s3252_s26 + $0x130] sm:$0xff]  ;;  %v2313_v2 = vld [vmem:[%s3252_s26 + $0x288] sm:$0xff] }
  0xa0   : > { %2178 = vmatprep.mubr.msk.f32.mxu1 %vm551_vm0, %v490_v16  ;;  %671 = vmatmul.mubr.f32.gmra.mrb[12].mxu0 %v2140_v17  ;;  %v2623_v16 = vpack.c.bf16 %v2291_v10, %v2290_v9  ;;  %v2653_v17 = vpack.c.bf16 %v2335_v13, %v2334_v12  ;;  %v2372_v10 = vld [vmem:[%s4073_s1 + $0x3c0] sm:$0xff]  ;;  %v2417_v13 = vld [vmem:[%s4073_s1 + $0x468] sm:$0xff] }
  0xa1   : > { %2573 = vmatpush1.bf16.msra.mxu0 %v2572_v15  ;;  %800 = vmatmul.mubr.f32.gmra.mrb[12].mxu1 %v489_v22  ;;  %v2231_v15 = vld [vmem:[%s3252_s26 + $0x1b8] sm:$0xff]  ;;  %v2189_v22 = vld [vmem:[%s3252_s26 + $0x148] sm:$0xff]  ;;  %v2416_v12 = vld [vmem:[%s4073_s1 + $0x460] sm:$0xff] }
  0xa2   : > { %2603 = vmatpush1.bf16.msra.mxu1 %v2602_v18  ;;  %2574 = vmatprep.subr.bf16.mxu0 %v2834_v19  ;;  %v2230_v18 = vld [vmem:[%s3252_s26 + $0x1b0] sm:$0xff] }
  0xa3   : > { %2604 = vmatprep.subr.bf16.mxu1 %v2834_v19  ;;  %2171 = vmatprep.mubr.msk.f32.mxu0 %vm551_vm0, %v2143_v25  ;;  %v2188_v25 = vld [vmem:[%s3252_s26 + $0x140] sm:$0xff] }
  0xa4   : > { %2179 = vmatprep.mubr.msk.f32.mxu1 %vm551_vm0, %v492_v27  ;;  %676 = vmatmul.mubr.f32.gmra.mrb[14].mxu0 %v2142_v28  ;;  %v2626_v27 = vpack.c.bf16 %v2293_v21, %v2292_v20  ;;  %v2656_v28 = vpack.c.bf16 %v2337_v24, %v2336_v23  ;;  %v2375_v20 = vld [vmem:[%s4073_s1 + $0x3d8] sm:$0xff]  ;;  %v2270_v24 = vld [vmem:[%s3252_s26 + $0x210] sm:$0xff] }
  0xa5   : > { %2576 = vmatpush1.bf16.msra.mxu0 %v2575_v26  ;;  %805 = vmatmul.mubr.f32.gmra.mrb[14].mxu1 %v491_v32  ;;  %v2233_v26 = vld [vmem:[%s3252_s26 + $0x1c8] sm:$0xff]  ;;  %v2191_v32 = vld [vmem:[%s3252_s26 + $0x158] sm:$0xff] }
  0xa6   : > { %2606 = vmatpush1.bf16.msra.mxu1 %v2605_v29  ;;  %2577 = vmatprep.subr.bf16.mxu0 %v2834_v19  ;;  %v2232_v29 = vld [vmem:[%s3252_s26 + $0x1c0] sm:$0xff]  ;;  %v2271_v21 = vld [vmem:[%s3252_s26 + $0x218] sm:$0xff] }
  0xa7   : > { %2607 = vmatprep.subr.bf16.mxu1 %v2834_v19  ;;  %2216 = vmatprep.mubr.msk.f32.mxu0 %vm551_vm0, %v2181_v35  ;;  %v2190_v35 = vld [vmem:[%s3252_s26 + $0x150] sm:$0xff]  ;;  %v2419_v23 = vld [vmem:[%s4073_s1 + $0x478] sm:$0xff] }
  0xa8   : > { %2260 = vmatprep.mubr.msk.f32.mxu1 %vm551_vm0, %v2225_v37  ;;  %v2629_v37 = vpack.c.bf16 %v2295_v31, %v2294_v30  ;;  %v2377_v30 = vld [vmem:[%s4073_s1 + $0x3e8] sm:$0xff] }
  0xa9   : > { %2579 = vmatpush1.bf16.msra.mxu0 %v2578_v36  ;;  %v2235_v36 = vld [vmem:[%s3252_s26 + $0x1d8] sm:$0xff]  ;;  %v2273_v31 = vld [vmem:[%s3252_s26 + $0x228] sm:$0xff] }
  0xaa   : > { %2609 = vmatpush1.bf16.msra.mxu1 %v2608_v38  ;;  %2580 = vmatprep.subr.bf16.mxu0 %v2834_v19  ;;  %v2659_v38 = vpack.c.bf16 %v2339_v34, %v2338_v33  ;;  %v2421_v33 = vld [vmem:[%s4073_s1 + $0x488] sm:$0xff]  ;;  %v2272_v34 = vld [vmem:[%s3252_s26 + $0x220] sm:$0xff] }
  0xab   : > { %2610 = vmatprep.subr.bf16.mxu1 %v2834_v19 }
  0xad   : > { %2582 = vmatpush1.bf16.msra.mxu0 %v2581_v43  ;;  %v2340_v43 = vld [vmem:[%s4073_s1 + $0x380] sm:$0xff] }
  0xae   : > { %2612 = vmatpush1.bf16.msra.mxu1 %v2611_v44  ;;  %2613 = vmatprep.subr.bf16.mxu0 %v2834_v19  ;;  %v2341_v44 = vld [vmem:[%s4073_s1 + $0x388] sm:$0xff] }
  0xaf   : > { %2643 = vmatprep.subr.bf16.mxu1 %v2834_v19  ;;  %v2662_v48 = vpack.c.bf16 %v2341_v44, %v2340_v43  ;;  %v2423_v43 = vld [vmem:[%s4073_s1 + $0x498] sm:$0xff]  ;;  %v2274_v44 = vld [vmem:[%s3252_s26 + $0x230] sm:$0xff] }
  0xb0   : > { %937 = vmatmul.mubr.f32.vlgmr.msra.gmra.mrb[16].mxu0 %v2180_v49  ;;  %v2236_v49 = vld [vmem:[%s3252_s26 + $0x1e0] sm:$0xff] }
  0xb1   : > { %1112 = vmatmul.mubr.f32.vlgmr.msra.gmra.mrb[16].mxu1 %v2224_v51  ;;  %2615 = vmatpush1.bf16.msra.mxu0 %v2614_v50  ;;  %v2298_v50 = vld [vmem:[%s4073_s1 + $0x2f0] sm:$0xff]  ;;  %v2299_v51 = vld [vmem:[%s4073_s1 + $0x2f8] sm:$0xff] }
  0xb2   : > { %2645 = vmatpush1.bf16.msra.mxu1 %v2644_v52  ;;  %2217 = vmatprep.mubr.msk.f32.mxu0 %vm551_vm0, %v2183_v55  ;;  %v2195_v52 = vld [vmem:[%s3252_s26 + $0x178] sm:$0xff]  ;;  %v2194_v55 = vld [vmem:[%s3252_s26 + $0x170] sm:$0xff]  ;;  %v2635_v57 = vpack.c.bf16 %v2299_v51, %v2298_v50  ;;  %v2381_v50 = vld [vmem:[%s4073_s1 + $0x408] sm:$0xff] }
  0xb3   : > { %2616 = vmatprep.subr.bf16.mxu0 %v2834_v19  ;;  %2646 = vmatprep.subr.bf16.mxu1 %v2834_v19  ;;  %v2277_v51 = vld [vmem:[%s3252_s26 + $0x248] sm:$0xff] }
  0xb4   : > { %942 = vmatmul.mubr.f32.gmra.mrb[18].mxu0 %v2182_v58  ;;  %2261 = vmatprep.mubr.msk.f32.mxu1 %vm551_vm0, %v2227_v59  ;;  %v2665_v58 = vpack.c.bf16 %v2343_v54, %v2342_v53  ;;  %v2238_v59 = vld [vmem:[%s3252_s26 + $0x1f0] sm:$0xff]  ;;  %v2425_v53 = vld [vmem:[%s4073_s1 + $0x4a8] sm:$0xff]  ;;  %v2276_v54 = vld [vmem:[%s3252_s26 + $0x240] sm:$0xff] }
  0xb5   : > { %2618 = vmatpush1.bf16.msra.mxu0 %v2617_v60  ;;  %1117 = vmatmul.mubr.f32.gmra.mrb[18].mxu1 %v2226_v62  ;;  %v2300_v60 = vld [vmem:[%s4073_s1 + $0x300] sm:$0xff] }
  0xb6   : > { %2648 = vmatpush1.bf16.msra.mxu1 %v2647_v61  ;;  %2218 = vmatprep.mubr.msk.f32.mxu0 %vm551_vm0, %v2185_v1  ;;  %v2301_v61 = vld [vmem:[%s4073_s1 + $0x308] sm:$0xff]  ;;  %v2344_v62 = vld [vmem:[%s4073_s1 + $0x3a0] sm:$0xff] }
  0xb7   : > { %2619 = vmatprep.subr.bf16.mxu0 %v2834_v19  ;;  %2649 = vmatprep.subr.bf16.mxu1 %v2834_v19  ;;  %v2638_v1 = vpack.c.bf16 %v2301_v61, %v2300_v60  ;;  %v2668_v3 = vpack.c.bf16 %v2345_v63, %v2344_v62  ;;  %v2383_v60 = vld [vmem:[%s4073_s1 + $0x418] sm:$0xff]  ;;  %v2426_v62 = vld [vmem:[%s4073_s1 + $0x4b0] sm:$0xff] }
  0xb8   : > { %947 = vmatmul.mubr.f32.gmra.mrb[20].mxu0 %v2184_v4  ;;  %2262 = vmatprep.mubr.msk.f32.mxu1 %vm551_vm0, %v2229_v5  ;;  %v2302_v4 = vld [vmem:[%s4073_s1 + $0x310] sm:$0xff]  ;;  %v2303_v5 = vld [vmem:[%s4073_s1 + $0x318] sm:$0xff] }
  0xb9   : > { %2621 = vmatpush1.bf16.msra.mxu0 %v2620_v6  ;;  %1122 = vmatmul.mubr.f32.gmra.mrb[20].mxu1 %v2228_v8  ;;  %v2346_v6 = vld [vmem:[%s4073_s1 + $0x3b0] sm:$0xff]  ;;  %v2641_v8 = vpack.c.bf16 %v2303_v5, %v2302_v4  ;;  %v2279_v61 = vld [vmem:[%s3252_s26 + $0x258] sm:$0xff]  ;;  %v2384_v5 = vld [vmem:[%s4073_s1 + $0x420] sm:$0xff] }
  0xba   : > { %2651 = vmatpush1.bf16.msra.mxu1 %v2650_v7  ;;  %2219 = vmatprep.mubr.msk.f32.mxu0 %vm551_vm0, %v2187_v11  ;;  %v2347_v7 = vld [vmem:[%s4073_s1 + $0x3b8] sm:$0xff]  ;;  %v2373_v11 = vld [vmem:[%s4073_s1 + $0x3c8] sm:$0xff]  ;;  %v2322_v4 = vld [vmem:[%s3252_s26 + $0x2d0] sm:$0xff] }
  0xbb   : > { %2622 = vmatprep.subr.bf16.mxu0 %v2834_v19  ;;  %2652 = vmatprep.subr.bf16.mxu1 %v2834_v19  ;;  %v2671_v9 = vpack.c.bf16 %v2347_v7, %v2346_v6  ;;  %v2427_v63 = vld [vmem:[%s4073_s1 + $0x4b8] sm:$0xff]  ;;  %v2385_v6 = vld [vmem:[%s4073_s1 + $0x428] sm:$0xff] }
  0xbc   : > { %952 = vmatmul.mubr.f32.gmra.mrb[22].mxu0 %v2186_v14  ;;  %2263 = vmatprep.mubr.msk.f32.mxu1 %vm551_vm0, %v2231_v15  ;;  %v2268_v14 = vld [vmem:[%s3252_s26 + $0x200] sm:$0xff]  ;;  %v2674_v15 = vpack.c.bf16 %v2373_v11, %v2372_v10  ;;  %v2281_v7 = vld [vmem:[%s3252_s26 + $0x268] sm:$0xff] }
  0xbd   : > { %2624 = vmatpush1.bf16.msra.mxu0 %v2623_v16  ;;  %1127 = vmatmul.mubr.f32.gmra.mrb[22].mxu1 %v2230_v18  ;;  %v2312_v16 = vld [vmem:[%s3252_s26 + $0x280] sm:$0xff]  ;;  %v2374_v18 = vld [vmem:[%s4073_s1 + $0x3d0] sm:$0xff]  ;;  %v2325_v11 = vld [vmem:[%s3252_s26 + $0x2e8] sm:$0xff] }
  0xbe   : > { %2654 = vmatpush1.bf16.msra.mxu1 %v2653_v17  ;;  %2220 = vmatprep.mubr.msk.f32.mxu0 %vm551_vm0, %v2189_v22  ;;  %v2704_v17 = vpack.c.bf16 %v2417_v13, %v2416_v12  ;;  %v2418_v22 = vld [vmem:[%s4073_s1 + $0x470] sm:$0xff]  ;;  %v2280_v10 = vld [vmem:[%s3252_s26 + $0x260] sm:$0xff]  ;;  %v2692_v12 = vpack.c.bf16 %v2385_v6, %v2384_v5  ;;  %v2409_v6 = vld [vmem:[%s3252_s26 + $0x3c8] sm:$0xff] }
  0xbf   : > { %2625 = vmatprep.subr.bf16.mxu0 %v2834_v19  ;;  %2655 = vmatprep.subr.bf16.mxu1 %v2834_v19  ;;  %v2364_v5 = vld [vmem:[%s3252_s26 + $0x340] sm:$0xff] }
  0xc0   : > { %957 = vmatmul.mubr.f32.gmra.mrb[24].mxu0 %v2188_v25  ;;  %2264 = vmatprep.mubr.msk.f32.mxu1 %vm551_vm0, %v2233_v26  ;;  %v2315_v25 = vld [vmem:[%s3252_s26 + $0x298] sm:$0xff]  ;;  %v2677_v26 = vpack.c.bf16 %v2375_v20, %v2374_v18  ;;  %v2430_v18 = vld [vmem:[%s4073_s1 + $0x4d0] sm:$0xff] }
  0xc1   : > { %2627 = vmatpush1.bf16.msra.mxu0 %v2626_v27  ;;  %1132 = vmatmul.mubr.f32.gmra.mrb[24].mxu1 %v2232_v29  ;;  %v2707_v27 = vpack.c.bf16 %v2419_v23, %v2418_v22  ;;  %v2376_v29 = vld [vmem:[%s4073_s1 + $0x3e0] sm:$0xff]  ;;  %v2431_v20 = vld [vmem:[%s4073_s1 + $0x4d8] sm:$0xff] }
  0xc2   : > { %2657 = vmatpush1.bf16.msra.mxu1 %v2656_v28  ;;  %2221 = vmatprep.mubr.msk.f32.mxu0 %vm551_vm0, %v2191_v32  ;;  %v2314_v28 = vld [vmem:[%s3252_s26 + $0x290] sm:$0xff]  ;;  %v2420_v32 = vld [vmem:[%s4073_s1 + $0x480] sm:$0xff]  ;;  %v2327_v22 = vld [vmem:[%s3252_s26 + $0x2f8] sm:$0xff] }
  0xc3   : > { %2628 = vmatprep.subr.bf16.mxu0 %v2834_v19  ;;  %2658 = vmatprep.subr.bf16.mxu1 %v2834_v19 }
  0xc4   : > { %962 = vmatmul.mubr.f32.gmra.mrb[26].mxu0 %v2190_v35  ;;  %2265 = vmatprep.mubr.msk.f32.mxu1 %vm551_vm0, %v2235_v36  ;;  %v2317_v35 = vld [vmem:[%s3252_s26 + $0x2a8] sm:$0xff]  ;;  %v2680_v36 = vpack.c.bf16 %v2377_v30, %v2376_v29 }
  0xc5   : > { %2630 = vmatpush1.bf16.msra.mxu0 %v2629_v37  ;;  %1137 = vmatmul.mubr.f32.gmra.mrb[26].mxu1 %v2234_v39  ;;  %v2710_v37 = vpack.c.bf16 %v2421_v33, %v2420_v32  ;;  %v2378_v39 = vld [vmem:[%s4073_s1 + $0x3f0] sm:$0xff]  ;;  %v2433_v29 = vld [vmem:[%s4073_s1 + $0x4e8] sm:$0xff] }
  0xc6   : > { %2660 = vmatpush1.bf16.msra.mxu1 %v2659_v38  ;;  %2222 = vmatprep.mubr.msk.f32.mxu0 %vm551_vm0, %v2193_v42  ;;  %v2316_v38 = vld [vmem:[%s3252_s26 + $0x2a0] sm:$0xff]  ;;  %v2422_v42 = vld [vmem:[%s4073_s1 + $0x490] sm:$0xff]  ;;  %v2357_v30 = vld [vmem:[%s3252_s26 + $0x308] sm:$0xff] }
  0xc7   : > { %2631 = vmatprep.subr.bf16.mxu0 %v2834_v19  ;;  %2661 = vmatprep.subr.bf16.mxu1 %v2834_v19  ;;  %v2401_v32 = vld [vmem:[%s3252_s26 + $0x388] sm:$0xff] }
  0xc8   : > { %967 = vmatmul.mubr.f32.gmra.mrb[28].mxu0 %v2192_v45  ;;  %2266 = vmatprep.mubr.msk.f32.mxu1 %vm551_vm0, %v2237_v46  ;;  %v2319_v45 = vld [vmem:[%s3252_s26 + $0x2b8] sm:$0xff]  ;;  %v2683_v46 = vpack.c.bf16 %v2379_v40, %v2378_v39  ;;  %v2460_v40 = vld [vmem:[%s4073_s1 + $0x500] sm:$0xff] }
  0xc9   : > { %2633 = vmatpush1.bf16.msra.mxu0 %v2632_v47  ;;  %1142 = vmatmul.mubr.f32.gmra.mrb[28].mxu1 %v2236_v49  ;;  %v2713_v47 = vpack.c.bf16 %v2423_v43, %v2422_v42  ;;  %v2380_v49 = vld [vmem:[%s4073_s1 + $0x400] sm:$0xff] }
  0xca   : > { %2663 = vmatpush1.bf16.msra.mxu1 %v2662_v48  ;;  %2223 = vmatprep.mubr.msk.f32.mxu0 %vm551_vm0, %v2195_v52  ;;  %v2318_v48 = vld [vmem:[%s3252_s26 + $0x2b0] sm:$0xff]  ;;  %v2424_v52 = vld [vmem:[%s4073_s1 + $0x4a0] sm:$0xff] }
  0xcb   : > { %2634 = vmatprep.subr.bf16.mxu0 %v2834_v19  ;;  %2664 = vmatprep.subr.bf16.mxu1 %v2834_v19  ;;  %v2356_v42 = vld [vmem:[%s3252_s26 + $0x300] sm:$0xff] }
  0xcc   : > { %972 = vmatmul.mubr.f32.gmra.mrb[30].mxu0 %v2194_v55  ;;  %2267 = vmatprep.mubr.msk.f32.mxu1 %vm551_vm0, %v2239_v56  ;;  %v2321_v55 = vld [vmem:[%s3252_s26 + $0x2c8] sm:$0xff]  ;;  %v2686_v56 = vpack.c.bf16 %v2381_v50, %v2380_v49  ;;  %v2403_v49 = vld [vmem:[%s3252_s26 + $0x398] sm:$0xff] }
  0xcd   : > { %2636 = vmatpush1.bf16.msra.mxu0 %v2635_v57  ;;  %1147 = vmatmul.mubr.f32.gmra.mrb[30].mxu1 %v2238_v59  ;;  %v2716_v57 = vpack.c.bf16 %v2425_v53, %v2424_v52  ;;  %v2382_v59 = vld [vmem:[%s4073_s1 + $0x410] sm:$0xff]  ;;  %v2464_v52 = vld [vmem:[%s4073_s1 + $0x520] sm:$0xff]  ;;  %v2465_v53 = vld [vmem:[%s4073_s1 + $0x528] sm:$0xff] }
  0xce   : > { %2666 = vmatpush1.bf16.msra.mxu1 %v2665_v58  ;;  %2637 = vmatprep.subr.bf16.mxu0 %v2834_v19  ;;  %v2320_v58 = vld [vmem:[%s3252_s26 + $0x2c0] sm:$0xff] }
  0xcf   : > { %2667 = vmatprep.subr.bf16.mxu1 %v2834_v19  ;;  %2304 = vmatprep.mubr.msk.f32.mxu0 %vm551_vm0, %v2269_v0  ;;  %v2278_v0 = vld [vmem:[%s3252_s26 + $0x250] sm:$0xff] }
  0xd0   : > { %2348 = vmatprep.mubr.msk.f32.mxu1 %vm551_vm0, %v2313_v2  ;;  %v2689_v2 = vpack.c.bf16 %v2383_v60, %v2382_v59  ;;  %v2466_v59 = vld [vmem:[%s4073_s1 + $0x530] sm:$0xff]  ;;  %v2467_v60 = vld [vmem:[%s4073_s1 + $0x538] sm:$0xff] }
  0xd1   : > { %2639 = vmatpush1.bf16.msra.mxu0 %v2638_v1  ;;  %v2323_v1 = vld [vmem:[%s3252_s26 + $0x2d8] sm:$0xff] }
  0xd2   : > { %2669 = vmatpush1.bf16.msra.mxu1 %v2668_v3  ;;  %2640 = vmatprep.subr.bf16.mxu0 %v2834_v19  ;;  %v2719_v3 = vpack.c.bf16 %v2427_v63, %v2426_v62  ;;  %v2362_v62 = vld [vmem:[%s3252_s26 + $0x330] sm:$0xff]  ;;  %v2407_v63 = vld [vmem:[%s3252_s26 + $0x3b8] sm:$0xff] }
  0xd3   : > { %2670 = vmatprep.subr.bf16.mxu1 %v2834_v19 }
  0xd5   : > { %2642 = vmatpush1.bf16.msra.mxu0 %v2641_v8  ;;  %v2428_v8 = vld [vmem:[%s4073_s1 + $0x4c0] sm:$0xff] }
  0xd6   : > { %2672 = vmatpush1.bf16.msra.mxu1 %v2671_v9  ;;  %2673 = vmatprep.subr.bf16.mxu0 %v2834_v19  ;;  %v2429_v9 = vld [vmem:[%s4073_s1 + $0x4c8] sm:$0xff] }
  0xd7   : > { %2703 = vmatprep.subr.bf16.mxu1 %v2834_v19  ;;  %v2722_v13 = vpack.c.bf16 %v2429_v9, %v2428_v8  ;;  %v2408_v8 = vld [vmem:[%s3252_s26 + $0x3c0] sm:$0xff]  ;;  %v2470_v9 = vld [vmem:[%s4073_s1 + $0x550] sm:$0xff] }
  0xd8   : > { %1287 = vmatmul.mubr.f32.vlgmr.msra.gmra.mrb[32].mxu0 %v2268_v14  ;;  %v2324_v14 = vld [vmem:[%s3252_s26 + $0x2e0] sm:$0xff] }
  0xd9   : > { %1462 = vmatmul.mubr.f32.vlgmr.msra.gmra.mrb[32].mxu1 %v2312_v16  ;;  %2675 = vmatpush1.bf16.msra.mxu0 %v2674_v15  ;;  %v2386_v15 = vld [vmem:[%s4073_s1 + $0x430] sm:$0xff]  ;;  %v2387_v16 = vld [vmem:[%s4073_s1 + $0x438] sm:$0xff] }
  0xda   : > { %2705 = vmatpush1.bf16.msra.mxu1 %v2704_v17  ;;  %2305 = vmatprep.mubr.msk.f32.mxu0 %vm551_vm0, %v2271_v21  ;;  %v2283_v17 = vld [vmem:[%s3252_s26 + $0x278] sm:$0xff]  ;;  %v2282_v21 = vld [vmem:[%s3252_s26 + $0x270] sm:$0xff]  ;;  %v2695_v23 = vpack.c.bf16 %v2387_v16, %v2386_v15  ;;  %v2472_v16 = vld [vmem:[%s4073_s1 + $0x560] sm:$0xff] }
  0xdb   : > { %2676 = vmatprep.subr.bf16.mxu0 %v2834_v19  ;;  %2706 = vmatprep.subr.bf16.mxu1 %v2834_v19  ;;  %v2410_v15 = vld [vmem:[%s3252_s26 + $0x3d0] sm:$0xff] }
  0xdc   : > { %1292 = vmatmul.mubr.f32.gmra.mrb[34].mxu0 %v2270_v24  ;;  %2349 = vmatprep.mubr.msk.f32.mxu1 %vm551_vm0, %v2315_v25  ;;  %v2725_v24 = vpack.c.bf16 %v2431_v20, %v2430_v18  ;;  %v2326_v25 = vld [vmem:[%s3252_s26 + $0x2f0] sm:$0xff]  ;;  %v2369_v18 = vld [vmem:[%s3252_s26 + $0x368] sm:$0xff]  ;;  %v2368_v20 = vld [vmem:[%s3252_s26 + $0x360] sm:$0xff] }
  0xdd   : > { %2678 = vmatpush1.bf16.msra.mxu0 %v2677_v26  ;;  %1467 = vmatmul.mubr.f32.gmra.mrb[34].mxu1 %v2314_v28  ;;  %v2388_v26 = vld [vmem:[%s4073_s1 + $0x440] sm:$0xff] }
  0xde   : > { %2708 = vmatpush1.bf16.msra.mxu1 %v2707_v27  ;;  %2306 = vmatprep.mubr.msk.f32.mxu0 %vm551_vm0, %v2273_v31  ;;  %v2389_v27 = vld [vmem:[%s4073_s1 + $0x448] sm:$0xff]  ;;  %v2432_v28 = vld [vmem:[%s4073_s1 + $0x4e0] sm:$0xff] }
  0xdf   : > { %2679 = vmatprep.subr.bf16.mxu0 %v2834_v19  ;;  %2709 = vmatprep.subr.bf16.mxu1 %v2834_v19  ;;  %v2698_v31 = vpack.c.bf16 %v2389_v27, %v2388_v26  ;;  %v2728_v33 = vpack.c.bf16 %v2433_v29, %v2432_v28  ;;  %v2371_v26 = vld [vmem:[%s3252_s26 + $0x378] sm:$0xff]  ;;  %v2370_v27 = vld [vmem:[%s3252_s26 + $0x370] sm:$0xff] }
  0xe0   : > { %1297 = vmatmul.mubr.f32.gmra.mrb[36].mxu0 %v2272_v34  ;;  %2350 = vmatprep.mubr.msk.f32.mxu1 %vm551_vm0, %v2317_v35  ;;  %v2390_v34 = vld [vmem:[%s4073_s1 + $0x450] sm:$0xff]  ;;  %v2391_v35 = vld [vmem:[%s4073_s1 + $0x458] sm:$0xff] }
  0xe1   : > { %2681 = vmatpush1.bf16.msra.mxu0 %v2680_v36  ;;  %1472 = vmatmul.mubr.f32.gmra.mrb[36].mxu1 %v2316_v38  ;;  %v2434_v36 = vld [vmem:[%s4073_s1 + $0x4f0] sm:$0xff]  ;;  %v2701_v38 = vpack.c.bf16 %v2391_v35, %v2390_v34  ;;  %v2415_v28 = vld [vmem:[%s3252_s26 + $0x3f8] sm:$0xff]  ;;  %v2453_v35 = vld [vmem:[%s3252_s26 + $0x448] sm:$0xff] }
  0xe2   : > { %2711 = vmatpush1.bf16.msra.mxu1 %v2710_v37  ;;  %2307 = vmatprep.mubr.msk.f32.mxu0 %vm551_vm0, %v2275_v41  ;;  %v2435_v37 = vld [vmem:[%s4073_s1 + $0x4f8] sm:$0xff]  ;;  %v2461_v41 = vld [vmem:[%s4073_s1 + $0x508] sm:$0xff] }
  0xe3   : > { %2682 = vmatprep.subr.bf16.mxu0 %v2834_v19  ;;  %2712 = vmatprep.subr.bf16.mxu1 %v2834_v19  ;;  %v2731_v39 = vpack.c.bf16 %v2435_v37, %v2434_v36  ;;  %v2734_v43 = vpack.c.bf16 %v2461_v41, %v2460_v40  ;;  %v2478_v36 = vld [vmem:[%s4073_s1 + $0x590] sm:$0xff]  ;;  %v2479_v37 = vld [vmem:[%s4073_s1 + $0x598] sm:$0xff]  ;;  %v2452_v40 = vld [vmem:[%s3252_s26 + $0x440] sm:$0xff] }
  0xe4   : > { %1302 = vmatmul.mubr.f32.gmra.mrb[38].mxu0 %v2274_v44  ;;  %2351 = vmatprep.mubr.msk.f32.mxu1 %vm551_vm0, %v2319_v45  ;;  %v2400_v44 = vld [vmem:[%s3252_s26 + $0x380] sm:$0xff]  ;;  %v2462_v45 = vld [vmem:[%s4073_s1 + $0x510] sm:$0xff]  ;;  %v2447_v41 = vld [vmem:[%s3252_s26 + $0x418] sm:$0xff] }
  0xe5   : > { %2684 = vmatpush1.bf16.msra.mxu0 %v2683_v46  ;;  %1477 = vmatmul.mubr.f32.gmra.mrb[38].mxu1 %v2318_v48  ;;  %v2463_v46 = vld [vmem:[%s4073_s1 + $0x518] sm:$0xff]  ;;  %v2358_v48 = vld [vmem:[%s3252_s26 + $0x310] sm:$0xff] }
  0xe6   : > { %2714 = vmatpush1.bf16.msra.mxu1 %v2713_v47  ;;  %2308 = vmatprep.mubr.msk.f32.mxu0 %vm551_vm0, %v2277_v51  ;;  %v2359_v47 = vld [vmem:[%s3252_s26 + $0x318] sm:$0xff]  ;;  %v2737_v50 = vpack.c.bf16 %v2463_v46, %v2462_v45  ;;  %v2402_v51 = vld [vmem:[%s3252_s26 + $0x390] sm:$0xff]  ;;  %v2457_v45 = vld [vmem:[%s3252_s26 + $0x468] sm:$0xff] }
  0xe7   : > { %2685 = vmatprep.subr.bf16.mxu0 %v2834_v19  ;;  %2715 = vmatprep.subr.bf16.mxu1 %v2834_v19  ;;  %v2448_v46 = vld [vmem:[%s3252_s26 + $0x420] sm:$0xff] }
  0xe8   : > { %1307 = vmatmul.mubr.f32.gmra.mrb[40].mxu0 %v2276_v54  ;;  %2352 = vmatprep.mubr.msk.f32.mxu1 %vm551_vm0, %v2321_v55  ;;  %v2361_v54 = vld [vmem:[%s3252_s26 + $0x328] sm:$0xff]  ;;  %v2360_v55 = vld [vmem:[%s3252_s26 + $0x320] sm:$0xff] }
  0xe9   : > { %2687 = vmatpush1.bf16.msra.mxu0 %v2686_v56  ;;  %1482 = vmatmul.mubr.f32.gmra.mrb[40].mxu1 %v2320_v58  ;;  %v2405_v56 = vld [vmem:[%s3252_s26 + $0x3a8] sm:$0xff]  ;;  %v2404_v58 = vld [vmem:[%s3252_s26 + $0x3a0] sm:$0xff] }
  0xea   : > { %2717 = vmatpush1.bf16.msra.mxu1 %v2716_v57  ;;  %2309 = vmatprep.mubr.msk.f32.mxu0 %vm551_vm0, %v2279_v61  ;;  %v2740_v57 = vpack.c.bf16 %v2465_v53, %v2464_v52  ;;  %v2363_v61 = vld [vmem:[%s3252_s26 + $0x338] sm:$0xff] }
  0xeb   : > { %2688 = vmatprep.subr.bf16.mxu0 %v2834_v19  ;;  %2718 = vmatprep.subr.bf16.mxu1 %v2834_v19 }
  0xec   : > { %1312 = vmatmul.mubr.f32.gmra.mrb[42].mxu0 %v2278_v0  ;;  %2353 = vmatprep.mubr.msk.f32.mxu1 %vm551_vm0, %v2323_v1  ;;  %v2743_v0 = vpack.c.bf16 %v2467_v60, %v2466_v59  ;;  %v2406_v1 = vld [vmem:[%s3252_s26 + $0x3b0] sm:$0xff] }
  0xed   : > { %2690 = vmatpush1.bf16.msra.mxu0 %v2689_v2  ;;  %1487 = vmatmul.mubr.f32.gmra.mrb[42].mxu1 %v2322_v4  ;;  %v2468_v2 = vld [vmem:[%s4073_s1 + $0x540] sm:$0xff]  ;;  %v2365_v4 = vld [vmem:[%s3252_s26 + $0x348] sm:$0xff] }
  0xee   : > { %2720 = vmatpush1.bf16.msra.mxu1 %v2719_v3  ;;  %2310 = vmatprep.mubr.msk.f32.mxu0 %vm551_vm0, %v2281_v7  ;;  %v2469_v3 = vld [vmem:[%s4073_s1 + $0x548] sm:$0xff] }
  0xef   : > { %2691 = vmatprep.subr.bf16.mxu0 %v2834_v19  ;;  %2721 = vmatprep.subr.bf16.mxu1 %v2834_v19  ;;  %v2746_v7 = vpack.c.bf16 %v2469_v3, %v2468_v2 }
  0xf0   : > { %1317 = vmatmul.mubr.f32.gmra.mrb[44].mxu0 %v2280_v10  ;;  %2354 = vmatprep.mubr.msk.f32.mxu1 %vm551_vm0, %v2325_v11  ;;  %v2471_v10 = vld [vmem:[%s4073_s1 + $0x558] sm:$0xff] }
  0xf1   : > { %2693 = vmatpush1.bf16.msra.mxu0 %v2692_v12  ;;  %1492 = vmatmul.mubr.f32.gmra.mrb[44].mxu1 %v2324_v14  ;;  %v2367_v11 = vld [vmem:[%s3252_s26 + $0x358] sm:$0xff]  ;;  %v2366_v12 = vld [vmem:[%s3252_s26 + $0x350] sm:$0xff]  ;;  %v2749_v14 = vpack.c.bf16 %v2471_v10, %v2470_v9 }
  0xf2   : > { %2723 = vmatpush1.bf16.msra.mxu1 %v2722_v13  ;;  %2311 = vmatprep.mubr.msk.f32.mxu0 %vm551_vm0, %v2283_v17  ;;  %v2411_v13 = vld [vmem:[%s3252_s26 + $0x3d8] sm:$0xff]  ;;  %v2473_v17 = vld [vmem:[%s4073_s1 + $0x568] sm:$0xff] }
  0xf3   : > { %2694 = vmatprep.subr.bf16.mxu0 %v2834_v19  ;;  %2724 = vmatprep.subr.bf16.mxu1 %v2834_v19 }
  0xf4   : > { %1322 = vmatmul.mubr.f32.gmra.mrb[46].mxu0 %v2282_v21  ;;  %2355 = vmatprep.mubr.msk.f32.mxu1 %vm551_vm0, %v2327_v22  ;;  %v2413_v21 = vld [vmem:[%s3252_s26 + $0x3e8] sm:$0xff]  ;;  %v2752_v22 = vpack.c.bf16 %v2473_v17, %v2472_v16 }
  0xf5   : > { %2696 = vmatpush1.bf16.msra.mxu0 %v2695_v23  ;;  %1497 = vmatmul.mubr.f32.gmra.mrb[46].mxu1 %v2326_v25  ;;  %v2412_v23 = vld [vmem:[%s3252_s26 + $0x3e0] sm:$0xff]  ;;  %v2475_v25 = vld [vmem:[%s4073_s1 + $0x578] sm:$0xff] }
  0xf6   : > { %2726 = vmatpush1.bf16.msra.mxu1 %v2725_v24  ;;  %2697 = vmatprep.subr.bf16.mxu0 %v2834_v19  ;;  %v2474_v24 = vld [vmem:[%s4073_s1 + $0x570] sm:$0xff] }
  0xf7   : > { %2727 = vmatprep.subr.bf16.mxu1 %v2834_v19  ;;  %2392 = vmatprep.mubr.msk.f32.mxu0 %vm551_vm0, %v2357_v30  ;;  %v2755_v29 = vpack.c.bf16 %v2475_v25, %v2474_v24  ;;  %v2414_v30 = vld [vmem:[%s3252_s26 + $0x3f0] sm:$0xff] }
  0xf8   : > { %2436 = vmatprep.mubr.msk.f32.mxu1 %vm551_vm0, %v2401_v32  ;;  %v2477_v32 = vld [vmem:[%s4073_s1 + $0x588] sm:$0xff] }
  0xf9   : > { %2699 = vmatpush1.bf16.msra.mxu0 %v2698_v31  ;;  %v2476_v31 = vld [vmem:[%s4073_s1 + $0x580] sm:$0xff] }
  0xfa   : > { %2729 = vmatpush1.bf16.msra.mxu1 %v2728_v33  ;;  %2700 = vmatprep.subr.bf16.mxu0 %v2834_v19  ;;  %v2445_v33 = vld [vmem:[%s3252_s26 + $0x408] sm:$0xff]  ;;  %v2758_v34 = vpack.c.bf16 %v2477_v32, %v2476_v31 }
  0xfb   : > { %2730 = vmatprep.subr.bf16.mxu1 %v2834_v19 }
  0xfd   : > { %2702 = vmatpush1.bf16.msra.mxu0 %v2701_v38  ;;  %v2761_v38 = vpack.c.bf16 %v2479_v37, %v2478_v36 }
  0xfe   : > { %2732 = vmatpush1.bf16.msra.mxu1 %v2731_v39  ;;  %2733 = vmatprep.subr.bf16.mxu0 %v2834_v19  ;;  %v2444_v39 = vld [vmem:[%s3252_s26 + $0x400] sm:$0xff] }
  0xff   : > { %2763 = vmatprep.subr.bf16.mxu1 %v2834_v19 }
 0x100   : > { %1637 = vmatmul.mubr.f32.vlgmr.msra.gmra.mrb[48].mxu0 %v2356_v42  ;;  %v2455_v42 = vld [vmem:[%s3252_s26 + $0x458] sm:$0xff] }
 0x101   : > { %1812 = vmatmul.mubr.f32.vlgmr.msra.gmra.mrb[48].mxu1 %v2400_v44  ;;  %2735 = vmatpush1.bf16.msra.mxu0 %v2734_v43  ;;  %v2454_v44 = vld [vmem:[%s3252_s26 + $0x450] sm:$0xff] }
 0x102   : > { %2773 = vmatpush1.bf16.msra.mxu1 %v2734_v43  ;;  %2393 = vmatprep.mubr.msk.f32.mxu0 %vm551_vm0, %v2359_v47  ;;  %v2446_v43 = vld [vmem:[%s3252_s26 + $0x410] sm:$0xff]  ;;  %v2456_v47 = vld [vmem:[%s3252_s26 + $0x460] sm:$0xff] }
 0x103   : > { %2736 = vmatprep.subr.bf16.mxu0 %v2834_v19  ;;  %2764 = vmatprep.subr.bf16.mxu1 %v2834_v19 }
 0x104   : > { %1642 = vmatmul.mubr.f32.gmra.mrb[50].mxu0 %v2358_v48  ;;  %2437 = vmatprep.mubr.msk.f32.mxu1 %vm551_vm0, %v2403_v49  ;;  %v2451_v48 = vld [vmem:[%s3252_s26 + $0x438] sm:$0xff] }
 0x105   : > { %2738 = vmatpush1.bf16.msra.mxu0 %v2737_v50  ;;  %1817 = vmatmul.mubr.f32.gmra.mrb[50].mxu1 %v2402_v51  ;;  %v2459_v49 = vld [vmem:[%s3252_s26 + $0x478] sm:$0xff]  ;;  %v2458_v51 = vld [vmem:[%s3252_s26 + $0x470] sm:$0xff] }
 0x106   : > { %2774 = vmatpush1.bf16.msra.mxu1 %v2737_v50  ;;  %2394 = vmatprep.mubr.msk.f32.mxu0 %vm551_vm0, %v2361_v54  ;;  %v2450_v50 = vld [vmem:[%s3252_s26 + $0x430] sm:$0xff] }
 0x107   : > { %2739 = vmatprep.subr.bf16.mxu0 %v2834_v19  ;;  %2765 = vmatprep.subr.bf16.mxu1 %v2834_v19 }
 0x108   : > { %1647 = vmatmul.mubr.f32.gmra.mrb[52].mxu0 %v2360_v55  ;;  %2438 = vmatprep.mubr.msk.f32.mxu1 %vm551_vm0, %v2405_v56 }
 0x109   : > { %2741 = vmatpush1.bf16.msra.mxu0 %v2740_v57  ;;  %1822 = vmatmul.mubr.f32.gmra.mrb[52].mxu1 %v2404_v58 }
 0x10a   : > { %2775 = vmatpush1.bf16.msra.mxu1 %v2740_v57  ;;  %2395 = vmatprep.mubr.msk.f32.mxu0 %vm551_vm0, %v2363_v61 }
 0x10b   : > { %2742 = vmatprep.subr.bf16.mxu0 %v2834_v19  ;;  %2766 = vmatprep.subr.bf16.mxu1 %v2834_v19 }
 0x10c   : > { %1652 = vmatmul.mubr.f32.gmra.mrb[54].mxu0 %v2362_v62  ;;  %2439 = vmatprep.mubr.msk.f32.mxu1 %vm551_vm0, %v2407_v63 }
 0x10d   : > { %2744 = vmatpush1.bf16.msra.mxu0 %v2743_v0  ;;  %1827 = vmatmul.mubr.f32.gmra.mrb[54].mxu1 %v2406_v1 }
 0x10e   : > { %2776 = vmatpush1.bf16.msra.mxu1 %v2743_v0  ;;  %2396 = vmatprep.mubr.msk.f32.mxu0 %vm551_vm0, %v2365_v4 }
 0x10f   : > { %2745 = vmatprep.subr.bf16.mxu0 %v2834_v19  ;;  %2767 = vmatprep.subr.bf16.mxu1 %v2834_v19 }
 0x110   : > { %1657 = vmatmul.mubr.f32.gmra.mrb[56].mxu0 %v2364_v5  ;;  %2440 = vmatprep.mubr.msk.f32.mxu1 %vm551_vm0, %v2409_v6 }
 0x111   : > { %2747 = vmatpush1.bf16.msra.mxu0 %v2746_v7  ;;  %1832 = vmatmul.mubr.f32.gmra.mrb[56].mxu1 %v2408_v8 }
 0x112   : > { %2777 = vmatpush1.bf16.msra.mxu1 %v2746_v7  ;;  %2397 = vmatprep.mubr.msk.f32.mxu0 %vm551_vm0, %v2367_v11 }
 0x113   : > { %2748 = vmatprep.subr.bf16.mxu0 %v2834_v19  ;;  %2768 = vmatprep.subr.bf16.mxu1 %v2834_v19 }
 0x114   : > { %1662 = vmatmul.mubr.f32.gmra.mrb[58].mxu0 %v2366_v12  ;;  %2441 = vmatprep.mubr.msk.f32.mxu1 %vm551_vm0, %v2411_v13 }
 0x115   : > { %2750 = vmatpush1.bf16.msra.mxu0 %v2749_v14  ;;  %1837 = vmatmul.mubr.f32.gmra.mrb[58].mxu1 %v2410_v15 }
 0x116   : > { %2778 = vmatpush1.bf16.msra.mxu1 %v2749_v14  ;;  %2398 = vmatprep.mubr.msk.f32.mxu0 %vm551_vm0, %v2369_v18 }
 0x117   : > { %2751 = vmatprep.subr.bf16.mxu0 %v2834_v19  ;;  %2769 = vmatprep.subr.bf16.mxu1 %v2834_v19 }
 0x118   : > { %1667 = vmatmul.mubr.f32.gmra.mrb[60].mxu0 %v2368_v20  ;;  %2442 = vmatprep.mubr.msk.f32.mxu1 %vm551_vm0, %v2413_v21 }
 0x119   : > { %2753 = vmatpush1.bf16.msra.mxu0 %v2752_v22  ;;  %1842 = vmatmul.mubr.f32.gmra.mrb[60].mxu1 %v2412_v23 }
 0x11a   : > { %2779 = vmatpush1.bf16.msra.mxu1 %v2752_v22  ;;  %2399 = vmatprep.mubr.msk.f32.mxu0 %vm551_vm0, %v2371_v26 }
 0x11b   : > { %2754 = vmatprep.subr.bf16.mxu0 %v2834_v19  ;;  %2770 = vmatprep.subr.bf16.mxu1 %v2834_v19 }
 0x11c   : > { %1672 = vmatmul.mubr.f32.gmra.mrb[62].mxu0 %v2370_v27  ;;  %2443 = vmatprep.mubr.msk.f32.mxu1 %vm551_vm0, %v2415_v28 }
 0x11d   : > { %2756 = vmatpush1.bf16.msra.mxu0 %v2755_v29  ;;  %1847 = vmatmul.mubr.f32.gmra.mrb[62].mxu1 %v2414_v30 }
 0x11e   : > { %2780 = vmatpush1.bf16.msra.mxu1 %v2755_v29  ;;  %2757 = vmatprep.subr.bf16.mxu0 %v2834_v19 }
 0x11f   : > { %2771 = vmatprep.subr.bf16.mxu1 %v2834_v19  ;;  %2480 = vmatprep.mubr.msk.f32.mxu0 %vm551_vm0, %v2445_v33 }
 0x120   : > { %2484 = vmatprep.mubr.msk.f32.mxu1 %vm551_vm0, %v2453_v35 }
 0x121   : > { %2759 = vmatpush1.bf16.msra.mxu0 %v2758_v34 }
 0x122   : > { %2781 = vmatpush1.bf16.msra.mxu1 %v2758_v34  ;;  %2760 = vmatprep.subr.bf16.mxu0 %v2834_v19 }
 0x123   : > { %2772 = vmatprep.subr.bf16.mxu1 %v2834_v19  ;;  %v2449_v19 = vld [vmem:[%s3252_s26 + $0x428] sm:$0xff]  ;;  %s2492_s26 = sshll.u32 %s4080_s15, 6 }
 0x124   : > { %s4052_s8 = scalar_lea.vmem %s4075_s3, %s2492_s26 }
 0x125   : > { %2762 = vmatpush1.bf16.msra.mxu0 %v2761_v38 }
 0x126   : > { %2782 = vmatpush1.bf16.msra.mxu1 %v2761_v38 }
 0x128   : > { %1987 = vmatmul.mubr.f32.vlgmr.msra.gmra.mrb[64].mxu0 %v2444_v39 }
 0x129   : > { %2007 = vmatmul.mubr.f32.vlgmr.msra.gmra.mrb[64].mxu1 %v2452_v40  ;;  %2481 = vmatprep.mubr.msk.f32.mxu0 %vm551_vm0, %v2447_v41 }
 0x12a   : > { %2485 = vmatprep.mubr.msk.f32.mxu1 %vm551_vm0, %v2455_v42 }
 0x12c   : > { %1992 = vmatmul.mubr.f32.gmra.mrb[66].mxu0 %v2446_v43 }
 0x12d   : > { %2012 = vmatmul.mubr.f32.gmra.mrb[66].mxu1 %v2454_v44  ;;  %2482 = vmatprep.mubr.msk.f32.mxu0 %vm551_vm0, %v2449_v19 }
 0x12e   : > { %2486 = vmatprep.mubr.msk.f32.mxu1 %vm551_vm0, %v2457_v45 }
 0x130   : > { %1997 = vmatmul.mubr.f32.gmra.mrb[68].mxu0 %v2448_v46 }
 0x131   : > { %2017 = vmatmul.mubr.f32.gmra.mrb[68].mxu1 %v2456_v47  ;;  %2483 = vmatprep.mubr.msk.f32.mxu0 %vm551_vm0, %v2451_v48 }
 0x132   : > { %2487 = vmatprep.mubr.msk.f32.mxu1 %vm551_vm0, %v2459_v49 }
 0x134   : > { %2002 = vmatmul.mubr.f32.gmra.mrb[70].mxu0 %v2450_v50 }
 0x135   : > { %2022 = vmatmul.mubr.f32.gmra.mrb[70].mxu1 %v2458_v51 }
 0x15b   : > { %v642_v52 = vpop.f32.mrb[0].mxu0 }
 0x15c   : > { %v771_v53 = vpop.f32.mrb[0].mxu1  ;;  %v644_v54 = vpop.f32.mrb[1].mxu0 }
 0x15d   : > { %v772_v55 = vadd.f32 %v771_v53, %v642_v52  ;;  %v773_v56 = vpop.f32.mrb[1].mxu1 }
 0x15f   : > { %v647_v57 = vpop.f32.mrb[2].mxu0 }
 0x160   : > { %v776_v58 = vpop.f32.mrb[2].mxu1  ;;  %v649_v59 = vpop.f32.mrb[3].mxu0 }
 0x161   : > { %v777_v60 = vadd.f32 %v776_v58, %v647_v57  ;;  %v778_v61 = vpop.f32.mrb[3].mxu1 }
 0x163   : > { %v652_v62 = vpop.f32.mrb[4].mxu0 }
 0x164   : > { %v781_v63 = vpop.f32.mrb[4].mxu1  ;;  %v654_v0 = vpop.f32.mrb[5].mxu0 }
 0x165   : > { %v782_v1 = vadd.f32 %v781_v63, %v652_v62  ;;  %v783_v2 = vpop.f32.mrb[5].mxu1 }
 0x167   : > { %v657_v3 = vpop.f32.mrb[6].mxu0 }
 0x168   : > { %v786_v4 = vpop.f32.mrb[6].mxu1  ;;  %v659_v5 = vpop.f32.mrb[7].mxu0 }
 0x169   : > { %v787_v6 = vadd.f32 %v786_v4, %v657_v3  ;;  %v788_v7 = vpop.f32.mrb[7].mxu1 }
 0x16b   : > { %v662_v8 = vpop.f32.mrb[8].mxu0 }
 0x16c   : > { %v791_v9 = vpop.f32.mrb[8].mxu1  ;;  %v664_v10 = vpop.f32.mrb[9].mxu0 }
 0x16d   : > { %v792_v11 = vadd.f32 %v791_v9, %v662_v8  ;;  %v793_v12 = vpop.f32.mrb[9].mxu1 }
 0x16f   : > { %v667_v13 = vpop.f32.mrb[10].mxu0 }
 0x170   : > { %v796_v14 = vpop.f32.mrb[10].mxu1  ;;  %v669_v15 = vpop.f32.mrb[11].mxu0 }
 0x171   : > { %v797_v16 = vadd.f32 %v796_v14, %v667_v13  ;;  %v798_v17 = vpop.f32.mrb[11].mxu1 }
 0x173   : > { %v672_v18 = vpop.f32.mrb[12].mxu0 }
 0x174   : > { %v801_v20 = vpop.f32.mrb[12].mxu1  ;;  %v674_v21 = vpop.f32.mrb[13].mxu0 }
 0x175   : > { %v802_v22 = vadd.f32 %v801_v20, %v672_v18  ;;  %v803_v23 = vpop.f32.mrb[13].mxu1 }
 0x177   : > { %v677_v24 = vpop.f32.mrb[14].mxu0 }
 0x178   : > { %v806_v25 = vpop.f32.mrb[14].mxu1  ;;  %v679_v26 = vpop.f32.mrb[15].mxu0 }
 0x179   : > { %v807_v27 = vadd.f32 %v806_v25, %v677_v24  ;;  %v808_v28 = vpop.f32.mrb[15].mxu1 }
 0x183   : > { %v938_v29 = vpop.f32.mrb[16].mxu0 }
 0x184   : > { %v977_v30 = vadd.f32 %v938_v29, %v772_v55  ;;  %v1113_v31 = vpop.f32.mrb[16].mxu1  ;;  %v940_v32 = vpop.f32.mrb[17].mxu0 }
 0x185   : > { %v1115_v33 = vpop.f32.mrb[17].mxu1 }
 0x186   : > { %v1152_v34 = vadd.f32 %v1113_v31, %v977_v30 }
 0x187   : > { %v943_v35 = vpop.f32.mrb[18].mxu0 }
 0x188   : > { %v978_v36 = vadd.f32 %v943_v35, %v777_v60  ;;  %v1118_v37 = vpop.f32.mrb[18].mxu1  ;;  %v945_v38 = vpop.f32.mrb[19].mxu0 }
 0x189   : > { %v1120_v39 = vpop.f32.mrb[19].mxu1 }
 0x18a   : > { %v1153_v40 = vadd.f32 %v1118_v37, %v978_v36 }
 0x18b   : > { %v948_v41 = vpop.f32.mrb[20].mxu0 }
 0x18c   : > { %v979_v42 = vadd.f32 %v948_v41, %v782_v1  ;;  %v1123_v43 = vpop.f32.mrb[20].mxu1  ;;  %v950_v44 = vpop.f32.mrb[21].mxu0 }
 0x18d   : > { %v1125_v19 = vpop.f32.mrb[21].mxu1 }
 0x18e   : > { %v1154_v45 = vadd.f32 %v1123_v43, %v979_v42 }
 0x18f   : > { %v953_v46 = vpop.f32.mrb[22].mxu0 }
 0x190   : > { %v980_v47 = vadd.f32 %v953_v46, %v787_v6  ;;  %v1128_v48 = vpop.f32.mrb[22].mxu1  ;;  %v955_v49 = vpop.f32.mrb[23].mxu0 }
 0x191   : > { %v1130_v50 = vpop.f32.mrb[23].mxu1 }
 0x192   : > { %v1155_v51 = vadd.f32 %v1128_v48, %v980_v47 }
 0x193   : > { %v958_v52 = vpop.f32.mrb[24].mxu0 }
 0x194   : > { %v981_v53 = vadd.f32 %v958_v52, %v792_v11  ;;  %v1133_v54 = vpop.f32.mrb[24].mxu1  ;;  %v960_v55 = vpop.f32.mrb[25].mxu0 }
 0x195   : > { %v1135_v56 = vpop.f32.mrb[25].mxu1 }
 0x196   : > { %v1156_v57 = vadd.f32 %v1133_v54, %v981_v53 }
 0x197   : > { %v963_v58 = vpop.f32.mrb[26].mxu0 }
 0x198   : > { %v982_v59 = vadd.f32 %v963_v58, %v797_v16  ;;  %v1138_v60 = vpop.f32.mrb[26].mxu1  ;;  %v965_v61 = vpop.f32.mrb[27].mxu0 }
 0x199   : > { %v1140_v62 = vpop.f32.mrb[27].mxu1 }
 0x19a   : > { %v1157_v63 = vadd.f32 %v1138_v60, %v982_v59 }
 0x19b   : > { %v968_v0 = vpop.f32.mrb[28].mxu0 }
 0x19c   : > { %v983_v1 = vadd.f32 %v968_v0, %v802_v22  ;;  %v1143_v2 = vpop.f32.mrb[28].mxu1  ;;  %v970_v3 = vpop.f32.mrb[29].mxu0 }
 0x19d   : > { %v1145_v4 = vpop.f32.mrb[29].mxu1 }
 0x19e   : > { %v1158_v5 = vadd.f32 %v1143_v2, %v983_v1 }
 0x19f   : > { %v973_v6 = vpop.f32.mrb[30].mxu0 }
 0x1a0   : > { %v984_v7 = vadd.f32 %v973_v6, %v807_v27  ;;  %v1148_v8 = vpop.f32.mrb[30].mxu1  ;;  %v975_v9 = vpop.f32.mrb[31].mxu0 }
 0x1a1   : > { %v1150_v10 = vpop.f32.mrb[31].mxu1 }
 0x1a2   : > { %v1159_v11 = vadd.f32 %v1148_v8, %v984_v7 }
 0x1ab   : > { %v1288_v12 = vpop.f32.mrb[32].mxu0 }
 0x1ac   : > { %v1327_v13 = vadd.f32 %v1288_v12, %v1152_v34  ;;  %v1463_v14 = vpop.f32.mrb[32].mxu1  ;;  %v1290_v15 = vpop.f32.mrb[33].mxu0 }
 0x1ad   : > { %v1465_v16 = vpop.f32.mrb[33].mxu1 }
 0x1ae   : > { %v1502_v17 = vadd.f32 %v1463_v14, %v1327_v13 }
 0x1af   : > { %v1293_v18 = vpop.f32.mrb[34].mxu0 }
 0x1b0   : > { %v1328_v20 = vadd.f32 %v1293_v18, %v1153_v40  ;;  %v1468_v21 = vpop.f32.mrb[34].mxu1  ;;  %v1295_v22 = vpop.f32.mrb[35].mxu0 }
 0x1b1   : > { %v1470_v23 = vpop.f32.mrb[35].mxu1 }
 0x1b2   : > { %v1503_v24 = vadd.f32 %v1468_v21, %v1328_v20 }
 0x1b3   : > { %v1298_v25 = vpop.f32.mrb[36].mxu0 }
 0x1b4   : > { %v1329_v26 = vadd.f32 %v1298_v25, %v1154_v45  ;;  %v1473_v28 = vpop.f32.mrb[36].mxu1  ;;  %v1300_v27 = vpop.f32.mrb[37].mxu0 }
 0x1b5   : > { %v1475_v29 = vpop.f32.mrb[37].mxu1 }
 0x1b6   : > { %v1504_v30 = vadd.f32 %v1473_v28, %v1329_v26 }
 0x1b7   : > { %v1303_v31 = vpop.f32.mrb[38].mxu0 }
 0x1b8   : > { %v1330_v32 = vadd.f32 %v1303_v31, %v1155_v51  ;;  %v1478_v33 = vpop.f32.mrb[38].mxu1  ;;  %v1305_v34 = vpop.f32.mrb[39].mxu0 }
 0x1b9   : > { %v1480_v35 = vpop.f32.mrb[39].mxu1 }
 0x1ba   : > { %v1505_v36 = vadd.f32 %v1478_v33, %v1330_v32 }
 0x1bb   : > { %v1308_v37 = vpop.f32.mrb[40].mxu0 }
 0x1bc   : > { %v1331_v38 = vadd.f32 %v1308_v37, %v1156_v57  ;;  %v1483_v39 = vpop.f32.mrb[40].mxu1  ;;  %v1310_v40 = vpop.f32.mrb[41].mxu0 }
 0x1bd   : > { %v1485_v41 = vpop.f32.mrb[41].mxu1 }
 0x1be   : > { %v1506_v42 = vadd.f32 %v1483_v39, %v1331_v38 }
 0x1bf   : > { %v1313_v43 = vpop.f32.mrb[42].mxu0 }
 0x1c0   : > { %v1332_v44 = vadd.f32 %v1313_v43, %v1157_v63  ;;  %v1488_v19 = vpop.f32.mrb[42].mxu1  ;;  %v1315_v45 = vpop.f32.mrb[43].mxu0 }
 0x1c1   : > { %v1490_v46 = vpop.f32.mrb[43].mxu1  ;;  %v2488_v45 = vld [vmem:[%s4074_s2] ss:$0 sm:$0xff] }
 0x1c2   : > { %v1507_v47 = vadd.f32 %v1488_v19, %v1332_v44 }
 0x1c3   : > { %v1318_v48 = vpop.f32.mrb[44].mxu0 }
 0x1c4   : > { %v1333_v49 = vadd.f32 %v1318_v48, %v1158_v5  ;;  %v1493_v50 = vpop.f32.mrb[44].mxu1  ;;  %v1320_v51 = vpop.f32.mrb[45].mxu0 }
 0x1c5   : > { %v1495_v52 = vpop.f32.mrb[45].mxu1 }
 0x1c6   : > { %v1508_v53 = vadd.f32 %v1493_v50, %v1333_v49 }
 0x1c7   : > { %v1323_v54 = vpop.f32.mrb[46].mxu0 }
 0x1c8   : > { %v1334_v55 = vadd.f32 %v1323_v54, %v1159_v11  ;;  %v1498_v56 = vpop.f32.mrb[46].mxu1  ;;  %v1325_v57 = vpop.f32.mrb[47].mxu0 }
 0x1c9   : > { %v1500_v58 = vpop.f32.mrb[47].mxu1 }
 0x1ca   : > { %v1509_v59 = vadd.f32 %v1498_v56, %v1334_v55 }
 0x1d3   : > { %v1638_v60 = vpop.f32.mrb[48].mxu0 }
 0x1d4   : > { %v1677_v61 = vadd.f32 %v1638_v60, %v1502_v17  ;;  %v1813_v62 = vpop.f32.mrb[48].mxu1  ;;  %v1640_v63 = vpop.f32.mrb[49].mxu0 }
 0x1d5   : > { %v1815_v0 = vpop.f32.mrb[49].mxu1 }
 0x1d6   : > { %v1852_v1 = vadd.f32 %v1813_v62, %v1677_v61 }
 0x1d7   : > { %v1643_v2 = vpop.f32.mrb[50].mxu0 }
 0x1d8   : > { %v1678_v3 = vadd.f32 %v1643_v2, %v1503_v24  ;;  %v1818_v4 = vpop.f32.mrb[50].mxu1  ;;  %v1645_v5 = vpop.f32.mrb[51].mxu0 }
 0x1d9   : > { %v1820_v6 = vpop.f32.mrb[51].mxu1 }
 0x1da   : > { %v1853_v7 = vadd.f32 %v1818_v4, %v1678_v3 }
 0x1db   : > { %v1648_v8 = vpop.f32.mrb[52].mxu0 }
 0x1dc   : > { %v1679_v9 = vadd.f32 %v1648_v8, %v1504_v30  ;;  %v1823_v10 = vpop.f32.mrb[52].mxu1  ;;  %v1650_v11 = vpop.f32.mrb[53].mxu0 }
 0x1dd   : > { %v1825_v12 = vpop.f32.mrb[53].mxu1 }
 0x1de   : > { %v1854_v13 = vadd.f32 %v1823_v10, %v1679_v9 }
 0x1df   : > { %v1653_v14 = vpop.f32.mrb[54].mxu0 }
 0x1e0   : > { %v1680_v15 = vadd.f32 %v1653_v14, %v1505_v36  ;;  %v1828_v16 = vpop.f32.mrb[54].mxu1  ;;  %v1655_v17 = vpop.f32.mrb[55].mxu0 }
 0x1e1   : > { %v1830_v18 = vpop.f32.mrb[55].mxu1 }
 0x1e2   : > { %v1855_v20 = vadd.f32 %v1828_v16, %v1680_v15 }
 0x1e3   : > { %v1658_v21 = vpop.f32.mrb[56].mxu0 }
 0x1e4   : > { %v1681_v22 = vadd.f32 %v1658_v21, %v1506_v42  ;;  %v1833_v23 = vpop.f32.mrb[56].mxu1  ;;  %v1660_v24 = vpop.f32.mrb[57].mxu0 }
 0x1e5   : > { %v1835_v25 = vpop.f32.mrb[57].mxu1 }
 0x1e6   : > { %v1856_v26 = vadd.f32 %v1833_v23, %v1681_v22 }
 0x1e7   : > { %v1663_v28 = vpop.f32.mrb[58].mxu0 }
 0x1e8   : > { %v1682_v27 = vadd.f32 %v1663_v28, %v1507_v47  ;;  %v1838_v29 = vpop.f32.mrb[58].mxu1  ;;  %v1665_v30 = vpop.f32.mrb[59].mxu0 }
 0x1e9   : > { %v1840_v31 = vpop.f32.mrb[59].mxu1 }
 0x1ea   : > { %v1857_v32 = vadd.f32 %v1838_v29, %v1682_v27 }
 0x1eb   : > { %v1668_v33 = vpop.f32.mrb[60].mxu0 }
 0x1ec   : > { %v1683_v34 = vadd.f32 %v1668_v33, %v1508_v53  ;;  %v1843_v35 = vpop.f32.mrb[60].mxu1  ;;  %v1670_v36 = vpop.f32.mrb[61].mxu0 }
 0x1ed   : > { %v1845_v37 = vpop.f32.mrb[61].mxu1 }
 0x1ee   : > { %v1858_v38 = vadd.f32 %v1843_v35, %v1683_v34 }
 0x1ef   : > { %v1673_v39 = vpop.f32.mrb[62].mxu0 }
 0x1f0   : > { %v1684_v40 = vadd.f32 %v1673_v39, %v1509_v59  ;;  %v1848_v41 = vpop.f32.mrb[62].mxu1  ;;  %v1675_v42 = vpop.f32.mrb[63].mxu0 }
 0x1f1   : > { %v1850_v43 = vpop.f32.mrb[63].mxu1 }
 0x1f2   : > { %v1859_v44 = vadd.f32 %v1848_v41, %v1684_v40 }
 0x1fb   : > { %v1988_v19 = vpop.f32.mrb[64].mxu0 }
 0x1fc   : > { %v2027_v46 = vadd.f32 %v1988_v19, %v1852_v1  ;;  %v2008_v47 = vpop.f32.mrb[64].mxu1  ;;  %v1990_v48 = vpop.f32.mrb[65].mxu0 }
 0x1fd   : > { %v2031_v49 = vadd.f32 %v2008_v47, %v1856_v26  ;;  %v2010_v50 = vpop.f32.mrb[65].mxu1 }
 0x1fe   : > { %v2042_v51 = vadd.f32 %v2488_v45, %v2027_v46 }
 0x1ff   : > { %v2046_v52 = vadd.f32 %v2488_v45, %v2031_v49  ;;  %v1993_v53 = vpop.f32.mrb[66].mxu0 }
 0x200   : > { %2050 = vst [vmem:[%s4052_s8] sm:$0xff] %v2042_v51  ;;  %v2028_v54 = vadd.f32 %v1993_v53, %v1853_v7  ;;  %v2013_v55 = vpop.f32.mrb[66].mxu1  ;;  %v1995_v56 = vpop.f32.mrb[67].mxu0 }
 0x201   : > { %2054 = vst [vmem:[%s4052_s8 + $0x20] sm:$0xff] %v2046_v52  ;;  %v2032_v57 = vadd.f32 %v2013_v55, %v1857_v32  ;;  %v2015_v58 = vpop.f32.mrb[67].mxu1 }
 0x202   : > { %v2043_v59 = vadd.f32 %v2488_v45, %v2028_v54 }
 0x203   : > { %v2047_v60 = vadd.f32 %v2488_v45, %v2032_v57  ;;  %v1998_v61 = vpop.f32.mrb[68].mxu0 }
 0x204   : > { %2051 = vst [vmem:[%s4052_s8 + $0x8] sm:$0xff] %v2043_v59  ;;  %v2029_v62 = vadd.f32 %v1998_v61, %v1854_v13  ;;  %v2018_v63 = vpop.f32.mrb[68].mxu1  ;;  %v2000_v0 = vpop.f32.mrb[69].mxu0 }
 0x205   : > { %2055 = vst [vmem:[%s4052_s8 + $0x28] sm:$0xff] %v2047_v60  ;;  %v2033_v1 = vadd.f32 %v2018_v63, %v1858_v38  ;;  %v2020_v2 = vpop.f32.mrb[69].mxu1 }
 0x206   : > { %v2044_v3 = vadd.f32 %v2488_v45, %v2029_v62 }
 0x207   : > { %v2048_v4 = vadd.f32 %v2488_v45, %v2033_v1  ;;  %v2003_v5 = vpop.f32.mrb[70].mxu0 }
 0x208   : > { %2052 = vst [vmem:[%s4052_s8 + $0x10] sm:$0xff] %v2044_v3  ;;  %v2030_v6 = vadd.f32 %v2003_v5, %v1855_v20  ;;  %v2023_v7 = vpop.f32.mrb[70].mxu1  ;;  %v2005_v8 = vpop.f32.mrb[71].mxu0 }
 0x209   : > { %2056 = vst [vmem:[%s4052_s8 + $0x30] sm:$0xff] %v2048_v4  ;;  %v2034_v9 = vadd.f32 %v2023_v7, %v1859_v44  ;;  %v2025_v10 = vpop.f32.mrb[71].mxu1 }
 0x20a   : > { %v2045_v11 = vadd.f32 %v2488_v45, %v2030_v6 }
 0x20b   : > { %v2049_v12 = vadd.f32 %v2488_v45, %v2034_v9 }
 0x20c   : > { %2053 = vst [vmem:[%s4052_s8 + $0x18] sm:$0xff] %v2045_v11 }
 0x20d   : > { %2057 = vst [vmem:[%s4052_s8 + $0x38] sm:$0xff] %v2049_v12 }
 0x20e PF: > { %p10_p9 = scmp.ge.s32.totalorder %s2872_s16, 4   ;;  %s4076_s12 = smov %s2828_s13 }
 0x20f   : > { %s4077_s13 = smov %s2881_s19  ;;  %s4078_s14 = smov %s2872_s16 }
 0x210   :  { %12 = sbr.rel (!%p10_p9) target bundleno = 2 (0x2), region = 106 }

// kernel: dolg_forward.18
= control target key start
LH: loop header
LB: loop body
LE: loop exit
PB: predicated region body
PF: predicated region fallthrough
CT: control target
= control target key end

     0   :  { %s408_s6 = smov 0   ;;  %s495_s0 = inlined_call_operand.vmem [shape: f32[2,256,64], index: 0, kind: input, shape index: {}]   ;;  %s496_s1 = inlined_call_operand.vmem [shape: f32[2,1,64], index: 1, kind: output, shape index: {}]  }
   0x1 LB: > { %s368_s7 = sadd.s32 4294967295, %s396_s6   ;;  %p372_p0 = scmp.ge.s32.totalorder %s396_s6, 1  ;;  %s396_s6 = sphi %s408_s6, %s11_s6  }
   0x2   : > { %p87_p1 = scmp.lt.s32.totalorder %s396_s6, 3 }
   0x4   : > { %p88_p2 = pnand %p372_p0, %p87_p1 }
   0x5   : > { %p105_p3 = scmp.lt.s32.totalorder (!%p88_p2), %s368_s7, 1  ;;  %vm241_vm0 = vcmask (!%p88_p2), 523264   ;;  %vm319_vm1 = vcmask (!%p88_p2), 516096  }
   0x6   : > { %91 = sbr.rel (%p88_p2) target bundleno = 129 (0x81), region = 24 }
   0xd   : > { %s498_s7 = smov (!%p105_p3, %s368_s7), 1 }
   0xe   : > { %s377_s8 = sshll.u32 %s498_s7, 8  ;;  %s112_s14 = scalar_lea.vmem %s496_s1, %s498_s7 }
   0xf   : > { %s422_s11 = scalar_lea.vmem %s495_s0, %s377_s8 }
  0x10   : > { %v113_v0 = vld [vmem:[%s422_s11] sm:$0xff]  ;;  %v114_v1 = vld [vmem:[%s422_s11 + $0x8] sm:$0xff]  ;;  %v115_v4 = vld [vmem:[%s422_s11 + $0x10] sm:$0xff] }
  0x11   : > { %v145_v2 = vmax.f32 %v113_v0, 1e-06  ;;  %v146_v3 = vmax.f32 %v114_v1, 1e-06  ;;  %v116_v5 = vld [vmem:[%s422_s11 + $0x18] sm:$0xff]  ;;  %v117_v8 = vld [vmem:[%s422_s11 + $0x20] sm:$0xff] }
  0x12   : > { %v147_v9 = vmax.f32 %v115_v4, 1e-06  ;;  %v118_v10 = vld [vmem:[%s422_s11 + $0x28] sm:$0xff]  ;;  %v148_v11 = vmax.f32 %v116_v5, 1e-06  ;;  %v119_v15 = vld [vmem:[%s422_s11 + $0x30] sm:$0xff] }
  0x13   : > { %v177_v6 = vmul.f32 %v145_v2, %v145_v2  ;;  %v178_v7 = vmul.f32 %v146_v3, %v146_v3  ;;  %v149_v12 = vmax.f32 %v117_v8, 1e-06  ;;  %v150_v16 = vmax.f32 %v118_v10, 1e-06  ;;  %v120_v18 = vld [vmem:[%s422_s11 + $0x38] sm:$0xff]  ;;  %v121_v24 = vld [vmem:[%s422_s11 + $0x40] sm:$0xff] }
  0x14   : > { %v179_v17 = vmul.f32 %v147_v9, %v147_v9  ;;  %v180_v19 = vmul.f32 %v148_v11, %v148_v11  ;;  %v151_v20 = vmax.f32 %v119_v15, 1e-06  ;;  %v152_v25 = vmax.f32 %v120_v18, 1e-06  ;;  %v122_v28 = vld [vmem:[%s422_s11 + $0x48] sm:$0xff]  ;;  %v123_v34 = vld [vmem:[%s422_s11 + $0x50] sm:$0xff] }
  0x15   : > { %v209_v13 = vmul.f32 %v177_v6, %v145_v2  ;;  %v210_v14 = vmul.f32 %v178_v7, %v146_v3  ;;  %v181_v21 = vmul.f32 %v149_v12, %v149_v12  ;;  %v182_v26 = vmul.f32 %v150_v16, %v150_v16  ;;  %v124_v39 = vld [vmem:[%s422_s11 + $0x58] sm:$0xff]  ;;  %v125_v46 = vld [vmem:[%s422_s11 + $0x60] sm:$0xff]  ;;  %v126_v52 = vld [vmem:[%s422_s11 + $0x68] sm:$0xff] }
  0x16   : > { %v211_v27 = vmul.f32 %v179_v17, %v147_v9  ;;  %v212_v29 = vmul.f32 %v180_v19, %v148_v11  ;;  %v153_v31 = vmax.f32 %v121_v24, 1e-06  ;;  %v183_v32 = vmul.f32 %v151_v20, %v151_v20  ;;  %v127_v58 = vld [vmem:[%s422_s11 + $0x70] sm:$0xff]  ;;  %v128_v0 = vld [vmem:[%s422_s11 + $0x78] sm:$0xff]  ;;  %v129_v6 = vld [vmem:[%s422_s11 + $0x80] sm:$0xff] }
  0x17   : > { %v242_v22 = vsel %vm241_vm0, %v209_v13, 0.0  ;;  %v243_v23 = vsel %vm241_vm0, %v210_v14, 0.0  ;;  %v213_v33 = vmul.f32 %v181_v21, %v149_v12  ;;  %v154_v35 = vmax.f32 %v122_v28, 1e-06  ;;  %v130_v12 = vld [vmem:[%s422_s11 + $0x88] sm:$0xff]  ;;  %v131_v18 = vld [vmem:[%s422_s11 + $0x90] sm:$0xff] }
  0x18   : > { %v244_v30 = vadd.f32 %v243_v23, %v242_v22  ;;  %v184_v36 = vmul.f32 %v152_v25, %v152_v25  ;;  %v214_v37 = vmul.f32 %v182_v26, %v150_v16  ;;  %v245_v38 = vsel %vm241_vm0, %v211_v27, 0.0  ;;  %v132_v24 = vld [vmem:[%s422_s11 + $0x98] sm:$0xff] }
  0x19   : > { %v247_v41 = vsel %vm241_vm0, %v212_v29, 0.0  ;;  %v155_v42 = vmax.f32 %v123_v34, 1e-06  ;;  %v185_v43 = vmul.f32 %v153_v31, %v153_v31  ;;  %v215_v44 = vmul.f32 %v183_v32, %v151_v20 }
  0x1a   : > { %v246_v40 = vadd.f32 %v245_v38, %v244_v30  ;;  %v249_v45 = vsel %vm241_vm0, %v213_v33, 0.0  ;;  %v156_v48 = vmax.f32 %v124_v39, 1e-06  ;;  %v186_v49 = vmul.f32 %v154_v35, %v154_v35  ;;  %v133_v30 = vld [vmem:[%s422_s11 + $0xa0] sm:$0xff] }
  0x1b   : > { %v216_v50 = vmul.f32 %v184_v36, %v152_v25  ;;  %v251_v51 = vsel %vm241_vm0, %v214_v37, 0.0  ;;  %v157_v54 = vmax.f32 %v125_v46, 1e-06  ;;  %v187_v55 = vmul.f32 %v155_v42, %v155_v42  ;;  %v134_v36 = vld [vmem:[%s422_s11 + $0xa8] sm:$0xff] }
  0x1c   : > { %v248_v47 = vadd.f32 %v247_v41, %v246_v40  ;;  %v217_v56 = vmul.f32 %v185_v43, %v153_v31  ;;  %v253_v57 = vsel %vm241_vm0, %v215_v44, 0.0  ;;  %v158_v60 = vmax.f32 %v126_v52, 1e-06 }
  0x1d   : > { %v188_v61 = vmul.f32 %v156_v48, %v156_v48  ;;  %v218_v62 = vmul.f32 %v186_v49, %v154_v35  ;;  %v255_v63 = vsel %vm241_vm0, %v216_v50, 0.0  ;;  %v159_v2 = vmax.f32 %v127_v58, 1e-06 }
  0x1e   : > { %v250_v53 = vadd.f32 %v249_v45, %v248_v47  ;;  %v189_v3 = vmul.f32 %v157_v54, %v157_v54  ;;  %v219_v4 = vmul.f32 %v187_v55, %v155_v42  ;;  %v257_v5 = vsel %vm241_vm0, %v217_v56, 0.0  ;;  %v135_v42 = vld [vmem:[%s422_s11 + $0xb0] sm:$0xff] }
  0x1f   : > { %v160_v8 = vmax.f32 %v128_v0, 1e-06  ;;  %v190_v9 = vmul.f32 %v158_v60, %v158_v60  ;;  %v220_v10 = vmul.f32 %v188_v61, %v156_v48  ;;  %v259_v11 = vsel %vm241_vm0, %v218_v62, 0.0  ;;  %v136_v48 = vld [vmem:[%s422_s11 + $0xb8] sm:$0xff] }
  0x20   : > { %v252_v59 = vadd.f32 %v251_v51, %v250_v53  ;;  %v161_v14 = vmax.f32 %v129_v6, 1e-06  ;;  %v191_v15 = vmul.f32 %v159_v2, %v159_v2  ;;  %v221_v16 = vmul.f32 %v189_v3, %v157_v54  ;;  %v137_v54 = vld [vmem:[%s422_s11 + $0xc0] sm:$0xff] }
  0x21   : > { %v261_v17 = vsel %vm241_vm0, %v219_v4, 0.0  ;;  %v162_v20 = vmax.f32 %v130_v12, 1e-06  ;;  %v192_v21 = vmul.f32 %v160_v8, %v160_v8  ;;  %v222_v22 = vmul.f32 %v190_v9, %v158_v60  ;;  %v138_v60 = vld [vmem:[%s422_s11 + $0xc8] sm:$0xff] }
  0x22   : > { %v254_v1 = vadd.f32 %v253_v57, %v252_v59  ;;  %v263_v23 = vsel %vm241_vm0, %v220_v10, 0.0  ;;  %v163_v26 = vmax.f32 %v131_v18, 1e-06  ;;  %v193_v27 = vmul.f32 %v161_v14, %v161_v14 }
  0x23   : > { %v223_v28 = vmul.f32 %v191_v15, %v159_v2  ;;  %v265_v29 = vsel %vm241_vm0, %v221_v16, 0.0  ;;  %v164_v32 = vmax.f32 %v132_v24, 1e-06  ;;  %v194_v33 = vmul.f32 %v162_v20, %v162_v20  ;;  %v139_v2 = vld [vmem:[%s422_s11 + $0xd0] sm:$0xff] }
  0x24   : > { %v256_v7 = vadd.f32 %v255_v63, %v254_v1  ;;  %v224_v34 = vmul.f32 %v192_v21, %v160_v8  ;;  %v267_v35 = vsel %vm241_vm0, %v222_v22, 0.0  ;;  %v165_v38 = vmax.f32 %v133_v30, 1e-06  ;;  %v140_v8 = vld [vmem:[%s422_s11 + $0xd8] sm:$0xff] }
  0x25   : > { %v195_v39 = vmul.f32 %v163_v26, %v163_v26  ;;  %v225_v40 = vmul.f32 %v193_v27, %v161_v14  ;;  %v269_v41 = vsel %vm241_vm0, %v223_v28, 0.0  ;;  %v166_v44 = vmax.f32 %v134_v36, 1e-06  ;;  %v141_v14 = vld [vmem:[%s422_s11 + $0xe0] sm:$0xff] }
  0x26   : > { %v258_v13 = vadd.f32 %v257_v5, %v256_v7  ;;  %v196_v45 = vmul.f32 %v164_v32, %v164_v32  ;;  %v226_v46 = vmul.f32 %v194_v33, %v162_v20  ;;  %v271_v47 = vsel %vm241_vm0, %v224_v34, 0.0  ;;  %v142_v20 = vld [vmem:[%s422_s11 + $0xe8] sm:$0xff] }
  0x27   : > { %v167_v50 = vmax.f32 %v135_v42, 1e-06  ;;  %v197_v51 = vmul.f32 %v165_v38, %v165_v38  ;;  %v227_v52 = vmul.f32 %v195_v39, %v163_v26  ;;  %v273_v53 = vsel %vm241_vm0, %v225_v40, 0.0  ;;  %v143_v26 = vld [vmem:[%s422_s11 + $0xf0] sm:$0xff] }
  0x28   : > { %v260_v19 = vadd.f32 %v259_v11, %v258_v13  ;;  %v168_v56 = vmax.f32 %v136_v48, 1e-06  ;;  %v198_v57 = vmul.f32 %v166_v44, %v166_v44  ;;  %v228_v58 = vmul.f32 %v196_v45, %v164_v32  ;;  %v144_v32 = vld [vmem:[%s422_s11 + $0xf8] sm:$0xff] }
  0x29   : > { %v275_v59 = vsel %vm241_vm0, %v226_v46, 0.0  ;;  %v169_v62 = vmax.f32 %v137_v54, 1e-06  ;;  %v199_v63 = vmul.f32 %v167_v50, %v167_v50  ;;  %v229_v0 = vmul.f32 %v197_v51, %v165_v38 }
  0x2a   : > { %v262_v25 = vadd.f32 %v261_v17, %v260_v19  ;;  %v277_v1 = vsel %vm241_vm0, %v227_v52, 0.0  ;;  %v170_v4 = vmax.f32 %v138_v60, 1e-06  ;;  %v200_v5 = vmul.f32 %v168_v56, %v168_v56 }
  0x2b   : > { %v230_v6 = vmul.f32 %v198_v57, %v166_v44  ;;  %v279_v7 = vsel %vm241_vm0, %v228_v58, 0.0  ;;  %v171_v10 = vmax.f32 %v139_v2, 1e-06  ;;  %v201_v11 = vmul.f32 %v169_v62, %v169_v62 }
  0x2c   : > { %v264_v31 = vadd.f32 %v263_v23, %v262_v25  ;;  %v231_v12 = vmul.f32 %v199_v63, %v167_v50  ;;  %v281_v13 = vsel %vm241_vm0, %v229_v0, 0.0  ;;  %v172_v16 = vmax.f32 %v140_v8, 1e-06 }
  0x2d   : > { %v202_v17 = vmul.f32 %v170_v4, %v170_v4  ;;  %v232_v18 = vmul.f32 %v200_v5, %v168_v56  ;;  %v283_v19 = vsel %vm241_vm0, %v230_v6, 0.0  ;;  %v173_v22 = vmax.f32 %v141_v14, 1e-06 }
  0x2e   : > { %v266_v37 = vadd.f32 %v265_v29, %v264_v31  ;;  %v203_v23 = vmul.f32 %v171_v10, %v171_v10  ;;  %v233_v24 = vmul.f32 %v201_v11, %v169_v62  ;;  %v285_v25 = vsel %vm241_vm0, %v231_v12, 0.0 }
  0x2f   : > { %v174_v28 = vmax.f32 %v142_v20, 1e-06  ;;  %v204_v29 = vmul.f32 %v172_v16, %v172_v16  ;;  %v234_v30 = vmul.f32 %v202_v17, %v170_v4  ;;  %v287_v31 = vsel %vm241_vm0, %v232_v18, 0.0 }
  0x30   : > { %v268_v43 = vadd.f32 %v267_v35, %v266_v37  ;;  %v175_v34 = vmax.f32 %v143_v26, 1e-06  ;;  %v205_v35 = vmul.f32 %v173_v22, %v173_v22  ;;  %v235_v36 = vmul.f32 %v203_v23, %v171_v10 }
  0x31   : > { %v289_v37 = vsel %vm241_vm0, %v233_v24, 0.0  ;;  %v176_v39 = vmax.f32 %v144_v32, 1e-06  ;;  %v206_v40 = vmul.f32 %v174_v28, %v174_v28  ;;  %v291_v42 = vsel %vm241_vm0, %v234_v30, 0.0 }
  0x32   : > { %v270_v49 = vadd.f32 %v269_v41, %v268_v43  ;;  %v236_v41 = vmul.f32 %v204_v29, %v172_v16  ;;  %v207_v44 = vmul.f32 %v175_v34, %v175_v34  ;;  %v237_v45 = vmul.f32 %v205_v35, %v173_v22 }
  0x33   : > { %v293_v46 = vsel %vm241_vm0, %v235_v36, 0.0  ;;  %v208_v48 = vmul.f32 %v176_v39, %v176_v39 }
  0x34   : > { %v272_v55 = vadd.f32 %v271_v47, %v270_v49  ;;  %v238_v49 = vmul.f32 %v206_v40, %v174_v28  ;;  %v295_v50 = vsel %vm241_vm0, %v236_v41, 0.0  ;;  %v239_v52 = vmul.f32 %v207_v44, %v175_v34 }
  0x36   : > { %v274_v61 = vadd.f32 %v273_v53, %v272_v55  ;;  %v297_v53 = vsel %vm241_vm0, %v237_v45, 0.0  ;;  %v240_v55 = vmul.f32 %v208_v48, %v176_v39  ;;  %v299_v56 = vsel %vm241_vm0, %v238_v49, 0.0 }
  0x37   : > { %v301_v58 = vsel %vm241_vm0, %v239_v52, 0.0 }
  0x38   : > { %v276_v3 = vadd.f32 %v275_v59, %v274_v61  ;;  %v303_v60 = vsel %vm241_vm0, %v240_v55, 0.0 }
  0x3a   : > { %v278_v9 = vadd.f32 %v277_v1, %v276_v3 }
  0x3c   : > { %v280_v15 = vadd.f32 %v279_v7, %v278_v9 }
  0x3e   : > { %v282_v21 = vadd.f32 %v281_v13, %v280_v15 }
  0x40   : > { %v284_v27 = vadd.f32 %v283_v19, %v282_v21 }
  0x42   : > { %v286_v33 = vadd.f32 %v285_v25, %v284_v27 }
  0x44   : > { %v288_v38 = vadd.f32 %v287_v31, %v286_v33 }
  0x46   : > { %v290_v43 = vadd.f32 %v289_v37, %v288_v38 }
  0x48   : > { %v292_v47 = vadd.f32 %v291_v42, %v290_v43 }
  0x4a   : > { %v294_v51 = vadd.f32 %v293_v46, %v292_v47 }
  0x4c   : > { %v296_v54 = vadd.f32 %v295_v50, %v294_v51 }
  0x4e   : > { %v298_v57 = vadd.f32 %v297_v53, %v296_v54 }
  0x50   : > { %v300_v59 = vadd.f32 %v299_v56, %v298_v57 }
  0x52   : > { %v302_v61 = vadd.f32 %v301_v58, %v300_v59 }
  0x54   : > { %v304_v62 = vadd.f32 %v303_v60, %v302_v61 }
  0x56   : > { %v305_v63 = vrot.slane %v304_v62, 4 }
  0x58   : > { %v306_v0 = vadd.f32 %v305_v63, %v304_v62 }
  0x5a   : > { %v307_v1 = vrot.slane %v306_v0, 2 }
  0x5c   : > { %v308_v2 = vadd.f32 %v307_v1, %v306_v0 }
  0x5e   : > { %v309_v3 = vrot.slane %v308_v2, 1 }
  0x60   : > { %v310_v4 = vadd.f32 %v309_v3, %v308_v2 }
  0x62   : > { %v312_v5 = vmul.f32 0.00390625, %v310_v4 }
  0x64   : > { %386 = vlog2.f32 %v312_v5 }
  0x6e   : > { %v387_v6 = vpop.eup %386 }
  0x6f   : > { %v314_v7 = vmul.f32 0.6931472, %v387_v6 }
  0x71   : > { %v316_v8 = vmul.f32 0.33333334, %v314_v7 }
  0x73   : > { %v317_v9 = vmul.f32 1.442695, %v316_v8 }
  0x75   : > { %388 = vpow2.f32 %v317_v9 }
  0x7f   : > { %v389_v10 = vpop.eup %388 }
  0x80   : > { %320 = vst.msk [vmem:[%s112_s14] sm:$0x1] %vm319_vm1, %v389_v10 }
  0x81 PF: > { %s11_s6 = sadd.s32 1, %s396_s6  }
  0x82   : > { %p8_p4 = scmp.ge.s32.totalorder %s11_s6, 4  }
  0x84   :  { %10 = sbr.rel (!%p8_p4) target bundleno = 1 (0x1), region = 54 }

// kernel: dolg_forward.19
= control target key start
LH: loop header
LB: loop body
LE: loop exit
PB: predicated region body
PF: predicated region fallthrough
CT: control target
= control target key end

     0   :  { %v154_v0 = vmov 0.0|0.0   ;;  %vm155_vm0 = vmmov 0   ;;  %v156_v4 = vmov 0.0   ;;  %vm30_vm1 = vcmask 523264   ;;  %s210_s1 = inlined_call_operand.vmem [shape: f32[64,128], index: 1, kind: input, shape index: {}]   ;;  %s211_s0 = inlined_call_operand.vmem [shape: f32[8,64], index: 0, kind: input, shape index: {}]   ;;  %s212_s2 = inlined_call_operand.vmem [shape: f32[1,128], index: 2, kind: input, shape index: {}]   ;;  %s213_s3 = inlined_call_operand.vmem [shape: f32[8,128], index: 3, kind: output, shape index: {}]  }
   0x1   :  { %139 = vmatprep.subr.bf16.mxu0 %v154_v0  ;;  %v15_v1 = vld [vmem:[%s210_s1] sm:$0xff]  ;;  %v16_v2 = vld [vmem:[%s210_s1 + $0x8] sm:$0xff]  ;;  %v17_v3 = vld [vmem:[%s210_s1 + $0x10] sm:$0xff]  ;;  %136 = vmatprep.mubr.msk.f32.mxu0 %vm155_vm0, %v156_v4 }
   0x2   :  { %v140_v5 = vpack.c.bf16 %v16_v2, %v15_v1  ;;  %v18_v6 = vld [vmem:[%s210_s1 + $0x18] sm:$0xff]  ;;  %v19_v8 = vld [vmem:[%s210_s1 + $0x20] sm:$0xff]  ;;  %v20_v9 = vld [vmem:[%s210_s1 + $0x28] sm:$0xff] }
   0x3   :  { %v143_v7 = vpack.c.bf16 %v18_v6, %v17_v3  ;;  %v146_v10 = vpack.c.bf16 %v20_v9, %v19_v8  ;;  %v21_v11 = vld [vmem:[%s210_s1 + $0x30] sm:$0xff]  ;;  %v22_v12 = vld [vmem:[%s210_s1 + $0x38] sm:$0xff]  ;;  %v14_v14 = vld [vmem:[%s211_s0] sm:$0xff] }
   0x4   :  { %141 = vmatpush3.bf16.msra.mxu0 %v140_v5  ;;  %v149_v13 = vpack.c.bf16 %v22_v12, %v21_v11  ;;  %v109_v15 = vld [vmem:[%s212_s2] ss:$0 sm:$0xff] }
   0x5   :  { %142 = vmatprep.subr.bf16.mxu0 %v154_v0 }
   0x8   :  { %144 = vmatpush3.bf16.msra.mxu0 %v143_v7 }
   0x9   :  { %145 = vmatprep.subr.bf16.mxu0 %v154_v0 }
   0xc   :  { %147 = vmatpush3.bf16.msra.mxu0 %v146_v10 }
   0xd   :  { %148 = vmatprep.subr.bf16.mxu0 %v154_v0 }
  0x10   :  { %150 = vmatpush3.bf16.msra.mxu0 %v149_v13 }
  0x13   :  { %137 = vmatmul.mubr.msk.f32.vlgmr.msra.gmra.mrb[0].mxu0 %vm30_vm1, %v14_v14 }
  0xe6   :  { %v100_v16 = vpop.f32.mrb[0].mxu0 }
  0xe7   :  { %v101_v17 = vadd.f32 %v109_v15, %v100_v16  ;;  %v138_v18 = vpop.f32.mrb[1].mxu0 }
  0xe9   :  { %104 = vst [vmem:[%s213_s3] sm:$0xff] %v101_v17 }

// kernel: dolg_forward.20
= control target key start
LH: loop header
LB: loop body
LE: loop exit
PB: predicated region body
PF: predicated region fallthrough
CT: control target
= control target key end

     0   :  { %s315_s9 = smov 0   ;;  %s349_s0 = inlined_call_operand.vmem [shape: f32[2,64,128], index: 0, kind: input, shape index: {}]   ;;  %s350_s1 = inlined_call_operand.vmem [shape: f32[2,1,128], index: 1, kind: input, shape index: {}]   ;;  %s351_s2 = inlined_call_operand.vmem [shape: f32[2,1,256], index: 2, kind: output, shape index: {}]  }
   0x1 LB: > { %s269_s10 = sadd.s32 4294967295, %s298_s9   ;;  %p273_p0 = scmp.ge.s32.totalorder %s298_s9, 1  ;;  %s298_s9 = sphi %s315_s9, %s12_s9  }
   0x2   : > { %p120_p1 = scmp.lt.s32.totalorder %s298_s9, 3 }
   0x4   : > { %p121_p2 = pnand %p273_p0, %p120_p1 }
   0x5   : > { %p144_p3 = scmp.lt.s32.totalorder (!%p121_p2), %s269_s10, 1  ;;  %v201_v0 = vlaneseq (!%p121_p2)  ;;  %vm166_vm1 = vcmask (!%p121_p2), 1040384  }
   0x6   : > { %124 = sbr.rel (%p121_p2) target bundleno = 341 (0x155), region = 28 }
   0x7   : > { %vm323_vm0 = vcmp.lt.s32.totalorder (!%p121_p2), %v201_v0, 128 }
   0xd   : > { %s355_s10 = smov (!%p144_p3, %s269_s10), 1 }
   0xe   : > { %s151_s13 = scalar_lea.vmem %s350_s1, %s355_s10  ;;  %s276_s14 = sshll.u32 %s355_s10, 1 }
   0xf   : > { %s333_s17 = scalar_lea.vmem %s351_s2, %s276_s14  ;;  %v164_v2 = vld [vmem:[%s151_s13] sm:$0x1]  ;;  %s279_s18 = sshll.u32 %s355_s10, 6 }
  0x10   : > { %v165_v3 = vmul.f32 %v164_v2, %v164_v2  ;;  %205 = vst.msk [vmem:[%s333_s17] sm:$0x1] %vm323_vm0, %v164_v2  ;;  %s148_s21 = scalar_lea.vmem %s349_s0, %s279_s18 }
  0x11   : > { %v156_v5 = vld [vmem:[%s148_s21] sm:$0xff]  ;;  %v157_v6 = vld [vmem:[%s148_s21 + $0x8] sm:$0xff]  ;;  %v158_v8 = vld [vmem:[%s148_s21 + $0x10] sm:$0xff] }
  0x12   : > { %v167_v4 = vsel %vm166_vm1, %v165_v3, 0.0  ;;  %v180_v7 = vadd.f32 %v157_v6, %v156_v5  ;;  %v159_v10 = vld [vmem:[%s148_s21 + $0x18] sm:$0xff]  ;;  %v160_v12 = vld [vmem:[%s148_s21 + $0x20] sm:$0xff]  ;;  %v161_v14 = vld [vmem:[%s148_s21 + $0x28] sm:$0xff] }
  0x13   : > { %168 = vadd.xlane.f32.xlu0 %v167_v4  ;;  %v162_v16 = vld [vmem:[%s148_s21 + $0x30] sm:$0xff]  ;;  %v163_v18 = vld [vmem:[%s148_s21 + $0x38] sm:$0xff] }
  0x14   : > { %v181_v9 = vadd.f32 %v180_v7, %v158_v8 }
  0x16   : > { %v182_v11 = vadd.f32 %v181_v9, %v159_v10 }
  0x18   : > { %v183_v13 = vadd.f32 %v182_v11, %v160_v12 }
  0x1a   : > { %v184_v15 = vadd.f32 %v183_v13, %v161_v14 }
  0x1c   : > { %v185_v17 = vadd.f32 %v184_v15, %v162_v16 }
  0x1e   : > { %v186_v19 = vadd.f32 %v185_v17, %v163_v18 }
  0x20   : > { %v187_v21 = vrot.slane %v186_v19, 4 }
  0x22   : > { %v188_v22 = vadd.f32 %v187_v21, %v186_v19 }
  0x24   : > { %v189_v24 = vrot.slane %v188_v22, 2 }
  0x26   : > { %v190_v29 = vadd.f32 %v189_v24, %v188_v22 }
  0x28   : > { %v191_v31 = vrot.slane %v190_v29, 1 }
  0x2a   : > { %v192_v32 = vadd.f32 %v191_v31, %v190_v29 }
  0x2c   : > { %v194_v33 = vmul.f32 0.015625, %v192_v32 }
  0xa0   : > { %v169_v20 = vpop.xlane.xlu0 %168 }
  0xa1   : > { %288 = vrsqrt.f32 %v169_v20  ;;  %vm172_vm2 = vcmp.eq.f32.partialorder %v169_v20, inf  ;;  %v175_v26 = vand.u32 2147483648, %v169_v20  ;;  %vm174_vm3 = vcmp.eq.f32.partialorder %v169_v20, 0.0 }
  0xab   : > { %v289_v23 = vpop.eup %288 }
  0xac   : > { %v171_v25 = vmul.f32 %v289_v23, %v169_v20 }
  0xae   : > { %v173_v27 = vsel %vm172_vm2, %v169_v20, %v171_v25 }
  0xaf   : > { %v176_v28 = vsel %vm174_vm3, %v175_v26, %v173_v27 }
  0xb0   : > { %v177_v30 = vadd.f32 1e-06, %v176_v28 }
  0xb2   : > { %290 = vrcp.f32 %v177_v30 }
  0xbc   : > { %v291_v34 = vpop.eup %290 }
  0xbd   : > { %v179_v35 = vmul.f32 %v291_v34, %v164_v2 }
  0xbf   : > { %v195_v36 = vmul.f32 %v194_v33, %v179_v35 }
  0xc1   : > { %v196_v37 = vsel %vm166_vm1, %v195_v36, 0.0 }
  0xc2   : > { %197 = vadd.xlane.f32.xlu0 %v196_v37 }
 0x14f   : > { %v198_v38 = vpop.xlane.xlu0 %197 }
 0x150   : > { %v199_v39 = vmul.f32 %v198_v38, %v179_v35 }
 0x152   : > { %v200_v40 = vsub.f32 %v194_v33, %v199_v39 }
 0x154   : > { %206 = vst.msk [vmem:[%s333_s17 + $0x1] sm:$0x1] %vm323_vm0, %v200_v40 }
 0x155 PF: > { %s12_s9 = sadd.s32 1, %s298_s9  }
 0x156   : > { %p9_p4 = scmp.ge.s32.totalorder %s12_s9, 4  }
 0x158   :  { %11 = sbr.rel (!%p9_p4) target bundleno = 1 (0x1), region = 61 }

// kernel: dolg_forward.21
= control target key start
LH: loop header
LB: loop body
LE: loop exit
PB: predicated region body
PF: predicated region fallthrough
CT: control target
= control target key end

     0   :  { %vm125_vm0 = vcmask 523264   ;;  %s327_s1 = inlined_call_operand.vmem [shape: f32[256,64], index: 1, kind: input, shape index: {}]   ;;  %s328_s0 = inlined_call_operand.vmem [shape: f32[8,256], index: 0, kind: input, shape index: {}]   ;;  %s329_s2 = inlined_call_operand.vmem [shape: f32[1,64], index: 2, kind: input, shape index: {}]   ;;  %s330_s3 = inlined_call_operand.vmem [shape: f32[8,64], index: 3, kind: output, shape index: {}]  }
   0x1   :  { %v32_v0 = vld [vmem:[%s327_s1 + $0x80] sm:$0xff]  ;;  %v33_v1 = vld [vmem:[%s327_s1 + $0x88] sm:$0xff]  ;;  %v34_v5 = vld [vmem:[%s327_s1 + $0x90] sm:$0xff] }
   0x2   :  { %v16_v2 = vld [vmem:[%s327_s1] sm:$0xff]  ;;  %v167_v3 = vpack.c.bf16 %v33_v1, %v32_v0  ;;  %v17_v4 = vld [vmem:[%s327_s1 + $0x8] sm:$0xff]  ;;  %v35_v6 = vld [vmem:[%s327_s1 + $0x98] sm:$0xff] }
   0x3   :  { %v169_v7 = vpack.c.bf16 %v17_v4, %v16_v2  ;;  %v171_v8 = vpack.c.bf16 %v35_v6, %v34_v5  ;;  %v18_v9 = vld [vmem:[%s327_s1 + $0x10] sm:$0xff]  ;;  %v19_v10 = vld [vmem:[%s327_s1 + $0x18] sm:$0xff]  ;;  %v36_v11 = vld [vmem:[%s327_s1 + $0xa0] sm:$0xff] }
   0x4   :  { %168 = vmatprep.subr.bf16.mxu0 %v167_v3  ;;  %v37_v12 = vld [vmem:[%s327_s1 + $0xa8] sm:$0xff]  ;;  %v173_v13 = vpack.c.bf16 %v19_v10, %v18_v9  ;;  %v20_v15 = vld [vmem:[%s327_s1 + $0x20] sm:$0xff]  ;;  %v38_v17 = vld [vmem:[%s327_s1 + $0xb0] sm:$0xff] }
   0x5   :  { %170 = vmatpush3.bf16.msra.mxu0 %v169_v7  ;;  %v175_v14 = vpack.c.bf16 %v37_v12, %v36_v11  ;;  %v21_v16 = vld [vmem:[%s327_s1 + $0x28] sm:$0xff]  ;;  %v39_v18 = vld [vmem:[%s327_s1 + $0xb8] sm:$0xff]  ;;  %v22_v21 = vld [vmem:[%s327_s1 + $0x30] sm:$0xff] }
   0x6   :  { %172 = vmatprep.subr.bf16.mxu0 %v171_v8  ;;  %v177_v19 = vpack.c.bf16 %v21_v16, %v20_v15  ;;  %v179_v20 = vpack.c.bf16 %v39_v18, %v38_v17  ;;  %v23_v22 = vld [vmem:[%s327_s1 + $0x38] sm:$0xff]  ;;  %v40_v23 = vld [vmem:[%s327_s1 + $0xc0] sm:$0xff]  ;;  %v41_v24 = vld [vmem:[%s327_s1 + $0xc8] sm:$0xff] }
   0x7   :  { %v15_v25 = vld [vmem:[%s328_s0 + $0x8] sm:$0xff]  ;;  %v181_v26 = vpack.c.bf16 %v23_v22, %v22_v21  ;;  %v183_v27 = vpack.c.bf16 %v41_v24, %v40_v23  ;;  %v24_v28 = vld [vmem:[%s327_s1 + $0x40] sm:$0xff]  ;;  %v42_v30 = vld [vmem:[%s327_s1 + $0xd0] sm:$0xff] }
   0x8   :  { %119 = vmatprep.mubr.f32.mxu0 %v15_v25  ;;  %v25_v29 = vld [vmem:[%s327_s1 + $0x48] sm:$0xff]  ;;  %v43_v31 = vld [vmem:[%s327_s1 + $0xd8] sm:$0xff]  ;;  %v26_v34 = vld [vmem:[%s327_s1 + $0x50] sm:$0xff] }
   0x9   :  { %174 = vmatpush3.bf16.msra.mxu0 %v173_v13  ;;  %v185_v32 = vpack.c.bf16 %v25_v29, %v24_v28  ;;  %v187_v33 = vpack.c.bf16 %v43_v31, %v42_v30  ;;  %v27_v35 = vld [vmem:[%s327_s1 + $0x58] sm:$0xff]  ;;  %v44_v36 = vld [vmem:[%s327_s1 + $0xe0] sm:$0xff]  ;;  %v45_v37 = vld [vmem:[%s327_s1 + $0xe8] sm:$0xff] }
   0xa   :  { %176 = vmatprep.subr.bf16.mxu0 %v175_v14  ;;  %v189_v38 = vpack.c.bf16 %v27_v35, %v26_v34  ;;  %v191_v39 = vpack.c.bf16 %v45_v37, %v44_v36  ;;  %v28_v40 = vld [vmem:[%s327_s1 + $0x60] sm:$0xff]  ;;  %v29_v41 = vld [vmem:[%s327_s1 + $0x68] sm:$0xff]  ;;  %v46_v42 = vld [vmem:[%s327_s1 + $0xf0] sm:$0xff] }
   0xb   :  { %v47_v43 = vld [vmem:[%s327_s1 + $0xf8] sm:$0xff]  ;;  %v193_v44 = vpack.c.bf16 %v29_v41, %v28_v40  ;;  %v30_v46 = vld [vmem:[%s327_s1 + $0x70] sm:$0xff]  ;;  %v14_v49 = vld [vmem:[%s328_s0] sm:$0xff] }
   0xc   :  { %v195_v45 = vpack.c.bf16 %v47_v43, %v46_v42  ;;  %v31_v47 = vld [vmem:[%s327_s1 + $0x78] sm:$0xff]  ;;  %v131_v51 = vld [vmem:[%s329_s2] ss:$0 sm:$0xff] }
   0xd   :  { %178 = vmatpush3.bf16.msra.mxu0 %v177_v19  ;;  %v197_v48 = vpack.c.bf16 %v31_v47, %v30_v46 }
   0xe   :  { %180 = vmatprep.subr.bf16.mxu0 %v179_v20 }
  0x11   :  { %182 = vmatpush3.bf16.msra.mxu0 %v181_v26 }
  0x12   :  { %184 = vmatprep.subr.bf16.mxu0 %v183_v27 }
  0x15   :  { %186 = vmatpush3.bf16.msra.mxu0 %v185_v32 }
  0x16   :  { %188 = vmatprep.subr.bf16.mxu0 %v187_v33 }
  0x19   :  { %190 = vmatpush3.bf16.msra.mxu0 %v189_v38 }
  0x1a   :  { %192 = vmatprep.subr.bf16.mxu0 %v191_v39 }
  0x1d   :  { %194 = vmatpush3.bf16.msra.mxu0 %v193_v44 }
  0x1e   :  { %196 = vmatprep.subr.bf16.mxu0 %v195_v45 }
  0x21   :  { %198 = vmatpush3.bf16.msra.mxu0 %v197_v48 }
  0x24   :  { %120 = vmatmul.mubr.f32.vlgmr.msra.gmra.mrb[0].mxu0 %v14_v49 }
  0xf7   :  { %v164_v50 = vpop.f32.mrb[0].mxu0 }
  0xf8   :  { %v165_v52 = vpop.f32.mrb[1].mxu0 }
  0xf9   :  { %v166_v53 = vadd.f32 %v165_v52, %v164_v50 }
  0xfb   :  { %v122_v54 = vadd.f32 %v166_v53, %v131_v51 }
  0xfd   :  { %126 = vst.msk [vmem:[%s330_s3] sm:$0xff] %vm125_vm0, %v122_v54 }

</bundles_post_ra>
